<compile_context>
chip_gen: v7x
topology: tpu7x:2x2x1
jax: 0.10.0
libtpu: 0.0.40
codegen_flags: <defaults>
</compile_context>

<pallas_src>
import jax
import jax.numpy as jnp
from jax.experimental import pallas as pl
from jax.experimental.pallas import tpu as pltpu

BN_EPS = 1e-5


# ------------------------------ fused kernel -------------------------------

def fused_eeg_kernel(x_ref, w1_ref, s1_ref, t1_ref,
                     w2_ref, s2_ref, t2_ref,
                     w3_ref, s3_ref, t3_ref,
                     wih1_ref, whh1_ref, b1_ref,
                     wih2_ref, whh2_ref, b2_ref,
                     fw1_ref, fb1_ref, fw2_ref, fb2_ref,
                     out_ref,
                     y1buf, y2buf, y3buf, xseqbuf, gxbuf):
    """Whole EEG_Model forward pass; every intermediate stays in VMEM."""
    f32, bf16 = jnp.float32, jnp.bfloat16
    B = out_ref.shape[0]
    Cin = x_ref.shape[1]
    L = x_ref.shape[0] // B
    C1, C2, C3 = y1buf.shape[1], y2buf.shape[1], y3buf.shape[1]
    L1, L2, L3 = y1buf.shape[0] // B, y2buf.shape[0] // B, y3buf.shape[0] // B
    T = xseqbuf.shape[0] // B
    K1 = w1_ref.shape[0] // Cin
    K2 = w2_ref.shape[0] // C1
    K3 = w3_ref.shape[0] // C2
    H1 = whh1_ref.shape[0]
    H2p = whh2_ref.shape[1] // 4          # padded LSTM2 hidden (=128)
    ST1 = 2                               # conv1 stride (fixed by the model)

    def sigm(v):
        # logistic via a single EUP tanh (sigmoid = exp + recip = 2 EUP pushes)
        return 0.5 * jnp.tanh(0.5 * v) + 0.5

    def conv_accum(tap_fn, k_taps, w_ref, cblk):
        # conv as K accumulated MXU dots; bf16 operands, f32 accumulation.
        acc = jnp.dot(tap_fn(0).astype(bf16), w_ref[0:cblk, :],
                      preferred_element_type=f32)
        for k in range(1, k_taps):
            acc = acc + jnp.dot(tap_fn(k).astype(bf16),
                                w_ref[k * cblk:(k + 1) * cblk, :],
                                preferred_element_type=f32)
        return acc

    # ---- conv1 (stride 2) + bn1 + relu: K1 strided-tap dots per batch ----
    for b in range(B):
        y1buf[b * L1:(b + 1) * L1, :] = jnp.maximum(
            conv_accum(lambda k: x_ref[pl.ds(b * L + k, L1, stride=ST1), :],
                       K1, w1_ref, Cin) * s1_ref[...] + t1_ref[...], 0.0)

    # ---- pool1 fused into conv2 tap reads; conv2 + bn2 + relu ----
    for b in range(B):
        def tap2(k, b=b):
            return jnp.maximum(
                y1buf[pl.ds(b * L1 + 2 * k, L2, stride=2), :],
                y1buf[pl.ds(b * L1 + 2 * k + 1, L2, stride=2), :])
        y2buf[b * L2:(b + 1) * L2, :] = jnp.maximum(
            conv_accum(tap2, K2, w2_ref, C1) * s2_ref[...] + t2_ref[...], 0.0)

    # ---- pool2 fused into conv3 tap reads; conv3 + bn3 + relu ----
    for b in range(B):
        def tap3(k, b=b):
            return jnp.maximum(
                y2buf[pl.ds(b * L2 + 2 * k, L3, stride=2), :],
                y2buf[pl.ds(b * L2 + 2 * k + 1, L3, stride=2), :])
        y3buf[b * L3:(b + 1) * L3, :] = jnp.maximum(
            conv_accum(tap3, K3, w3_ref, C2) * s3_ref[...] + t3_ref[...], 0.0)

    # ---- pool3 -> LSTM input, TIME-MAJOR rows (t*B + b): per-step reads in
    #      the recurrence become contiguous aligned loads ----
    for t in range(T):
        xseqbuf[t * B:(t + 1) * B, :] = jnp.maximum(
            y3buf[pl.ds(2 * t, B, stride=L3), :],
            y3buf[pl.ds(2 * t + 1, B, stride=L3), :])

    # ---- LSTM1 input projection hoisted out of the recurrence (1 matmul) ----
    gxbuf[...] = jnp.dot(xseqbuf[...].astype(bf16), wih1_ref[...],
                         preferred_element_type=f32) + b1_ref[...]

    # hoist weight loads out of the time loop
    whh1 = whh1_ref[...]
    wih2 = wih2_ref[...]
    whh2 = whh2_ref[...]
    b2 = b2_ref[...]

    h1 = jnp.zeros((B, H1), f32)
    c1 = jnp.zeros((B, H1), f32)
    h2 = jnp.zeros((B, H2p), f32)
    c2 = jnp.zeros((B, H2p), f32)

    # LSTM1 + LSTM2 fused in one short static time loop; only the final h2 is
    # needed, so the hidden sequences never leave registers/VMEM.
    for t in range(T):
        # LSTM2 recurrent dot depends only on h2_{t-1}: issue its MXU push
        # first so it overlaps LSTM1's EUP/VPU gate work.
        g2h = jnp.dot(h2.astype(bf16), whh2, preferred_element_type=f32)

        # LSTM1 step: hoisted x-gates (contiguous time-major rows) + h1 @ Whh1
        g1 = gxbuf[t * B:(t + 1) * B, :] + jnp.dot(
            h1.astype(bf16), whh1, preferred_element_type=f32)
        i1 = sigm(g1[:, 0:H1])
        f1 = sigm(g1[:, H1:2 * H1])
        gg1 = jnp.tanh(g1[:, 2 * H1:3 * H1])
        o1 = sigm(g1[:, 3 * H1:4 * H1])
        c1 = f1 * c1 + i1 * gg1
        h1 = o1 * jnp.tanh(c1)

        # LSTM2 step: split dot (no concat), gate slices are full 128-lane tiles
        g2 = g2h + b2 + jnp.dot(h1.astype(bf16), wih2,
                                preferred_element_type=f32)
        i2 = sigm(g2[:, 0:H2p])
        f2 = sigm(g2[:, H2p:2 * H2p])
        gg2 = jnp.tanh(g2[:, 2 * H2p:3 * H2p])
        o2 = sigm(g2[:, 3 * H2p:4 * H2p])
        c2 = f2 * c2 + i2 * gg2
        h2 = o2 * jnp.tanh(c2)

    # ---- head: fc1 + ReLU + (Dropout = identity in eval) + fc2, fused ----
    hfc = jnp.maximum(
        jnp.dot(h2.astype(bf16), fw1_ref[...], preferred_element_type=f32)
        + fb1_ref[...], 0.0)
    out_ref[...] = jnp.dot(hfc.astype(bf16), fw2_ref[...],
                           preferred_element_type=f32) + fb2_ref[...]


# ----------------------------- wrapper / glue -------------------------------

@jax.jit
def eeg_forward(x_ncl, params):
    """x_ncl: (B, 4, L) NCL like the PyTorch module; returns (B, 5) float32."""
    B, Cin, L = x_ncl.shape
    K1, ST1, K2, K3 = 5, 2, 3, 3
    L1 = (L - K1) // ST1 + 1
    L1p = L1 // 2
    L2 = L1p - K2 + 1
    L2p = L2 // 2
    L3 = L2p - K3 + 1
    T = L3 // 2

    # Only layout glue: NCL -> flat channels-last rows (b*L + l, Cin).
    # conv1's strided im2col happens in-kernel with strided ref reads.
    xflat = jnp.transpose(x_ncl, (0, 2, 1)).reshape(B * L, Cin).astype(jnp.float32)

    w1, s1, t1 = params['conv1']
    w2, s2, t2 = params['conv2']
    w3, s3, t3 = params['conv3']
    wih1, whh1, b1 = params['lstm1']
    wih2, whh2, b2 = params['lstm2']
    fw1, fb1, fw2, fb2 = params['fc']
    C1, C2, C3 = w1.shape[1], w2.shape[1], w3.shape[1]
    H1 = whh1.shape[0]
    H2p = whh2.shape[0]                 # padded LSTM2 hidden (=128)
    Dfc = fw1.shape[1]
    n_cls = fw2.shape[1]

    flops = 2 * (B * L1 * K1 * Cin * C1
                 + B * L2 * K2 * C1 * C2
                 + B * L3 * K3 * C2 * C3
                 + B * T * C3 * 4 * H1
                 + T * B * (H1 * 4 * H1 + H1 * 4 * H2p + H2p * 4 * H2p)
                 + B * (H2p * Dfc + Dfc * n_cls))
    transcendentals = T * B * (5 * H1 + 5 * H2p)
    inputs = (xflat, w1, s1, t1, w2, s2, t2, w3, s3, t3,
              wih1, whh1, b1, wih2, whh2, b2, fw1, fb1, fw2, fb2)
    bytes_accessed = int(sum(a.size * a.dtype.itemsize for a in inputs)
                         + B * n_cls * 4)

    vmem = pl.BlockSpec(memory_space=pltpu.MemorySpace.VMEM)
    return pl.pallas_call(
        fused_eeg_kernel,
        out_shape=jax.ShapeDtypeStruct((B, n_cls), jnp.float32),
        in_specs=[vmem] * len(inputs),
        out_specs=vmem,
        scratch_shapes=[
            pltpu.VMEM((B * L1, C1), jnp.float32),      # conv1 out (BN+ReLU)
            pltpu.VMEM((B * L2, C2), jnp.float32),      # conv2 out (BN+ReLU)
            pltpu.VMEM((B * L3, C3), jnp.float32),      # conv3 out (BN+ReLU)
            pltpu.VMEM((B * T, C3), jnp.float32),       # LSTM input, time-major
            pltpu.VMEM((B * T, 4 * H1), jnp.float32),   # hoisted LSTM1 x-gates
        ],
        cost_estimate=pl.CostEstimate(flops=flops,
                                      transcendentals=transcendentals,
                                      bytes_accessed=bytes_accessed),
    )(*inputs)


# ----------------------------- parameter setup ------------------------------

def fold_conv(w_pt, b_pt, gamma, beta, running_mean=None, running_var=None):
    """Conv1d weight (Cout,Cin,K) -> per-tap (K*Cin,Cout) bf16; fold bias+BN."""
    Cout, Cin, K = w_pt.shape
    mu = jnp.zeros((Cout,), jnp.float32) if running_mean is None else running_mean
    var = jnp.ones((Cout,), jnp.float32) if running_var is None else running_var
    w = jnp.transpose(w_pt, (2, 1, 0)).reshape(K * Cin, Cout)
    s = gamma / jnp.sqrt(var + BN_EPS)
    scale = s.reshape(1, Cout).astype(jnp.float32)
    shift = ((b_pt - mu) * s + beta).reshape(1, Cout).astype(jnp.float32)
    return w.astype(jnp.bfloat16), scale, shift


def fold_lstm1(wih_pt, whh_pt, bih, bhh):
    """PyTorch (4H,Din)/(4H,H) -> (Din,4H)/(H,4H) bf16; combined f32 bias."""
    return (jnp.transpose(wih_pt).astype(jnp.bfloat16),
            jnp.transpose(whh_pt).astype(jnp.bfloat16),
            (bih + bhh).reshape(1, -1).astype(jnp.float32))


def fold_lstm2_padded(wih_pt, whh_pt, bih, bhh, h_pad=128):
    """LSTM2 with hidden padded 64->128 so gate slices are full lane tiles.

    Weights stored as two separate bf16 blocks (Wih2, Whh2) so the per-step
    gate matmul is two accumulated dots (no concat).  Padded columns/rows and
    bias entries are zero so padded h2/c2 lanes stay exactly 0.
    """
    din = wih_pt.shape[1]
    h = whh_pt.shape[1]
    wih_t = jnp.transpose(wih_pt).astype(jnp.float32)      # (din, 4h)
    whh_t = jnp.transpose(whh_pt).astype(jnp.float32)      # (h, 4h)
    b = (bih + bhh).astype(jnp.float32)                    # (4h,)
    wih_p = jnp.zeros((din, 4 * h_pad), jnp.float32)
    whh_p = jnp.zeros((h_pad, 4 * h_pad), jnp.float32)
    b_p = jnp.zeros((1, 4 * h_pad), jnp.float32)
    for g in range(4):
        wih_p = wih_p.at[:, g * h_pad:g * h_pad + h].set(wih_t[:, g * h:(g + 1) * h])
        whh_p = whh_p.at[:h, g * h_pad:g * h_pad + h].set(whh_t[:, g * h:(g + 1) * h])
        b_p = b_p.at[0, g * h_pad:g * h_pad + h].set(b[g * h:(g + 1) * h])
    return wih_p.astype(jnp.bfloat16), whh_p.astype(jnp.bfloat16), b_p


def fold_fc_padded(w1_pt, b1_pt, w2_pt, b2_pt, h_pad=128):
    """fc1 (128,64)/fc2 (5,128) -> column-major bf16; fc1 rows padded to h_pad."""
    h_in = w1_pt.shape[1]
    w1 = jnp.zeros((h_pad, w1_pt.shape[0]), jnp.float32)
    w1 = w1.at[:h_in, :].set(jnp.transpose(w1_pt))
    return (w1.astype(jnp.bfloat16),
            b1_pt.reshape(1, -1).astype(jnp.float32),
            jnp.transpose(w2_pt).astype(jnp.bfloat16),
            b2_pt.reshape(1, -1).astype(jnp.float32))


def init_params(key):
    ks = jax.random.split(key, 24)

    def u(k, shape, fan_in):
        bound = 1.0 / (fan_in ** 0.5)
        return jax.random.uniform(k, shape, jnp.float32, -bound, bound)

    params = {}
    i = 0
    for name, cin, cout, kk in [('conv1', 4, 32, 5),
                                ('conv2', 32, 64, 3),
                                ('conv3', 64, 128, 3)]:
        w = u(ks[i], (cout, cin, kk), cin * kk); i += 1
        b = u(ks[i], (cout,), cin * kk); i += 1
        g = 1.0 + 0.1 * jax.random.normal(ks[i], (cout,), jnp.float32); i += 1
        bt = 0.1 * jax.random.normal(ks[i], (cout,), jnp.float32); i += 1
        params[name] = fold_conv(w, b, g, bt)      # fresh-BN running stats

    raw = {}
    for name, din, h in [('lstm1', 128, 128), ('lstm2', 128, 64)]:
        wih = u(ks[i], (4 * h, din), h); i += 1
        whh = u(ks[i], (4 * h, h), h); i += 1
        bih = u(ks[i], (4 * h,), h); i += 1
        bhh = u(ks[i], (4 * h,), h); i += 1
        raw[name] = (wih, whh, bih, bhh)
    params['lstm1'] = fold_lstm1(*raw['lstm1'])
    params['lstm2'] = fold_lstm2_padded(*raw['lstm2'], h_pad=128)

    w1 = u(ks[i], (128, 64), 64); i += 1
    b1 = u(ks[i], (128,), 64); i += 1
    w2 = u(ks[i], (5, 128), 128); i += 1
    b2 = u(ks[i], (5,), 128); i += 1
    params['fc'] = fold_fc_padded(w1, b1, w2, b2, h_pad=128)
    return params


# -------------------------- pure-JAX f32 reference --------------------------

def reference_forward(x_ncl, params):
    """f32 reference built from the SAME folded params (bf16 upcast)."""
    f32 = jnp.float32
    B = x_ncl.shape[0]
    a = jnp.transpose(x_ncl, (0, 2, 1)).astype(f32)        # (B, L, Cin)

    def conv_bn_relu(a, w, s, t, k, stride):
        lout = (a.shape[1] - k) // stride + 1
        cols = jnp.concatenate(
            [a[:, kk:kk + stride * (lout - 1) + 1:stride, :] for kk in range(k)],
            axis=-1)
        y = cols @ w.astype(f32)
        return jnp.maximum(y * s + t, 0.0)

    def pool2(a):
        lp = a.shape[1] // 2
        return jnp.maximum(a[:, 0:2 * lp:2, :], a[:, 1:2 * lp:2, :])

    w1, s1, t1 = params['conv1']
    w2, s2, t2 = params['conv2']
    w3, s3, t3 = params['conv3']
    a = pool2(conv_bn_relu(a, w1, s1, t1, 5, 2))
    a = pool2(conv_bn_relu(a, w2, s2, t2, 3, 1))
    a = pool2(conv_bn_relu(a, w3, s3, t3, 3, 1))            # (B, T, 128)

    wih1, whh1, b1 = [p.astype(f32) for p in params['lstm1']]
    wih2, whh2, b2 = [p.astype(f32) for p in params['lstm2']]
    fw1, fb1, fw2, fb2 = [p.astype(f32) for p in params['fc']]
    T, H1, H2p = a.shape[1], whh1.shape[0], whh2.shape[0]

    def sigm(v):
        return 0.5 * jnp.tanh(0.5 * v) + 0.5

    h1 = jnp.zeros((B, H1), f32); c1 = jnp.zeros((B, H1), f32)
    h2 = jnp.zeros((B, H2p), f32); c2 = jnp.zeros((B, H2p), f32)
    for t in range(T):
        g1 = a[:, t, :] @ wih1 + b1 + h1 @ whh1
        i1, f1 = sigm(g1[:, :H1]), sigm(g1[:, H1:2 * H1])
        gg1, o1 = jnp.tanh(g1[:, 2 * H1:3 * H1]), sigm(g1[:, 3 * H1:])
        c1 = f1 * c1 + i1 * gg1
        h1 = o1 * jnp.tanh(c1)
        g2 = h1 @ wih2 + h2 @ whh2 + b2
        i2, f2 = sigm(g2[:, :H2p]), sigm(g2[:, H2p:2 * H2p])
        gg2, o2 = jnp.tanh(g2[:, 2 * H2p:3 * H2p]), sigm(g2[:, 3 * H2p:])
        c2 = f2 * c2 + i2 * gg2
        h2 = o2 * jnp.tanh(c2)

    hf = jnp.maximum(h2 @ fw1 + fb1, 0.0)
    return hf @ fw2 + fb2


if __name__ == "__main__":
    key = jax.random.PRNGKey(0)
    kx, kp = jax.random.split(key)
    # NCL input like PyTorch: (batch=2, channels=4, length=128)
    x = jax.random.normal(kx, (2, 4, 128), jnp.float32)
    params = init_params(kp)

    out = eeg_forward(x, params)
    jax.block_until_ready(out)
    assert out.shape == (2, 5) and out.dtype == jnp.float32
    assert bool(jnp.all(jnp.isfinite(out)))

    ref = reference_forward(x, params)
    err = float(jnp.max(jnp.abs(out - ref)))
    # bf16 MXU operands vs f32 reference: expect O(1e-2) absolute difference.
    assert err < 0.25, f"max |pallas - ref| = {err}"
    print("KERNEL_OK")
</pallas_src>

<mosaic_0001>
module attributes {stable_mosaic.version = 11 : i64} {
  func.func @fused_eeg_kernel(%arg0: memref<256x4xf32, #tpu.memory_space<vmem>>, %arg1: memref<20x32xbf16, #tpu.memory_space<vmem>>, %arg2: memref<1x32xf32, #tpu.memory_space<vmem>>, %arg3: memref<1x32xf32, #tpu.memory_space<vmem>>, %arg4: memref<96x64xbf16, #tpu.memory_space<vmem>>, %arg5: memref<1x64xf32, #tpu.memory_space<vmem>>, %arg6: memref<1x64xf32, #tpu.memory_space<vmem>>, %arg7: memref<192x128xbf16, #tpu.memory_space<vmem>>, %arg8: memref<1x128xf32, #tpu.memory_space<vmem>>, %arg9: memref<1x128xf32, #tpu.memory_space<vmem>>, %arg10: memref<128x512xbf16, #tpu.memory_space<vmem>>, %arg11: memref<128x512xbf16, #tpu.memory_space<vmem>>, %arg12: memref<1x512xf32, #tpu.memory_space<vmem>>, %arg13: memref<128x512xbf16, #tpu.memory_space<vmem>>, %arg14: memref<128x512xbf16, #tpu.memory_space<vmem>>, %arg15: memref<1x512xf32, #tpu.memory_space<vmem>>, %arg16: memref<128x128xbf16, #tpu.memory_space<vmem>>, %arg17: memref<1x128xf32, #tpu.memory_space<vmem>>, %arg18: memref<128x5xbf16, #tpu.memory_space<vmem>>, %arg19: memref<1x5xf32, #tpu.memory_space<vmem>>, %arg20: memref<2x5xf32, #tpu.memory_space<vmem>>, %arg21: memref<124x32xf32, #tpu.memory_space<vmem>>, %arg22: memref<58x64xf32, #tpu.memory_space<vmem>>, %arg23: memref<24x128xf32, #tpu.memory_space<vmem>>, %arg24: memref<12x128xf32, #tpu.memory_space<vmem>>, %arg25: memref<12x512xf32, #tpu.memory_space<vmem>>) attributes {dimension_semantics = [], scalar_prefetch = 0 : i64, scratch_operands = 5 : i64, tpu.core_type = #tpu.core_type<tc>} {
    %c0 = arith.constant 0 : index
    %c0_0 = arith.constant 0 : index
    %0 = tpu.strided_load %arg0[%c0, %c0_0] {strides = array<i32: 2, 1>} : memref<256x4xf32, #tpu.memory_space<vmem>>, vector<62x4xf32>
    %1 = arith.truncf %0 : vector<62x4xf32> to vector<62x4xbf16>
    %c0_1 = arith.constant 0 : index
    %c0_2 = arith.constant 0 : index
    %2 = vector.load %arg1[%c0_1, %c0_2] : memref<20x32xbf16, #tpu.memory_space<vmem>>, vector<4x32xbf16>
    %cst = arith.constant dense<0.000000e+00> : vector<62x32xf32>
    %3 = tpu.matmul %1, %2, %cst {dimension_numbers = #tpu.dot_dimension_numbers<[1], [0], [0], [1], [0, 0, 1, 1], [], []>} : vector<62x4xbf16>, vector<4x32xbf16>, vector<62x32xf32> -> vector<62x32xf32>
    %c1 = arith.constant 1 : index
    %c0_3 = arith.constant 0 : index
    %4 = tpu.strided_load %arg0[%c1, %c0_3] {strides = array<i32: 2, 1>} : memref<256x4xf32, #tpu.memory_space<vmem>>, vector<62x4xf32>
    %5 = arith.truncf %4 : vector<62x4xf32> to vector<62x4xbf16>
    %c4 = arith.constant 4 : index
    %c0_4 = arith.constant 0 : index
    %6 = vector.load %arg1[%c4, %c0_4] : memref<20x32xbf16, #tpu.memory_space<vmem>>, vector<4x32xbf16>
    %cst_5 = arith.constant dense<0.000000e+00> : vector<62x32xf32>
    %7 = tpu.matmul %5, %6, %cst_5 {dimension_numbers = #tpu.dot_dimension_numbers<[1], [0], [0], [1], [0, 0, 1, 1], [], []>} : vector<62x4xbf16>, vector<4x32xbf16>, vector<62x32xf32> -> vector<62x32xf32>
    %8 = arith.addf %3, %7 : vector<62x32xf32>
    %c2 = arith.constant 2 : index
    %c0_6 = arith.constant 0 : index
    %9 = tpu.strided_load %arg0[%c2, %c0_6] {strides = array<i32: 2, 1>} : memref<256x4xf32, #tpu.memory_space<vmem>>, vector<62x4xf32>
    %10 = arith.truncf %9 : vector<62x4xf32> to vector<62x4xbf16>
    %c8 = arith.constant 8 : index
    %c0_7 = arith.constant 0 : index
    %11 = vector.load %arg1[%c8, %c0_7] : memref<20x32xbf16, #tpu.memory_space<vmem>>, vector<4x32xbf16>
    %cst_8 = arith.constant dense<0.000000e+00> : vector<62x32xf32>
    %12 = tpu.matmul %10, %11, %cst_8 {dimension_numbers = #tpu.dot_dimension_numbers<[1], [0], [0], [1], [0, 0, 1, 1], [], []>} : vector<62x4xbf16>, vector<4x32xbf16>, vector<62x32xf32> -> vector<62x32xf32>
    %13 = arith.addf %8, %12 : vector<62x32xf32>
    %c3 = arith.constant 3 : index
    %c0_9 = arith.constant 0 : index
    %14 = tpu.strided_load %arg0[%c3, %c0_9] {strides = array<i32: 2, 1>} : memref<256x4xf32, #tpu.memory_space<vmem>>, vector<62x4xf32>
    %15 = arith.truncf %14 : vector<62x4xf32> to vector<62x4xbf16>
    %c12 = arith.constant 12 : index
    %c0_10 = arith.constant 0 : index
    %16 = vector.load %arg1[%c12, %c0_10] : memref<20x32xbf16, #tpu.memory_space<vmem>>, vector<4x32xbf16>
    %cst_11 = arith.constant dense<0.000000e+00> : vector<62x32xf32>
    %17 = tpu.matmul %15, %16, %cst_11 {dimension_numbers = #tpu.dot_dimension_numbers<[1], [0], [0], [1], [0, 0, 1, 1], [], []>} : vector<62x4xbf16>, vector<4x32xbf16>, vector<62x32xf32> -> vector<62x32xf32>
    %18 = arith.addf %13, %17 : vector<62x32xf32>
    %c4_12 = arith.constant 4 : index
    %c0_13 = arith.constant 0 : index
    %19 = tpu.strided_load %arg0[%c4_12, %c0_13] {strides = array<i32: 2, 1>} : memref<256x4xf32, #tpu.memory_space<vmem>>, vector<62x4xf32>
    %20 = arith.truncf %19 : vector<62x4xf32> to vector<62x4xbf16>
    %c16 = arith.constant 16 : index
    %c0_14 = arith.constant 0 : index
    %21 = vector.load %arg1[%c16, %c0_14] : memref<20x32xbf16, #tpu.memory_space<vmem>>, vector<4x32xbf16>
    %cst_15 = arith.constant dense<0.000000e+00> : vector<62x32xf32>
    %22 = tpu.matmul %20, %21, %cst_15 {dimension_numbers = #tpu.dot_dimension_numbers<[1], [0], [0], [1], [0, 0, 1, 1], [], []>} : vector<62x4xbf16>, vector<4x32xbf16>, vector<62x32xf32> -> vector<62x32xf32>
    %23 = arith.addf %18, %22 : vector<62x32xf32>
    %c0_16 = arith.constant 0 : index
    %c0_17 = arith.constant 0 : index
    %24 = vector.load %arg2[%c0_16, %c0_17] : memref<1x32xf32, #tpu.memory_space<vmem>>, vector<1x32xf32>
    %25 = vector.broadcast %24 : vector<1x32xf32> to vector<62x32xf32>
    %26 = arith.mulf %23, %25 : vector<62x32xf32>
    %c0_18 = arith.constant 0 : index
    %c0_19 = arith.constant 0 : index
    %27 = vector.load %arg3[%c0_18, %c0_19] : memref<1x32xf32, #tpu.memory_space<vmem>>, vector<1x32xf32>
    %28 = vector.broadcast %27 : vector<1x32xf32> to vector<62x32xf32>
    %29 = arith.addf %26, %28 : vector<62x32xf32>
    %cst_20 = arith.constant 0.000000e+00 : f32
    %30 = vector.broadcast %cst_20 : f32 to vector<62x32xf32>
    %31 = arith.maximumf %29, %30 : vector<62x32xf32>
    %c0_21 = arith.constant 0 : index
    %c0_22 = arith.constant 0 : index
    %32 = vector.load %arg21[%c0_21, %c0_22] : memref<124x32xf32, #tpu.memory_space<vmem>>, vector<62x32xf32>
    tpu.vector_store %arg21[%c0_21, %c0_22], %31 {strides = array<i32>} : memref<124x32xf32, #tpu.memory_space<vmem>>, vector<62x32xf32>,
    %c128 = arith.constant 128 : index
    %c0_23 = arith.constant 0 : index
    %33 = tpu.strided_load %arg0[%c128, %c0_23] {strides = array<i32: 2, 1>} : memref<256x4xf32, #tpu.memory_space<vmem>>, vector<62x4xf32>
    %34 = arith.truncf %33 : vector<62x4xf32> to vector<62x4xbf16>
    %c0_24 = arith.constant 0 : index
    %c0_25 = arith.constant 0 : index
    %35 = vector.load %arg1[%c0_24, %c0_25] : memref<20x32xbf16, #tpu.memory_space<vmem>>, vector<4x32xbf16>
    %cst_26 = arith.constant dense<0.000000e+00> : vector<62x32xf32>
    %36 = tpu.matmul %34, %35, %cst_26 {dimension_numbers = #tpu.dot_dimension_numbers<[1], [0], [0], [1], [0, 0, 1, 1], [], []>} : vector<62x4xbf16>, vector<4x32xbf16>, vector<62x32xf32> -> vector<62x32xf32>
    %c129 = arith.constant 129 : index
    %c0_27 = arith.constant 0 : index
    %37 = tpu.strided_load %arg0[%c129, %c0_27] {strides = array<i32: 2, 1>} : memref<256x4xf32, #tpu.memory_space<vmem>>, vector<62x4xf32>
    %38 = arith.truncf %37 : vector<62x4xf32> to vector<62x4xbf16>
    %c4_28 = arith.constant 4 : index
    %c0_29 = arith.constant 0 : index
    %39 = vector.load %arg1[%c4_28, %c0_29] : memref<20x32xbf16, #tpu.memory_space<vmem>>, vector<4x32xbf16>
    %cst_30 = arith.constant dense<0.000000e+00> : vector<62x32xf32>
    %40 = tpu.matmul %38, %39, %cst_30 {dimension_numbers = #tpu.dot_dimension_numbers<[1], [0], [0], [1], [0, 0, 1, 1], [], []>} : vector<62x4xbf16>, vector<4x32xbf16>, vector<62x32xf32> -> vector<62x32xf32>
    %41 = arith.addf %36, %40 : vector<62x32xf32>
    %c130 = arith.constant 130 : index
    %c0_31 = arith.constant 0 : index
    %42 = tpu.strided_load %arg0[%c130, %c0_31] {strides = array<i32: 2, 1>} : memref<256x4xf32, #tpu.memory_space<vmem>>, vector<62x4xf32>
    %43 = arith.truncf %42 : vector<62x4xf32> to vector<62x4xbf16>
    %c8_32 = arith.constant 8 : index
    %c0_33 = arith.constant 0 : index
    %44 = vector.load %arg1[%c8_32, %c0_33] : memref<20x32xbf16, #tpu.memory_space<vmem>>, vector<4x32xbf16>
    %cst_34 = arith.constant dense<0.000000e+00> : vector<62x32xf32>
    %45 = tpu.matmul %43, %44, %cst_34 {dimension_numbers = #tpu.dot_dimension_numbers<[1], [0], [0], [1], [0, 0, 1, 1], [], []>} : vector<62x4xbf16>, vector<4x32xbf16>, vector<62x32xf32> -> vector<62x32xf32>
    %46 = arith.addf %41, %45 : vector<62x32xf32>
    %c131 = arith.constant 131 : index
    %c0_35 = arith.constant 0 : index
    %47 = tpu.strided_load %arg0[%c131, %c0_35] {strides = array<i32: 2, 1>} : memref<256x4xf32, #tpu.memory_space<vmem>>, vector<62x4xf32>
    %48 = arith.truncf %47 : vector<62x4xf32> to vector<62x4xbf16>
    %c12_36 = arith.constant 12 : index
    %c0_37 = arith.constant 0 : index
    %49 = vector.load %arg1[%c12_36, %c0_37] : memref<20x32xbf16, #tpu.memory_space<vmem>>, vector<4x32xbf16>
    %cst_38 = arith.constant dense<0.000000e+00> : vector<62x32xf32>
    %50 = tpu.matmul %48, %49, %cst_38 {dimension_numbers = #tpu.dot_dimension_numbers<[1], [0], [0], [1], [0, 0, 1, 1], [], []>} : vector<62x4xbf16>, vector<4x32xbf16>, vector<62x32xf32> -> vector<62x32xf32>
    %51 = arith.addf %46, %50 : vector<62x32xf32>
    %c132 = arith.constant 132 : index
    %c0_39 = arith.constant 0 : index
    %52 = tpu.strided_load %arg0[%c132, %c0_39] {strides = array<i32: 2, 1>} : memref<256x4xf32, #tpu.memory_space<vmem>>, vector<62x4xf32>
    %53 = arith.truncf %52 : vector<62x4xf32> to vector<62x4xbf16>
    %c16_40 = arith.constant 16 : index
    %c0_41 = arith.constant 0 : index
    %54 = vector.load %arg1[%c16_40, %c0_41] : memref<20x32xbf16, #tpu.memory_space<vmem>>, vector<4x32xbf16>
    %cst_42 = arith.constant dense<0.000000e+00> : vector<62x32xf32>
    %55 = tpu.matmul %53, %54, %cst_42 {dimension_numbers = #tpu.dot_dimension_numbers<[1], [0], [0], [1], [0, 0, 1, 1], [], []>} : vector<62x4xbf16>, vector<4x32xbf16>, vector<62x32xf32> -> vector<62x32xf32>
    %56 = arith.addf %51, %55 : vector<62x32xf32>
    %c0_43 = arith.constant 0 : index
    %c0_44 = arith.constant 0 : index
    %57 = vector.load %arg2[%c0_43, %c0_44] : memref<1x32xf32, #tpu.memory_space<vmem>>, vector<1x32xf32>
    %58 = vector.broadcast %57 : vector<1x32xf32> to vector<62x32xf32>
    %59 = arith.mulf %56, %58 : vector<62x32xf32>
    %c0_45 = arith.constant 0 : index
    %c0_46 = arith.constant 0 : index
    %60 = vector.load %arg3[%c0_45, %c0_46] : memref<1x32xf32, #tpu.memory_space<vmem>>, vector<1x32xf32>
    %61 = vector.broadcast %60 : vector<1x32xf32> to vector<62x32xf32>
    %62 = arith.addf %59, %61 : vector<62x32xf32>
    %cst_47 = arith.constant 0.000000e+00 : f32
    %63 = vector.broadcast %cst_47 : f32 to vector<62x32xf32>
    %64 = arith.maximumf %62, %63 : vector<62x32xf32>
    %c62 = arith.constant 62 : index
    %c0_48 = arith.constant 0 : index
    %65 = vector.load %arg21[%c62, %c0_48] : memref<124x32xf32, #tpu.memory_space<vmem>>, vector<62x32xf32>
    tpu.vector_store %arg21[%c62, %c0_48], %64 {strides = array<i32>} : memref<124x32xf32, #tpu.memory_space<vmem>>, vector<62x32xf32>,
    %c0_49 = arith.constant 0 : index
    %c0_50 = arith.constant 0 : index
    %66 = tpu.strided_load %arg21[%c0_49, %c0_50] {strides = array<i32: 2, 1>} : memref<124x32xf32, #tpu.memory_space<vmem>>, vector<29x32xf32>
    %c1_51 = arith.constant 1 : index
    %c0_52 = arith.constant 0 : index
    %67 = tpu.strided_load %arg21[%c1_51, %c0_52] {strides = array<i32: 2, 1>} : memref<124x32xf32, #tpu.memory_space<vmem>>, vector<29x32xf32>
    %68 = arith.maximumf %66, %67 : vector<29x32xf32>
    %69 = arith.truncf %68 : vector<29x32xf32> to vector<29x32xbf16>
    %c0_53 = arith.constant 0 : index
    %c0_54 = arith.constant 0 : index
    %70 = vector.load %arg4[%c0_53, %c0_54] : memref<96x64xbf16, #tpu.memory_space<vmem>>, vector<32x64xbf16>
    %cst_55 = arith.constant dense<0.000000e+00> : vector<29x64xf32>
    %71 = tpu.matmul %69, %70, %cst_55 {dimension_numbers = #tpu.dot_dimension_numbers<[1], [0], [0], [1], [0, 0, 1, 1], [], []>} : vector<29x32xbf16>, vector<32x64xbf16>, vector<29x64xf32> -> vector<29x64xf32>
    %c2_56 = arith.constant 2 : index
    %c0_57 = arith.constant 0 : index
    %72 = tpu.strided_load %arg21[%c2_56, %c0_57] {strides = array<i32: 2, 1>} : memref<124x32xf32, #tpu.memory_space<vmem>>, vector<29x32xf32>
    %c3_58 = arith.constant 3 : index
    %c0_59 = arith.constant 0 : index
    %73 = tpu.strided_load %arg21[%c3_58, %c0_59] {strides = array<i32: 2, 1>} : memref<124x32xf32, #tpu.memory_space<vmem>>, vector<29x32xf32>
    %74 = arith.maximumf %72, %73 : vector<29x32xf32>
    %75 = arith.truncf %74 : vector<29x32xf32> to vector<29x32xbf16>
    %c32 = arith.constant 32 : index
    %c0_60 = arith.constant 0 : index
    %76 = vector.load %arg4[%c32, %c0_60] : memref<96x64xbf16, #tpu.memory_space<vmem>>, vector<32x64xbf16>
    %cst_61 = arith.constant dense<0.000000e+00> : vector<29x64xf32>
    %77 = tpu.matmul %75, %76, %cst_61 {dimension_numbers = #tpu.dot_dimension_numbers<[1], [0], [0], [1], [0, 0, 1, 1], [], []>} : vector<29x32xbf16>, vector<32x64xbf16>, vector<29x64xf32> -> vector<29x64xf32>
    %78 = arith.addf %71, %77 : vector<29x64xf32>
    %c4_62 = arith.constant 4 : index
    %c0_63 = arith.constant 0 : index
    %79 = tpu.strided_load %arg21[%c4_62, %c0_63] {strides = array<i32: 2, 1>} : memref<124x32xf32, #tpu.memory_space<vmem>>, vector<29x32xf32>
    %c5 = arith.constant 5 : index
    %c0_64 = arith.constant 0 : index
    %80 = tpu.strided_load %arg21[%c5, %c0_64] {strides = array<i32: 2, 1>} : memref<124x32xf32, #tpu.memory_space<vmem>>, vector<29x32xf32>
    %81 = arith.maximumf %79, %80 : vector<29x32xf32>
    %82 = arith.truncf %81 : vector<29x32xf32> to vector<29x32xbf16>
    %c64 = arith.constant 64 : index
    %c0_65 = arith.constant 0 : index
    %83 = vector.load %arg4[%c64, %c0_65] : memref<96x64xbf16, #tpu.memory_space<vmem>>, vector<32x64xbf16>
    %cst_66 = arith.constant dense<0.000000e+00> : vector<29x64xf32>
    %84 = tpu.matmul %82, %83, %cst_66 {dimension_numbers = #tpu.dot_dimension_numbers<[1], [0], [0], [1], [0, 0, 1, 1], [], []>} : vector<29x32xbf16>, vector<32x64xbf16>, vector<29x64xf32> -> vector<29x64xf32>
    %85 = arith.addf %78, %84 : vector<29x64xf32>
    %c0_67 = arith.constant 0 : index
    %c0_68 = arith.constant 0 : index
    %86 = vector.load %arg5[%c0_67, %c0_68] : memref<1x64xf32, #tpu.memory_space<vmem>>, vector<1x64xf32>
    %87 = vector.broadcast %86 : vector<1x64xf32> to vector<29x64xf32>
    %88 = arith.mulf %85, %87 : vector<29x64xf32>
    %c0_69 = arith.constant 0 : index
    %c0_70 = arith.constant 0 : index
    %89 = vector.load %arg6[%c0_69, %c0_70] : memref<1x64xf32, #tpu.memory_space<vmem>>, vector<1x64xf32>
    %90 = vector.broadcast %89 : vector<1x64xf32> to vector<29x64xf32>
    %91 = arith.addf %88, %90 : vector<29x64xf32>
    %cst_71 = arith.constant 0.000000e+00 : f32
    %92 = vector.broadcast %cst_71 : f32 to vector<29x64xf32>
    %93 = arith.maximumf %91, %92 : vector<29x64xf32>
    %c0_72 = arith.constant 0 : index
    %c0_73 = arith.constant 0 : index
    %94 = vector.load %arg22[%c0_72, %c0_73] : memref<58x64xf32, #tpu.memory_space<vmem>>, vector<29x64xf32>
    tpu.vector_store %arg22[%c0_72, %c0_73], %93 {strides = array<i32>} : memref<58x64xf32, #tpu.memory_space<vmem>>, vector<29x64xf32>,
    %c62_74 = arith.constant 62 : index
    %c0_75 = arith.constant 0 : index
    %95 = tpu.strided_load %arg21[%c62_74, %c0_75] {strides = array<i32: 2, 1>} : memref<124x32xf32, #tpu.memory_space<vmem>>, vector<29x32xf32>
    %c63 = arith.constant 63 : index
    %c0_76 = arith.constant 0 : index
    %96 = tpu.strided_load %arg21[%c63, %c0_76] {strides = array<i32: 2, 1>} : memref<124x32xf32, #tpu.memory_space<vmem>>, vector<29x32xf32>
    %97 = arith.maximumf %95, %96 : vector<29x32xf32>
    %98 = arith.truncf %97 : vector<29x32xf32> to vector<29x32xbf16>
    %c0_77 = arith.constant 0 : index
    %c0_78 = arith.constant 0 : index
    %99 = vector.load %arg4[%c0_77, %c0_78] : memref<96x64xbf16, #tpu.memory_space<vmem>>, vector<32x64xbf16>
    %cst_79 = arith.constant dense<0.000000e+00> : vector<29x64xf32>
    %100 = tpu.matmul %98, %99, %cst_79 {dimension_numbers = #tpu.dot_dimension_numbers<[1], [0], [0], [1], [0, 0, 1, 1], [], []>} : vector<29x32xbf16>, vector<32x64xbf16>, vector<29x64xf32> -> vector<29x64xf32>
    %c64_80 = arith.constant 64 : index
    %c0_81 = arith.constant 0 : index
    %101 = tpu.strided_load %arg21[%c64_80, %c0_81] {strides = array<i32: 2, 1>} : memref<124x32xf32, #tpu.memory_space<vmem>>, vector<29x32xf32>
    %c65 = arith.constant 65 : index
    %c0_82 = arith.constant 0 : index
    %102 = tpu.strided_load %arg21[%c65, %c0_82] {strides = array<i32: 2, 1>} : memref<124x32xf32, #tpu.memory_space<vmem>>, vector<29x32xf32>
    %103 = arith.maximumf %101, %102 : vector<29x32xf32>
    %104 = arith.truncf %103 : vector<29x32xf32> to vector<29x32xbf16>
    %c32_83 = arith.constant 32 : index
    %c0_84 = arith.constant 0 : index
    %105 = vector.load %arg4[%c32_83, %c0_84] : memref<96x64xbf16, #tpu.memory_space<vmem>>, vector<32x64xbf16>
    %cst_85 = arith.constant dense<0.000000e+00> : vector<29x64xf32>
    %106 = tpu.matmul %104, %105, %cst_85 {dimension_numbers = #tpu.dot_dimension_numbers<[1], [0], [0], [1], [0, 0, 1, 1], [], []>} : vector<29x32xbf16>, vector<32x64xbf16>, vector<29x64xf32> -> vector<29x64xf32>
    %107 = arith.addf %100, %106 : vector<29x64xf32>
    %c66 = arith.constant 66 : index
    %c0_86 = arith.constant 0 : index
    %108 = tpu.strided_load %arg21[%c66, %c0_86] {strides = array<i32: 2, 1>} : memref<124x32xf32, #tpu.memory_space<vmem>>, vector<29x32xf32>
    %c67 = arith.constant 67 : index
    %c0_87 = arith.constant 0 : index
    %109 = tpu.strided_load %arg21[%c67, %c0_87] {strides = array<i32: 2, 1>} : memref<124x32xf32, #tpu.memory_space<vmem>>, vector<29x32xf32>
    %110 = arith.maximumf %108, %109 : vector<29x32xf32>
    %111 = arith.truncf %110 : vector<29x32xf32> to vector<29x32xbf16>
    %c64_88 = arith.constant 64 : index
    %c0_89 = arith.constant 0 : index
    %112 = vector.load %arg4[%c64_88, %c0_89] : memref<96x64xbf16, #tpu.memory_space<vmem>>, vector<32x64xbf16>
    %cst_90 = arith.constant dense<0.000000e+00> : vector<29x64xf32>
    %113 = tpu.matmul %111, %112, %cst_90 {dimension_numbers = #tpu.dot_dimension_numbers<[1], [0], [0], [1], [0, 0, 1, 1], [], []>} : vector<29x32xbf16>, vector<32x64xbf16>, vector<29x64xf32> -> vector<29x64xf32>
    %114 = arith.addf %107, %113 : vector<29x64xf32>
    %c0_91 = arith.constant 0 : index
    %c0_92 = arith.constant 0 : index
    %115 = vector.load %arg5[%c0_91, %c0_92] : memref<1x64xf32, #tpu.memory_space<vmem>>, vector<1x64xf32>
    %116 = vector.broadcast %115 : vector<1x64xf32> to vector<29x64xf32>
    %117 = arith.mulf %114, %116 : vector<29x64xf32>
    %c0_93 = arith.constant 0 : index
    %c0_94 = arith.constant 0 : index
    %118 = vector.load %arg6[%c0_93, %c0_94] : memref<1x64xf32, #tpu.memory_space<vmem>>, vector<1x64xf32>
    %119 = vector.broadcast %118 : vector<1x64xf32> to vector<29x64xf32>
    %120 = arith.addf %117, %119 : vector<29x64xf32>
    %cst_95 = arith.constant 0.000000e+00 : f32
    %121 = vector.broadcast %cst_95 : f32 to vector<29x64xf32>
    %122 = arith.maximumf %120, %121 : vector<29x64xf32>
    %c29 = arith.constant 29 : index
    %c0_96 = arith.constant 0 : index
    %123 = vector.load %arg22[%c29, %c0_96] : memref<58x64xf32, #tpu.memory_space<vmem>>, vector<29x64xf32>
    tpu.vector_store %arg22[%c29, %c0_96], %122 {strides = array<i32>} : memref<58x64xf32, #tpu.memory_space<vmem>>, vector<29x64xf32>,
    %c0_97 = arith.constant 0 : index
    %c0_98 = arith.constant 0 : index
    %124 = tpu.strided_load %arg22[%c0_97, %c0_98] {strides = array<i32: 2, 1>} : memref<58x64xf32, #tpu.memory_space<vmem>>, vector<12x64xf32>
    %c1_99 = arith.constant 1 : index
    %c0_100 = arith.constant 0 : index
    %125 = tpu.strided_load %arg22[%c1_99, %c0_100] {strides = array<i32: 2, 1>} : memref<58x64xf32, #tpu.memory_space<vmem>>, vector<12x64xf32>
    %126 = arith.maximumf %124, %125 : vector<12x64xf32>
    %127 = arith.truncf %126 : vector<12x64xf32> to vector<12x64xbf16>
    %c0_101 = arith.constant 0 : index
    %c0_102 = arith.constant 0 : index
    %128 = vector.load %arg7[%c0_101, %c0_102] : memref<192x128xbf16, #tpu.memory_space<vmem>>, vector<64x128xbf16>
    %cst_103 = arith.constant dense<0.000000e+00> : vector<12x128xf32>
    %129 = tpu.matmul %127, %128, %cst_103 {dimension_numbers = #tpu.dot_dimension_numbers<[1], [0], [0], [1], [0, 0, 1, 1], [], []>} : vector<12x64xbf16>, vector<64x128xbf16>, vector<12x128xf32> -> vector<12x128xf32>
    %c2_104 = arith.constant 2 : index
    %c0_105 = arith.constant 0 : index
    %130 = tpu.strided_load %arg22[%c2_104, %c0_105] {strides = array<i32: 2, 1>} : memref<58x64xf32, #tpu.memory_space<vmem>>, vector<12x64xf32>
    %c3_106 = arith.constant 3 : index
    %c0_107 = arith.constant 0 : index
    %131 = tpu.strided_load %arg22[%c3_106, %c0_107] {strides = array<i32: 2, 1>} : memref<58x64xf32, #tpu.memory_space<vmem>>, vector<12x64xf32>
    %132 = arith.maximumf %130, %131 : vector<12x64xf32>
    %133 = arith.truncf %132 : vector<12x64xf32> to vector<12x64xbf16>
    %c64_108 = arith.constant 64 : index
    %c0_109 = arith.constant 0 : index
    %134 = vector.load %arg7[%c64_108, %c0_109] : memref<192x128xbf16, #tpu.memory_space<vmem>>, vector<64x128xbf16>
    %cst_110 = arith.constant dense<0.000000e+00> : vector<12x128xf32>
    %135 = tpu.matmul %133, %134, %cst_110 {dimension_numbers = #tpu.dot_dimension_numbers<[1], [0], [0], [1], [0, 0, 1, 1], [], []>} : vector<12x64xbf16>, vector<64x128xbf16>, vector<12x128xf32> -> vector<12x128xf32>
    %136 = arith.addf %129, %135 : vector<12x128xf32>
    %c4_111 = arith.constant 4 : index
    %c0_112 = arith.constant 0 : index
    %137 = tpu.strided_load %arg22[%c4_111, %c0_112] {strides = array<i32: 2, 1>} : memref<58x64xf32, #tpu.memory_space<vmem>>, vector<12x64xf32>
    %c5_113 = arith.constant 5 : index
    %c0_114 = arith.constant 0 : index
    %138 = tpu.strided_load %arg22[%c5_113, %c0_114] {strides = array<i32: 2, 1>} : memref<58x64xf32, #tpu.memory_space<vmem>>, vector<12x64xf32>
    %139 = arith.maximumf %137, %138 : vector<12x64xf32>
    %140 = arith.truncf %139 : vector<12x64xf32> to vector<12x64xbf16>
    %c128_115 = arith.constant 128 : index
    %c0_116 = arith.constant 0 : index
    %141 = vector.load %arg7[%c128_115, %c0_116] : memref<192x128xbf16, #tpu.memory_space<vmem>>, vector<64x128xbf16>
    %cst_117 = arith.constant dense<0.000000e+00> : vector<12x128xf32>
    %142 = tpu.matmul %140, %141, %cst_117 {dimension_numbers = #tpu.dot_dimension_numbers<[1], [0], [0], [1], [0, 0, 1, 1], [], []>} : vector<12x64xbf16>, vector<64x128xbf16>, vector<12x128xf32> -> vector<12x128xf32>
    %143 = arith.addf %136, %142 : vector<12x128xf32>
    %c0_118 = arith.constant 0 : index
    %c0_119 = arith.constant 0 : index
    %144 = vector.load %arg8[%c0_118, %c0_119] : memref<1x128xf32, #tpu.memory_space<vmem>>, vector<1x128xf32>
    %145 = vector.broadcast %144 : vector<1x128xf32> to vector<12x128xf32>
    %146 = arith.mulf %143, %145 : vector<12x128xf32>
    %c0_120 = arith.constant 0 : index
    %c0_121 = arith.constant 0 : index
    %147 = vector.load %arg9[%c0_120, %c0_121] : memref<1x128xf32, #tpu.memory_space<vmem>>, vector<1x128xf32>
    %148 = vector.broadcast %147 : vector<1x128xf32> to vector<12x128xf32>
    %149 = arith.addf %146, %148 : vector<12x128xf32>
    %cst_122 = arith.constant 0.000000e+00 : f32
    %150 = vector.broadcast %cst_122 : f32 to vector<12x128xf32>
    %151 = arith.maximumf %149, %150 : vector<12x128xf32>
    %c0_123 = arith.constant 0 : index
    %c0_124 = arith.constant 0 : index
    %152 = vector.load %arg23[%c0_123, %c0_124] : memref<24x128xf32, #tpu.memory_space<vmem>>, vector<12x128xf32>
    tpu.vector_store %arg23[%c0_123, %c0_124], %151 {strides = array<i32>} : memref<24x128xf32, #tpu.memory_space<vmem>>, vector<12x128xf32>,
    %c29_125 = arith.constant 29 : index
    %c0_126 = arith.constant 0 : index
    %153 = tpu.strided_load %arg22[%c29_125, %c0_126] {strides = array<i32: 2, 1>} : memref<58x64xf32, #tpu.memory_space<vmem>>, vector<12x64xf32>
    %c30 = arith.constant 30 : index
    %c0_127 = arith.constant 0 : index
    %154 = tpu.strided_load %arg22[%c30, %c0_127] {strides = array<i32: 2, 1>} : memref<58x64xf32, #tpu.memory_space<vmem>>, vector<12x64xf32>
    %155 = arith.maximumf %153, %154 : vector<12x64xf32>
    %156 = arith.truncf %155 : vector<12x64xf32> to vector<12x64xbf16>
    %c0_128 = arith.constant 0 : index
    %c0_129 = arith.constant 0 : index
    %157 = vector.load %arg7[%c0_128, %c0_129] : memref<192x128xbf16, #tpu.memory_space<vmem>>, vector<64x128xbf16>
    %cst_130 = arith.constant dense<0.000000e+00> : vector<12x128xf32>
    %158 = tpu.matmul %156, %157, %cst_130 {dimension_numbers = #tpu.dot_dimension_numbers<[1], [0], [0], [1], [0, 0, 1, 1], [], []>} : vector<12x64xbf16>, vector<64x128xbf16>, vector<12x128xf32> -> vector<12x128xf32>
    %c31 = arith.constant 31 : index
    %c0_131 = arith.constant 0 : index
    %159 = tpu.strided_load %arg22[%c31, %c0_131] {strides = array<i32: 2, 1>} : memref<58x64xf32, #tpu.memory_space<vmem>>, vector<12x64xf32>
    %c32_132 = arith.constant 32 : index
    %c0_133 = arith.constant 0 : index
    %160 = tpu.strided_load %arg22[%c32_132, %c0_133] {strides = array<i32: 2, 1>} : memref<58x64xf32, #tpu.memory_space<vmem>>, vector<12x64xf32>
    %161 = arith.maximumf %159, %160 : vector<12x64xf32>
    %162 = arith.truncf %161 : vector<12x64xf32> to vector<12x64xbf16>
    %c64_134 = arith.constant 64 : index
    %c0_135 = arith.constant 0 : index
    %163 = vector.load %arg7[%c64_134, %c0_135] : memref<192x128xbf16, #tpu.memory_space<vmem>>, vector<64x128xbf16>
    %cst_136 = arith.constant dense<0.000000e+00> : vector<12x128xf32>
    %164 = tpu.matmul %162, %163, %cst_136 {dimension_numbers = #tpu.dot_dimension_numbers<[1], [0], [0], [1], [0, 0, 1, 1], [], []>} : vector<12x64xbf16>, vector<64x128xbf16>, vector<12x128xf32> -> vector<12x128xf32>
    %165 = arith.addf %158, %164 : vector<12x128xf32>
    %c33 = arith.constant 33 : index
    %c0_137 = arith.constant 0 : index
    %166 = tpu.strided_load %arg22[%c33, %c0_137] {strides = array<i32: 2, 1>} : memref<58x64xf32, #tpu.memory_space<vmem>>, vector<12x64xf32>
    %c34 = arith.constant 34 : index
    %c0_138 = arith.constant 0 : index
    %167 = tpu.strided_load %arg22[%c34, %c0_138] {strides = array<i32: 2, 1>} : memref<58x64xf32, #tpu.memory_space<vmem>>, vector<12x64xf32>
    %168 = arith.maximumf %166, %167 : vector<12x64xf32>
    %169 = arith.truncf %168 : vector<12x64xf32> to vector<12x64xbf16>
    %c128_139 = arith.constant 128 : index
    %c0_140 = arith.constant 0 : index
    %170 = vector.load %arg7[%c128_139, %c0_140] : memref<192x128xbf16, #tpu.memory_space<vmem>>, vector<64x128xbf16>
    %cst_141 = arith.constant dense<0.000000e+00> : vector<12x128xf32>
    %171 = tpu.matmul %169, %170, %cst_141 {dimension_numbers = #tpu.dot_dimension_numbers<[1], [0], [0], [1], [0, 0, 1, 1], [], []>} : vector<12x64xbf16>, vector<64x128xbf16>, vector<12x128xf32> -> vector<12x128xf32>
    %172 = arith.addf %165, %171 : vector<12x128xf32>
    %c0_142 = arith.constant 0 : index
    %c0_143 = arith.constant 0 : index
    %173 = vector.load %arg8[%c0_142, %c0_143] : memref<1x128xf32, #tpu.memory_space<vmem>>, vector<1x128xf32>
    %174 = vector.broadcast %173 : vector<1x128xf32> to vector<12x128xf32>
    %175 = arith.mulf %172, %174 : vector<12x128xf32>
    %c0_144 = arith.constant 0 : index
    %c0_145 = arith.constant 0 : index
    %176 = vector.load %arg9[%c0_144, %c0_145] : memref<1x128xf32, #tpu.memory_space<vmem>>, vector<1x128xf32>
    %177 = vector.broadcast %176 : vector<1x128xf32> to vector<12x128xf32>
    %178 = arith.addf %175, %177 : vector<12x128xf32>
    %cst_146 = arith.constant 0.000000e+00 : f32
    %179 = vector.broadcast %cst_146 : f32 to vector<12x128xf32>
    %180 = arith.maximumf %178, %179 : vector<12x128xf32>
    %c12_147 = arith.constant 12 : index
    %c0_148 = arith.constant 0 : index
    %181 = vector.load %arg23[%c12_147, %c0_148] : memref<24x128xf32, #tpu.memory_space<vmem>>, vector<12x128xf32>
    tpu.vector_store %arg23[%c12_147, %c0_148], %180 {strides = array<i32>} : memref<24x128xf32, #tpu.memory_space<vmem>>, vector<12x128xf32>,
    %c0_149 = arith.constant 0 : index
    %c0_150 = arith.constant 0 : index
    %182 = tpu.strided_load %arg23[%c0_149, %c0_150] {strides = array<i32: 12, 1>} : memref<24x128xf32, #tpu.memory_space<vmem>>, vector<2x128xf32>
    %c1_151 = arith.constant 1 : index
    %c0_152 = arith.constant 0 : index
    %183 = tpu.strided_load %arg23[%c1_151, %c0_152] {strides = array<i32: 12, 1>} : memref<24x128xf32, #tpu.memory_space<vmem>>, vector<2x128xf32>
    %184 = arith.maximumf %182, %183 : vector<2x128xf32>
    %c0_153 = arith.constant 0 : index
    %c0_154 = arith.constant 0 : index
    %185 = vector.load %arg24[%c0_153, %c0_154] : memref<12x128xf32, #tpu.memory_space<vmem>>, vector<2x128xf32>
    tpu.vector_store %arg24[%c0_153, %c0_154], %184 {strides = array<i32>} : memref<12x128xf32, #tpu.memory_space<vmem>>, vector<2x128xf32>,
    %c2_155 = arith.constant 2 : index
    %c0_156 = arith.constant 0 : index
    %186 = tpu.strided_load %arg23[%c2_155, %c0_156] {strides = array<i32: 12, 1>} : memref<24x128xf32, #tpu.memory_space<vmem>>, vector<2x128xf32>
    %c3_157 = arith.constant 3 : index
    %c0_158 = arith.constant 0 : index
    %187 = tpu.strided_load %arg23[%c3_157, %c0_158] {strides = array<i32: 12, 1>} : memref<24x128xf32, #tpu.memory_space<vmem>>, vector<2x128xf32>
    %188 = arith.maximumf %186, %187 : vector<2x128xf32>
    %c2_159 = arith.constant 2 : index
    %c0_160 = arith.constant 0 : index
    %189 = vector.load %arg24[%c2_159, %c0_160] : memref<12x128xf32, #tpu.memory_space<vmem>>, vector<2x128xf32>
    tpu.vector_store %arg24[%c2_159, %c0_160], %188 {strides = array<i32>} : memref<12x128xf32, #tpu.memory_space<vmem>>, vector<2x128xf32>,
    %c4_161 = arith.constant 4 : index
    %c0_162 = arith.constant 0 : index
    %190 = tpu.strided_load %arg23[%c4_161, %c0_162] {strides = array<i32: 12, 1>} : memref<24x128xf32, #tpu.memory_space<vmem>>, vector<2x128xf32>
    %c5_163 = arith.constant 5 : index
    %c0_164 = arith.constant 0 : index
    %191 = tpu.strided_load %arg23[%c5_163, %c0_164] {strides = array<i32: 12, 1>} : memref<24x128xf32, #tpu.memory_space<vmem>>, vector<2x128xf32>
    %192 = arith.maximumf %190, %191 : vector<2x128xf32>
    %c4_165 = arith.constant 4 : index
    %c0_166 = arith.constant 0 : index
    %193 = vector.load %arg24[%c4_165, %c0_166] : memref<12x128xf32, #tpu.memory_space<vmem>>, vector<2x128xf32>
    tpu.vector_store %arg24[%c4_165, %c0_166], %192 {strides = array<i32>} : memref<12x128xf32, #tpu.memory_space<vmem>>, vector<2x128xf32>,
    %c6 = arith.constant 6 : index
    %c0_167 = arith.constant 0 : index
    %194 = tpu.strided_load %arg23[%c6, %c0_167] {strides = array<i32: 12, 1>} : memref<24x128xf32, #tpu.memory_space<vmem>>, vector<2x128xf32>
    %c7 = arith.constant 7 : index
    %c0_168 = arith.constant 0 : index
    %195 = tpu.strided_load %arg23[%c7, %c0_168] {strides = array<i32: 12, 1>} : memref<24x128xf32, #tpu.memory_space<vmem>>, vector<2x128xf32>
    %196 = arith.maximumf %194, %195 : vector<2x128xf32>
    %c6_169 = arith.constant 6 : index
    %c0_170 = arith.constant 0 : index
    %197 = vector.load %arg24[%c6_169, %c0_170] : memref<12x128xf32, #tpu.memory_space<vmem>>, vector<2x128xf32>
    tpu.vector_store %arg24[%c6_169, %c0_170], %196 {strides = array<i32>} : memref<12x128xf32, #tpu.memory_space<vmem>>, vector<2x128xf32>,
    %c8_171 = arith.constant 8 : index
    %c0_172 = arith.constant 0 : index
    %198 = tpu.strided_load %arg23[%c8_171, %c0_172] {strides = array<i32: 12, 1>} : memref<24x128xf32, #tpu.memory_space<vmem>>, vector<2x128xf32>
    %c9 = arith.constant 9 : index
    %c0_173 = arith.constant 0 : index
    %199 = tpu.strided_load %arg23[%c9, %c0_173] {strides = array<i32: 12, 1>} : memref<24x128xf32, #tpu.memory_space<vmem>>, vector<2x128xf32>
    %200 = arith.maximumf %198, %199 : vector<2x128xf32>
    %c8_174 = arith.constant 8 : index
    %c0_175 = arith.constant 0 : index
    %201 = vector.load %arg24[%c8_174, %c0_175] : memref<12x128xf32, #tpu.memory_space<vmem>>, vector<2x128xf32>
    tpu.vector_store %arg24[%c8_174, %c0_175], %200 {strides = array<i32>} : memref<12x128xf32, #tpu.memory_space<vmem>>, vector<2x128xf32>,
    %c10 = arith.constant 10 : index
    %c0_176 = arith.constant 0 : index
    %202 = tpu.strided_load %arg23[%c10, %c0_176] {strides = array<i32: 12, 1>} : memref<24x128xf32, #tpu.memory_space<vmem>>, vector<2x128xf32>
    %c11 = arith.constant 11 : index
    %c0_177 = arith.constant 0 : index
    %203 = tpu.strided_load %arg23[%c11, %c0_177] {strides = array<i32: 12, 1>} : memref<24x128xf32, #tpu.memory_space<vmem>>, vector<2x128xf32>
    %204 = arith.maximumf %202, %203 : vector<2x128xf32>
    %c10_178 = arith.constant 10 : index
    %c0_179 = arith.constant 0 : index
    %205 = vector.load %arg24[%c10_178, %c0_179] : memref<12x128xf32, #tpu.memory_space<vmem>>, vector<2x128xf32>
    tpu.vector_store %arg24[%c10_178, %c0_179], %204 {strides = array<i32>} : memref<12x128xf32, #tpu.memory_space<vmem>>, vector<2x128xf32>,
    %c0_180 = arith.constant 0 : index
    %c0_181 = arith.constant 0 : index
    %206 = vector.load %arg24[%c0_180, %c0_181] : memref<12x128xf32, #tpu.memory_space<vmem>>, vector<12x128xf32>
    %207 = arith.truncf %206 : vector<12x128xf32> to vector<12x128xbf16>
    %c0_182 = arith.constant 0 : index
    %c0_183 = arith.constant 0 : index
    %208 = vector.load %arg10[%c0_182, %c0_183] : memref<128x512xbf16, #tpu.memory_space<vmem>>, vector<128x512xbf16>
    %cst_184 = arith.constant dense<0.000000e+00> : vector<12x512xf32>
    %209 = tpu.matmul %207, %208, %cst_184 {dimension_numbers = #tpu.dot_dimension_numbers<[1], [0], [0], [1], [0, 0, 1, 1], [], []>} : vector<12x128xbf16>, vector<128x512xbf16>, vector<12x512xf32> -> vector<12x512xf32>
    %c0_185 = arith.constant 0 : index
    %c0_186 = arith.constant 0 : index
    %210 = vector.load %arg12[%c0_185, %c0_186] : memref<1x512xf32, #tpu.memory_space<vmem>>, vector<1x512xf32>
    %211 = vector.broadcast %210 : vector<1x512xf32> to vector<12x512xf32>
    %212 = arith.addf %209, %211 : vector<12x512xf32>
    %c0_187 = arith.constant 0 : index
    %c0_188 = arith.constant 0 : index
    %213 = vector.load %arg25[%c0_187, %c0_188] : memref<12x512xf32, #tpu.memory_space<vmem>>, vector<12x512xf32>
    tpu.vector_store %arg25[%c0_187, %c0_188], %212 {strides = array<i32>} : memref<12x512xf32, #tpu.memory_space<vmem>>, vector<12x512xf32>,
    %c0_189 = arith.constant 0 : index
    %c0_190 = arith.constant 0 : index
    %214 = vector.load %arg11[%c0_189, %c0_190] : memref<128x512xbf16, #tpu.memory_space<vmem>>, vector<128x512xbf16>
    %c0_191 = arith.constant 0 : index
    %c0_192 = arith.constant 0 : index
    %215 = vector.load %arg13[%c0_191, %c0_192] : memref<128x512xbf16, #tpu.memory_space<vmem>>, vector<128x512xbf16>
    %c0_193 = arith.constant 0 : index
    %c0_194 = arith.constant 0 : index
    %216 = vector.load %arg14[%c0_193, %c0_194] : memref<128x512xbf16, #tpu.memory_space<vmem>>, vector<128x512xbf16>
    %c0_195 = arith.constant 0 : index
    %c0_196 = arith.constant 0 : index
    %217 = vector.load %arg15[%c0_195, %c0_196] : memref<1x512xf32, #tpu.memory_space<vmem>>, vector<1x512xf32>
    %cst_197 = arith.constant 0.000000e+00 : f32
    %218 = vector.broadcast %cst_197 : f32 to vector<2x128xf32>
    %cst_198 = arith.constant 0.000000e+00 : f32
    %219 = vector.broadcast %cst_198 : f32 to vector<2x128xf32>
    %cst_199 = arith.constant 0.000000e+00 : f32
    %220 = vector.broadcast %cst_199 : f32 to vector<2x128xf32>
    %cst_200 = arith.constant 0.000000e+00 : f32
    %221 = vector.broadcast %cst_200 : f32 to vector<2x128xf32>
    %222 = arith.truncf %220 : vector<2x128xf32> to vector<2x128xbf16>
    %cst_201 = arith.constant dense<0.000000e+00> : vector<2x512xf32>
    %223 = tpu.matmul %222, %216, %cst_201 {dimension_numbers = #tpu.dot_dimension_numbers<[1], [0], [0], [1], [0, 0, 1, 1], [], []>} : vector<2x128xbf16>, vector<128x512xbf16>, vector<2x512xf32> -> vector<2x512xf32>
    %c0_202 = arith.constant 0 : index
    %c0_203 = arith.constant 0 : index
    %224 = vector.load %arg25[%c0_202, %c0_203] : memref<12x512xf32, #tpu.memory_space<vmem>>, vector<2x512xf32>
    %225 = arith.truncf %218 : vector<2x128xf32> to vector<2x128xbf16>
    %cst_204 = arith.constant dense<0.000000e+00> : vector<2x512xf32>
    %226 = tpu.matmul %225, %214, %cst_204 {dimension_numbers = #tpu.dot_dimension_numbers<[1], [0], [0], [1], [0, 0, 1, 1], [], []>} : vector<2x128xbf16>, vector<128x512xbf16>, vector<2x512xf32> -> vector<2x512xf32>
    %227 = arith.addf %224, %226 : vector<2x512xf32>
    %228 = vector.extract_strided_slice %227 {offsets = [0, 0], sizes = [2, 128], strides = [1, 1]} : vector<2x512xf32> to vector<2x128xf32>
    %cst_205 = arith.constant 5.000000e-01 : f32
    %229 = vector.broadcast %cst_205 : f32 to vector<2x128xf32>
    %230 = arith.mulf %229, %228 : vector<2x128xf32>
    %231 = math.tanh %230 : vector<2x128xf32>
    %cst_206 = arith.constant 5.000000e-01 : f32
    %232 = vector.broadcast %cst_206 : f32 to vector<2x128xf32>
    %233 = arith.mulf %232, %231 : vector<2x128xf32>
    %cst_207 = arith.constant 5.000000e-01 : f32
    %234 = vector.broadcast %cst_207 : f32 to vector<2x128xf32>
    %235 = arith.addf %233, %234 : vector<2x128xf32>
    %236 = vector.extract_strided_slice %227 {offsets = [0, 128], sizes = [2, 128], strides = [1, 1]} : vector<2x512xf32> to vector<2x128xf32>
    %cst_208 = arith.constant 5.000000e-01 : f32
    %237 = vector.broadcast %cst_208 : f32 to vector<2x128xf32>
    %238 = arith.mulf %237, %236 : vector<2x128xf32>
    %239 = math.tanh %238 : vector<2x128xf32>
    %cst_209 = arith.constant 5.000000e-01 : f32
    %240 = vector.broadcast %cst_209 : f32 to vector<2x128xf32>
    %241 = arith.mulf %240, %239 : vector<2x128xf32>
    %cst_210 = arith.constant 5.000000e-01 : f32
    %242 = vector.broadcast %cst_210 : f32 to vector<2x128xf32>
    %243 = arith.addf %241, %242 : vector<2x128xf32>
    %244 = vector.extract_strided_slice %227 {offsets = [0, 256], sizes = [2, 128], strides = [1, 1]} : vector<2x512xf32> to vector<2x128xf32>
    %245 = math.tanh %244 : vector<2x128xf32>
    %246 = vector.extract_strided_slice %227 {offsets = [0, 384], sizes = [2, 128], strides = [1, 1]} : vector<2x512xf32> to vector<2x128xf32>
    %cst_211 = arith.constant 5.000000e-01 : f32
    %247 = vector.broadcast %cst_211 : f32 to vector<2x128xf32>
    %248 = arith.mulf %247, %246 : vector<2x128xf32>
    %249 = math.tanh %248 : vector<2x128xf32>
    %cst_212 = arith.constant 5.000000e-01 : f32
    %250 = vector.broadcast %cst_212 : f32 to vector<2x128xf32>
    %251 = arith.mulf %250, %249 : vector<2x128xf32>
    %cst_213 = arith.constant 5.000000e-01 : f32
    %252 = vector.broadcast %cst_213 : f32 to vector<2x128xf32>
    %253 = arith.addf %251, %252 : vector<2x128xf32>
    %254 = arith.mulf %243, %219 : vector<2x128xf32>
    %255 = arith.mulf %235, %245 : vector<2x128xf32>
    %256 = arith.addf %254, %255 : vector<2x128xf32>
    %257 = math.tanh %256 : vector<2x128xf32>
    %258 = arith.mulf %253, %257 : vector<2x128xf32>
    %259 = vector.broadcast %217 : vector<1x512xf32> to vector<2x512xf32>
    %260 = arith.addf %223, %259 : vector<2x512xf32>
    %261 = arith.truncf %258 : vector<2x128xf32> to vector<2x128xbf16>
    %cst_214 = arith.constant dense<0.000000e+00> : vector<2x512xf32>
    %262 = tpu.matmul %261, %215, %cst_214 {dimension_numbers = #tpu.dot_dimension_numbers<[1], [0], [0], [1], [0, 0, 1, 1], [], []>} : vector<2x128xbf16>, vector<128x512xbf16>, vector<2x512xf32> -> vector<2x512xf32>
    %263 = arith.addf %260, %262 : vector<2x512xf32>
    %264 = vector.extract_strided_slice %263 {offsets = [0, 0], sizes = [2, 128], strides = [1, 1]} : vector<2x512xf32> to vector<2x128xf32>
    %cst_215 = arith.constant 5.000000e-01 : f32
    %265 = vector.broadcast %cst_215 : f32 to vector<2x128xf32>
    %266 = arith.mulf %265, %264 : vector<2x128xf32>
    %267 = math.tanh %266 : vector<2x128xf32>
    %cst_216 = arith.constant 5.000000e-01 : f32
    %268 = vector.broadcast %cst_216 : f32 to vector<2x128xf32>
    %269 = arith.mulf %268, %267 : vector<2x128xf32>
    %cst_217 = arith.constant 5.000000e-01 : f32
    %270 = vector.broadcast %cst_217 : f32 to vector<2x128xf32>
    %271 = arith.addf %269, %270 : vector<2x128xf32>
    %272 = vector.extract_strided_slice %263 {offsets = [0, 128], sizes = [2, 128], strides = [1, 1]} : vector<2x512xf32> to vector<2x128xf32>
    %cst_218 = arith.constant 5.000000e-01 : f32
    %273 = vector.broadcast %cst_218 : f32 to vector<2x128xf32>
    %274 = arith.mulf %273, %272 : vector<2x128xf32>
    %275 = math.tanh %274 : vector<2x128xf32>
    %cst_219 = arith.constant 5.000000e-01 : f32
    %276 = vector.broadcast %cst_219 : f32 to vector<2x128xf32>
    %277 = arith.mulf %276, %275 : vector<2x128xf32>
    %cst_220 = arith.constant 5.000000e-01 : f32
    %278 = vector.broadcast %cst_220 : f32 to vector<2x128xf32>
    %279 = arith.addf %277, %278 : vector<2x128xf32>
    %280 = vector.extract_strided_slice %263 {offsets = [0, 256], sizes = [2, 128], strides = [1, 1]} : vector<2x512xf32> to vector<2x128xf32>
    %281 = math.tanh %280 : vector<2x128xf32>
    %282 = vector.extract_strided_slice %263 {offsets = [0, 384], sizes = [2, 128], strides = [1, 1]} : vector<2x512xf32> to vector<2x128xf32>
    %cst_221 = arith.constant 5.000000e-01 : f32
    %283 = vector.broadcast %cst_221 : f32 to vector<2x128xf32>
    %284 = arith.mulf %283, %282 : vector<2x128xf32>
    %285 = math.tanh %284 : vector<2x128xf32>
    %cst_222 = arith.constant 5.000000e-01 : f32
    %286 = vector.broadcast %cst_222 : f32 to vector<2x128xf32>
    %287 = arith.mulf %286, %285 : vector<2x128xf32>
    %cst_223 = arith.constant 5.000000e-01 : f32
    %288 = vector.broadcast %cst_223 : f32 to vector<2x128xf32>
    %289 = arith.addf %287, %288 : vector<2x128xf32>
    %290 = arith.mulf %279, %221 : vector<2x128xf32>
    %291 = arith.mulf %271, %281 : vector<2x128xf32>
    %292 = arith.addf %290, %291 : vector<2x128xf32>
    %293 = math.tanh %292 : vector<2x128xf32>
    %294 = arith.mulf %289, %293 : vector<2x128xf32>
    %295 = arith.truncf %294 : vector<2x128xf32> to vector<2x128xbf16>
    %cst_224 = arith.constant dense<0.000000e+00> : vector<2x512xf32>
    %296 = tpu.matmul %295, %216, %cst_224 {dimension_numbers = #tpu.dot_dimension_numbers<[1], [0], [0], [1], [0, 0, 1, 1], [], []>} : vector<2x128xbf16>, vector<128x512xbf16>, vector<2x512xf32> -> vector<2x512xf32>
    %c2_225 = arith.constant 2 : index
    %c0_226 = arith.constant 0 : index
    %297 = vector.load %arg25[%c2_225, %c0_226] : memref<12x512xf32, #tpu.memory_space<vmem>>, vector<2x512xf32>
    %298 = arith.truncf %258 : vector<2x128xf32> to vector<2x128xbf16>
    %cst_227 = arith.constant dense<0.000000e+00> : vector<2x512xf32>
    %299 = tpu.matmul %298, %214, %cst_227 {dimension_numbers = #tpu.dot_dimension_numbers<[1], [0], [0], [1], [0, 0, 1, 1], [], []>} : vector<2x128xbf16>, vector<128x512xbf16>, vector<2x512xf32> -> vector<2x512xf32>
    %300 = arith.addf %297, %299 : vector<2x512xf32>
    %301 = vector.extract_strided_slice %300 {offsets = [0, 0], sizes = [2, 128], strides = [1, 1]} : vector<2x512xf32> to vector<2x128xf32>
    %cst_228 = arith.constant 5.000000e-01 : f32
    %302 = vector.broadcast %cst_228 : f32 to vector<2x128xf32>
    %303 = arith.mulf %302, %301 : vector<2x128xf32>
    %304 = math.tanh %303 : vector<2x128xf32>
    %cst_229 = arith.constant 5.000000e-01 : f32
    %305 = vector.broadcast %cst_229 : f32 to vector<2x128xf32>
    %306 = arith.mulf %305, %304 : vector<2x128xf32>
    %cst_230 = arith.constant 5.000000e-01 : f32
    %307 = vector.broadcast %cst_230 : f32 to vector<2x128xf32>
    %308 = arith.addf %306, %307 : vector<2x128xf32>
    %309 = vector.extract_strided_slice %300 {offsets = [0, 128], sizes = [2, 128], strides = [1, 1]} : vector<2x512xf32> to vector<2x128xf32>
    %cst_231 = arith.constant 5.000000e-01 : f32
    %310 = vector.broadcast %cst_231 : f32 to vector<2x128xf32>
    %311 = arith.mulf %310, %309 : vector<2x128xf32>
    %312 = math.tanh %311 : vector<2x128xf32>
    %cst_232 = arith.constant 5.000000e-01 : f32
    %313 = vector.broadcast %cst_232 : f32 to vector<2x128xf32>
    %314 = arith.mulf %313, %312 : vector<2x128xf32>
    %cst_233 = arith.constant 5.000000e-01 : f32
    %315 = vector.broadcast %cst_233 : f32 to vector<2x128xf32>
    %316 = arith.addf %314, %315 : vector<2x128xf32>
    %317 = vector.extract_strided_slice %300 {offsets = [0, 256], sizes = [2, 128], strides = [1, 1]} : vector<2x512xf32> to vector<2x128xf32>
    %318 = math.tanh %317 : vector<2x128xf32>
    %319 = vector.extract_strided_slice %300 {offsets = [0, 384], sizes = [2, 128], strides = [1, 1]} : vector<2x512xf32> to vector<2x128xf32>
    %cst_234 = arith.constant 5.000000e-01 : f32
    %320 = vector.broadcast %cst_234 : f32 to vector<2x128xf32>
    %321 = arith.mulf %320, %319 : vector<2x128xf32>
    %322 = math.tanh %321 : vector<2x128xf32>
    %cst_235 = arith.constant 5.000000e-01 : f32
    %323 = vector.broadcast %cst_235 : f32 to vector<2x128xf32>
    %324 = arith.mulf %323, %322 : vector<2x128xf32>
    %cst_236 = arith.constant 5.000000e-01 : f32
    %325 = vector.broadcast %cst_236 : f32 to vector<2x128xf32>
    %326 = arith.addf %324, %325 : vector<2x128xf32>
    %327 = arith.mulf %316, %256 : vector<2x128xf32>
    %328 = arith.mulf %308, %318 : vector<2x128xf32>
    %329 = arith.addf %327, %328 : vector<2x128xf32>
    %330 = math.tanh %329 : vector<2x128xf32>
    %331 = arith.mulf %326, %330 : vector<2x128xf32>
    %332 = vector.broadcast %217 : vector<1x512xf32> to vector<2x512xf32>
    %333 = arith.addf %296, %332 : vector<2x512xf32>
    %334 = arith.truncf %331 : vector<2x128xf32> to vector<2x128xbf16>
    %cst_237 = arith.constant dense<0.000000e+00> : vector<2x512xf32>
    %335 = tpu.matmul %334, %215, %cst_237 {dimension_numbers = #tpu.dot_dimension_numbers<[1], [0], [0], [1], [0, 0, 1, 1], [], []>} : vector<2x128xbf16>, vector<128x512xbf16>, vector<2x512xf32> -> vector<2x512xf32>
    %336 = arith.addf %333, %335 : vector<2x512xf32>
    %337 = vector.extract_strided_slice %336 {offsets = [0, 0], sizes = [2, 128], strides = [1, 1]} : vector<2x512xf32> to vector<2x128xf32>
    %cst_238 = arith.constant 5.000000e-01 : f32
    %338 = vector.broadcast %cst_238 : f32 to vector<2x128xf32>
    %339 = arith.mulf %338, %337 : vector<2x128xf32>
    %340 = math.tanh %339 : vector<2x128xf32>
    %cst_239 = arith.constant 5.000000e-01 : f32
    %341 = vector.broadcast %cst_239 : f32 to vector<2x128xf32>
    %342 = arith.mulf %341, %340 : vector<2x128xf32>
    %cst_240 = arith.constant 5.000000e-01 : f32
    %343 = vector.broadcast %cst_240 : f32 to vector<2x128xf32>
    %344 = arith.addf %342, %343 : vector<2x128xf32>
    %345 = vector.extract_strided_slice %336 {offsets = [0, 128], sizes = [2, 128], strides = [1, 1]} : vector<2x512xf32> to vector<2x128xf32>
    %cst_241 = arith.constant 5.000000e-01 : f32
    %346 = vector.broadcast %cst_241 : f32 to vector<2x128xf32>
    %347 = arith.mulf %346, %345 : vector<2x128xf32>
    %348 = math.tanh %347 : vector<2x128xf32>
    %cst_242 = arith.constant 5.000000e-01 : f32
    %349 = vector.broadcast %cst_242 : f32 to vector<2x128xf32>
    %350 = arith.mulf %349, %348 : vector<2x128xf32>
    %cst_243 = arith.constant 5.000000e-01 : f32
    %351 = vector.broadcast %cst_243 : f32 to vector<2x128xf32>
    %352 = arith.addf %350, %351 : vector<2x128xf32>
    %353 = vector.extract_strided_slice %336 {offsets = [0, 256], sizes = [2, 128], strides = [1, 1]} : vector<2x512xf32> to vector<2x128xf32>
    %354 = math.tanh %353 : vector<2x128xf32>
    %355 = vector.extract_strided_slice %336 {offsets = [0, 384], sizes = [2, 128], strides = [1, 1]} : vector<2x512xf32> to vector<2x128xf32>
    %cst_244 = arith.constant 5.000000e-01 : f32
    %356 = vector.broadcast %cst_244 : f32 to vector<2x128xf32>
    %357 = arith.mulf %356, %355 : vector<2x128xf32>
    %358 = math.tanh %357 : vector<2x128xf32>
    %cst_245 = arith.constant 5.000000e-01 : f32
    %359 = vector.broadcast %cst_245 : f32 to vector<2x128xf32>
    %360 = arith.mulf %359, %358 : vector<2x128xf32>
    %cst_246 = arith.constant 5.000000e-01 : f32
    %361 = vector.broadcast %cst_246 : f32 to vector<2x128xf32>
    %362 = arith.addf %360, %361 : vector<2x128xf32>
    %363 = arith.mulf %352, %292 : vector<2x128xf32>
    %364 = arith.mulf %344, %354 : vector<2x128xf32>
    %365 = arith.addf %363, %364 : vector<2x128xf32>
    %366 = math.tanh %365 : vector<2x128xf32>
    %367 = arith.mulf %362, %366 : vector<2x128xf32>
    %368 = arith.truncf %367 : vector<2x128xf32> to vector<2x128xbf16>
    %cst_247 = arith.constant dense<0.000000e+00> : vector<2x512xf32>
    %369 = tpu.matmul %368, %216, %cst_247 {dimension_numbers = #tpu.dot_dimension_numbers<[1], [0], [0], [1], [0, 0, 1, 1], [], []>} : vector<2x128xbf16>, vector<128x512xbf16>, vector<2x512xf32> -> vector<2x512xf32>
    %c4_248 = arith.constant 4 : index
    %c0_249 = arith.constant 0 : index
    %370 = vector.load %arg25[%c4_248, %c0_249] : memref<12x512xf32, #tpu.memory_space<vmem>>, vector<2x512xf32>
    %371 = arith.truncf %331 : vector<2x128xf32> to vector<2x128xbf16>
    %cst_250 = arith.constant dense<0.000000e+00> : vector<2x512xf32>
    %372 = tpu.matmul %371, %214, %cst_250 {dimension_numbers = #tpu.dot_dimension_numbers<[1], [0], [0], [1], [0, 0, 1, 1], [], []>} : vector<2x128xbf16>, vector<128x512xbf16>, vector<2x512xf32> -> vector<2x512xf32>
    %373 = arith.addf %370, %372 : vector<2x512xf32>
    %374 = vector.extract_strided_slice %373 {offsets = [0, 0], sizes = [2, 128], strides = [1, 1]} : vector<2x512xf32> to vector<2x128xf32>
    %cst_251 = arith.constant 5.000000e-01 : f32
    %375 = vector.broadcast %cst_251 : f32 to vector<2x128xf32>
    %376 = arith.mulf %375, %374 : vector<2x128xf32>
    %377 = math.tanh %376 : vector<2x128xf32>
    %cst_252 = arith.constant 5.000000e-01 : f32
    %378 = vector.broadcast %cst_252 : f32 to vector<2x128xf32>
    %379 = arith.mulf %378, %377 : vector<2x128xf32>
    %cst_253 = arith.constant 5.000000e-01 : f32
    %380 = vector.broadcast %cst_253 : f32 to vector<2x128xf32>
    %381 = arith.addf %379, %380 : vector<2x128xf32>
    %382 = vector.extract_strided_slice %373 {offsets = [0, 128], sizes = [2, 128], strides = [1, 1]} : vector<2x512xf32> to vector<2x128xf32>
    %cst_254 = arith.constant 5.000000e-01 : f32
    %383 = vector.broadcast %cst_254 : f32 to vector<2x128xf32>
    %384 = arith.mulf %383, %382 : vector<2x128xf32>
    %385 = math.tanh %384 : vector<2x128xf32>
    %cst_255 = arith.constant 5.000000e-01 : f32
    %386 = vector.broadcast %cst_255 : f32 to vector<2x128xf32>
    %387 = arith.mulf %386, %385 : vector<2x128xf32>
    %cst_256 = arith.constant 5.000000e-01 : f32
    %388 = vector.broadcast %cst_256 : f32 to vector<2x128xf32>
    %389 = arith.addf %387, %388 : vector<2x128xf32>
    %390 = vector.extract_strided_slice %373 {offsets = [0, 256], sizes = [2, 128], strides = [1, 1]} : vector<2x512xf32> to vector<2x128xf32>
    %391 = math.tanh %390 : vector<2x128xf32>
    %392 = vector.extract_strided_slice %373 {offsets = [0, 384], sizes = [2, 128], strides = [1, 1]} : vector<2x512xf32> to vector<2x128xf32>
    %cst_257 = arith.constant 5.000000e-01 : f32
    %393 = vector.broadcast %cst_257 : f32 to vector<2x128xf32>
    %394 = arith.mulf %393, %392 : vector<2x128xf32>
    %395 = math.tanh %394 : vector<2x128xf32>
    %cst_258 = arith.constant 5.000000e-01 : f32
    %396 = vector.broadcast %cst_258 : f32 to vector<2x128xf32>
    %397 = arith.mulf %396, %395 : vector<2x128xf32>
    %cst_259 = arith.constant 5.000000e-01 : f32
    %398 = vector.broadcast %cst_259 : f32 to vector<2x128xf32>
    %399 = arith.addf %397, %398 : vector<2x128xf32>
    %400 = arith.mulf %389, %329 : vector<2x128xf32>
    %401 = arith.mulf %381, %391 : vector<2x128xf32>
    %402 = arith.addf %400, %401 : vector<2x128xf32>
    %403 = math.tanh %402 : vector<2x128xf32>
    %404 = arith.mulf %399, %403 : vector<2x128xf32>
    %405 = vector.broadcast %217 : vector<1x512xf32> to vector<2x512xf32>
    %406 = arith.addf %369, %405 : vector<2x512xf32>
    %407 = arith.truncf %404 : vector<2x128xf32> to vector<2x128xbf16>
    %cst_260 = arith.constant dense<0.000000e+00> : vector<2x512xf32>
    %408 = tpu.matmul %407, %215, %cst_260 {dimension_numbers = #tpu.dot_dimension_numbers<[1], [0], [0], [1], [0, 0, 1, 1], [], []>} : vector<2x128xbf16>, vector<128x512xbf16>, vector<2x512xf32> -> vector<2x512xf32>
    %409 = arith.addf %406, %408 : vector<2x512xf32>
    %410 = vector.extract_strided_slice %409 {offsets = [0, 0], sizes = [2, 128], strides = [1, 1]} : vector<2x512xf32> to vector<2x128xf32>
    %cst_261 = arith.constant 5.000000e-01 : f32
    %411 = vector.broadcast %cst_261 : f32 to vector<2x128xf32>
    %412 = arith.mulf %411, %410 : vector<2x128xf32>
    %413 = math.tanh %412 : vector<2x128xf32>
    %cst_262 = arith.constant 5.000000e-01 : f32
    %414 = vector.broadcast %cst_262 : f32 to vector<2x128xf32>
    %415 = arith.mulf %414, %413 : vector<2x128xf32>
    %cst_263 = arith.constant 5.000000e-01 : f32
    %416 = vector.broadcast %cst_263 : f32 to vector<2x128xf32>
    %417 = arith.addf %415, %416 : vector<2x128xf32>
    %418 = vector.extract_strided_slice %409 {offsets = [0, 128], sizes = [2, 128], strides = [1, 1]} : vector<2x512xf32> to vector<2x128xf32>
    %cst_264 = arith.constant 5.000000e-01 : f32
    %419 = vector.broadcast %cst_264 : f32 to vector<2x128xf32>
    %420 = arith.mulf %419, %418 : vector<2x128xf32>
    %421 = math.tanh %420 : vector<2x128xf32>
    %cst_265 = arith.constant 5.000000e-01 : f32
    %422 = vector.broadcast %cst_265 : f32 to vector<2x128xf32>
    %423 = arith.mulf %422, %421 : vector<2x128xf32>
    %cst_266 = arith.constant 5.000000e-01 : f32
    %424 = vector.broadcast %cst_266 : f32 to vector<2x128xf32>
    %425 = arith.addf %423, %424 : vector<2x128xf32>
    %426 = vector.extract_strided_slice %409 {offsets = [0, 256], sizes = [2, 128], strides = [1, 1]} : vector<2x512xf32> to vector<2x128xf32>
    %427 = math.tanh %426 : vector<2x128xf32>
    %428 = vector.extract_strided_slice %409 {offsets = [0, 384], sizes = [2, 128], strides = [1, 1]} : vector<2x512xf32> to vector<2x128xf32>
    %cst_267 = arith.constant 5.000000e-01 : f32
    %429 = vector.broadcast %cst_267 : f32 to vector<2x128xf32>
    %430 = arith.mulf %429, %428 : vector<2x128xf32>
    %431 = math.tanh %430 : vector<2x128xf32>
    %cst_268 = arith.constant 5.000000e-01 : f32
    %432 = vector.broadcast %cst_268 : f32 to vector<2x128xf32>
    %433 = arith.mulf %432, %431 : vector<2x128xf32>
    %cst_269 = arith.constant 5.000000e-01 : f32
    %434 = vector.broadcast %cst_269 : f32 to vector<2x128xf32>
    %435 = arith.addf %433, %434 : vector<2x128xf32>
    %436 = arith.mulf %425, %365 : vector<2x128xf32>
    %437 = arith.mulf %417, %427 : vector<2x128xf32>
    %438 = arith.addf %436, %437 : vector<2x128xf32>
    %439 = math.tanh %438 : vector<2x128xf32>
    %440 = arith.mulf %435, %439 : vector<2x128xf32>
    %441 = arith.truncf %440 : vector<2x128xf32> to vector<2x128xbf16>
    %cst_270 = arith.constant dense<0.000000e+00> : vector<2x512xf32>
    %442 = tpu.matmul %441, %216, %cst_270 {dimension_numbers = #tpu.dot_dimension_numbers<[1], [0], [0], [1], [0, 0, 1, 1], [], []>} : vector<2x128xbf16>, vector<128x512xbf16>, vector<2x512xf32> -> vector<2x512xf32>
    %c6_271 = arith.constant 6 : index
    %c0_272 = arith.constant 0 : index
    %443 = vector.load %arg25[%c6_271, %c0_272] : memref<12x512xf32, #tpu.memory_space<vmem>>, vector<2x512xf32>
    %444 = arith.truncf %404 : vector<2x128xf32> to vector<2x128xbf16>
    %cst_273 = arith.constant dense<0.000000e+00> : vector<2x512xf32>
    %445 = tpu.matmul %444, %214, %cst_273 {dimension_numbers = #tpu.dot_dimension_numbers<[1], [0], [0], [1], [0, 0, 1, 1], [], []>} : vector<2x128xbf16>, vector<128x512xbf16>, vector<2x512xf32> -> vector<2x512xf32>
    %446 = arith.addf %443, %445 : vector<2x512xf32>
    %447 = vector.extract_strided_slice %446 {offsets = [0, 0], sizes = [2, 128], strides = [1, 1]} : vector<2x512xf32> to vector<2x128xf32>
    %cst_274 = arith.constant 5.000000e-01 : f32
    %448 = vector.broadcast %cst_274 : f32 to vector<2x128xf32>
    %449 = arith.mulf %448, %447 : vector<2x128xf32>
    %450 = math.tanh %449 : vector<2x128xf32>
    %cst_275 = arith.constant 5.000000e-01 : f32
    %451 = vector.broadcast %cst_275 : f32 to vector<2x128xf32>
    %452 = arith.mulf %451, %450 : vector<2x128xf32>
    %cst_276 = arith.constant 5.000000e-01 : f32
    %453 = vector.broadcast %cst_276 : f32 to vector<2x128xf32>
    %454 = arith.addf %452, %453 : vector<2x128xf32>
    %455 = vector.extract_strided_slice %446 {offsets = [0, 128], sizes = [2, 128], strides = [1, 1]} : vector<2x512xf32> to vector<2x128xf32>
    %cst_277 = arith.constant 5.000000e-01 : f32
    %456 = vector.broadcast %cst_277 : f32 to vector<2x128xf32>
    %457 = arith.mulf %456, %455 : vector<2x128xf32>
    %458 = math.tanh %457 : vector<2x128xf32>
    %cst_278 = arith.constant 5.000000e-01 : f32
    %459 = vector.broadcast %cst_278 : f32 to vector<2x128xf32>
    %460 = arith.mulf %459, %458 : vector<2x128xf32>
    %cst_279 = arith.constant 5.000000e-01 : f32
    %461 = vector.broadcast %cst_279 : f32 to vector<2x128xf32>
    %462 = arith.addf %460, %461 : vector<2x128xf32>
    %463 = vector.extract_strided_slice %446 {offsets = [0, 256], sizes = [2, 128], strides = [1, 1]} : vector<2x512xf32> to vector<2x128xf32>
    %464 = math.tanh %463 : vector<2x128xf32>
    %465 = vector.extract_strided_slice %446 {offsets = [0, 384], sizes = [2, 128], strides = [1, 1]} : vector<2x512xf32> to vector<2x128xf32>
    %cst_280 = arith.constant 5.000000e-01 : f32
    %466 = vector.broadcast %cst_280 : f32 to vector<2x128xf32>
    %467 = arith.mulf %466, %465 : vector<2x128xf32>
    %468 = math.tanh %467 : vector<2x128xf32>
    %cst_281 = arith.constant 5.000000e-01 : f32
    %469 = vector.broadcast %cst_281 : f32 to vector<2x128xf32>
    %470 = arith.mulf %469, %468 : vector<2x128xf32>
    %cst_282 = arith.constant 5.000000e-01 : f32
    %471 = vector.broadcast %cst_282 : f32 to vector<2x128xf32>
    %472 = arith.addf %470, %471 : vector<2x128xf32>
    %473 = arith.mulf %462, %402 : vector<2x128xf32>
    %474 = arith.mulf %454, %464 : vector<2x128xf32>
    %475 = arith.addf %473, %474 : vector<2x128xf32>
    %476 = math.tanh %475 : vector<2x128xf32>
    %477 = arith.mulf %472, %476 : vector<2x128xf32>
    %478 = vector.broadcast %217 : vector<1x512xf32> to vector<2x512xf32>
    %479 = arith.addf %442, %478 : vector<2x512xf32>
    %480 = arith.truncf %477 : vector<2x128xf32> to vector<2x128xbf16>
    %cst_283 = arith.constant dense<0.000000e+00> : vector<2x512xf32>
    %481 = tpu.matmul %480, %215, %cst_283 {dimension_numbers = #tpu.dot_dimension_numbers<[1], [0], [0], [1], [0, 0, 1, 1], [], []>} : vector<2x128xbf16>, vector<128x512xbf16>, vector<2x512xf32> -> vector<2x512xf32>
    %482 = arith.addf %479, %481 : vector<2x512xf32>
    %483 = vector.extract_strided_slice %482 {offsets = [0, 0], sizes = [2, 128], strides = [1, 1]} : vector<2x512xf32> to vector<2x128xf32>
    %cst_284 = arith.constant 5.000000e-01 : f32
    %484 = vector.broadcast %cst_284 : f32 to vector<2x128xf32>
    %485 = arith.mulf %484, %483 : vector<2x128xf32>
    %486 = math.tanh %485 : vector<2x128xf32>
    %cst_285 = arith.constant 5.000000e-01 : f32
    %487 = vector.broadcast %cst_285 : f32 to vector<2x128xf32>
    %488 = arith.mulf %487, %486 : vector<2x128xf32>
    %cst_286 = arith.constant 5.000000e-01 : f32
    %489 = vector.broadcast %cst_286 : f32 to vector<2x128xf32>
    %490 = arith.addf %488, %489 : vector<2x128xf32>
    %491 = vector.extract_strided_slice %482 {offsets = [0, 128], sizes = [2, 128], strides = [1, 1]} : vector<2x512xf32> to vector<2x128xf32>
    %cst_287 = arith.constant 5.000000e-01 : f32
    %492 = vector.broadcast %cst_287 : f32 to vector<2x128xf32>
    %493 = arith.mulf %492, %491 : vector<2x128xf32>
    %494 = math.tanh %493 : vector<2x128xf32>
    %cst_288 = arith.constant 5.000000e-01 : f32
    %495 = vector.broadcast %cst_288 : f32 to vector<2x128xf32>
    %496 = arith.mulf %495, %494 : vector<2x128xf32>
    %cst_289 = arith.constant 5.000000e-01 : f32
    %497 = vector.broadcast %cst_289 : f32 to vector<2x128xf32>
    %498 = arith.addf %496, %497 : vector<2x128xf32>
    %499 = vector.extract_strided_slice %482 {offsets = [0, 256], sizes = [2, 128], strides = [1, 1]} : vector<2x512xf32> to vector<2x128xf32>
    %500 = math.tanh %499 : vector<2x128xf32>
    %501 = vector.extract_strided_slice %482 {offsets = [0, 384], sizes = [2, 128], strides = [1, 1]} : vector<2x512xf32> to vector<2x128xf32>
    %cst_290 = arith.constant 5.000000e-01 : f32
    %502 = vector.broadcast %cst_290 : f32 to vector<2x128xf32>
    %503 = arith.mulf %502, %501 : vector<2x128xf32>
    %504 = math.tanh %503 : vector<2x128xf32>
    %cst_291 = arith.constant 5.000000e-01 : f32
    %505 = vector.broadcast %cst_291 : f32 to vector<2x128xf32>
    %506 = arith.mulf %505, %504 : vector<2x128xf32>
    %cst_292 = arith.constant 5.000000e-01 : f32
    %507 = vector.broadcast %cst_292 : f32 to vector<2x128xf32>
    %508 = arith.addf %506, %507 : vector<2x128xf32>
    %509 = arith.mulf %498, %438 : vector<2x128xf32>
    %510 = arith.mulf %490, %500 : vector<2x128xf32>
    %511 = arith.addf %509, %510 : vector<2x128xf32>
    %512 = math.tanh %511 : vector<2x128xf32>
    %513 = arith.mulf %508, %512 : vector<2x128xf32>
    %514 = arith.truncf %513 : vector<2x128xf32> to vector<2x128xbf16>
    %cst_293 = arith.constant dense<0.000000e+00> : vector<2x512xf32>
    %515 = tpu.matmul %514, %216, %cst_293 {dimension_numbers = #tpu.dot_dimension_numbers<[1], [0], [0], [1], [0, 0, 1, 1], [], []>} : vector<2x128xbf16>, vector<128x512xbf16>, vector<2x512xf32> -> vector<2x512xf32>
    %c8_294 = arith.constant 8 : index
    %c0_295 = arith.constant 0 : index
    %516 = vector.load %arg25[%c8_294, %c0_295] : memref<12x512xf32, #tpu.memory_space<vmem>>, vector<2x512xf32>
    %517 = arith.truncf %477 : vector<2x128xf32> to vector<2x128xbf16>
    %cst_296 = arith.constant dense<0.000000e+00> : vector<2x512xf32>
    %518 = tpu.matmul %517, %214, %cst_296 {dimension_numbers = #tpu.dot_dimension_numbers<[1], [0], [0], [1], [0, 0, 1, 1], [], []>} : vector<2x128xbf16>, vector<128x512xbf16>, vector<2x512xf32> -> vector<2x512xf32>
    %519 = arith.addf %516, %518 : vector<2x512xf32>
    %520 = vector.extract_strided_slice %519 {offsets = [0, 0], sizes = [2, 128], strides = [1, 1]} : vector<2x512xf32> to vector<2x128xf32>
    %cst_297 = arith.constant 5.000000e-01 : f32
    %521 = vector.broadcast %cst_297 : f32 to vector<2x128xf32>
    %522 = arith.mulf %521, %520 : vector<2x128xf32>
    %523 = math.tanh %522 : vector<2x128xf32>
    %cst_298 = arith.constant 5.000000e-01 : f32
    %524 = vector.broadcast %cst_298 : f32 to vector<2x128xf32>
    %525 = arith.mulf %524, %523 : vector<2x128xf32>
    %cst_299 = arith.constant 5.000000e-01 : f32
    %526 = vector.broadcast %cst_299 : f32 to vector<2x128xf32>
    %527 = arith.addf %525, %526 : vector<2x128xf32>
    %528 = vector.extract_strided_slice %519 {offsets = [0, 128], sizes = [2, 128], strides = [1, 1]} : vector<2x512xf32> to vector<2x128xf32>
    %cst_300 = arith.constant 5.000000e-01 : f32
    %529 = vector.broadcast %cst_300 : f32 to vector<2x128xf32>
    %530 = arith.mulf %529, %528 : vector<2x128xf32>
    %531 = math.tanh %530 : vector<2x128xf32>
    %cst_301 = arith.constant 5.000000e-01 : f32
    %532 = vector.broadcast %cst_301 : f32 to vector<2x128xf32>
    %533 = arith.mulf %532, %531 : vector<2x128xf32>
    %cst_302 = arith.constant 5.000000e-01 : f32
    %534 = vector.broadcast %cst_302 : f32 to vector<2x128xf32>
    %535 = arith.addf %533, %534 : vector<2x128xf32>
    %536 = vector.extract_strided_slice %519 {offsets = [0, 256], sizes = [2, 128], strides = [1, 1]} : vector<2x512xf32> to vector<2x128xf32>
    %537 = math.tanh %536 : vector<2x128xf32>
    %538 = vector.extract_strided_slice %519 {offsets = [0, 384], sizes = [2, 128], strides = [1, 1]} : vector<2x512xf32> to vector<2x128xf32>
    %cst_303 = arith.constant 5.000000e-01 : f32
    %539 = vector.broadcast %cst_303 : f32 to vector<2x128xf32>
    %540 = arith.mulf %539, %538 : vector<2x128xf32>
    %541 = math.tanh %540 : vector<2x128xf32>
    %cst_304 = arith.constant 5.000000e-01 : f32
    %542 = vector.broadcast %cst_304 : f32 to vector<2x128xf32>
    %543 = arith.mulf %542, %541 : vector<2x128xf32>
    %cst_305 = arith.constant 5.000000e-01 : f32
    %544 = vector.broadcast %cst_305 : f32 to vector<2x128xf32>
    %545 = arith.addf %543, %544 : vector<2x128xf32>
    %546 = arith.mulf %535, %475 : vector<2x128xf32>
    %547 = arith.mulf %527, %537 : vector<2x128xf32>
    %548 = arith.addf %546, %547 : vector<2x128xf32>
    %549 = math.tanh %548 : vector<2x128xf32>
    %550 = arith.mulf %545, %549 : vector<2x128xf32>
    %551 = vector.broadcast %217 : vector<1x512xf32> to vector<2x512xf32>
    %552 = arith.addf %515, %551 : vector<2x512xf32>
    %553 = arith.truncf %550 : vector<2x128xf32> to vector<2x128xbf16>
    %cst_306 = arith.constant dense<0.000000e+00> : vector<2x512xf32>
    %554 = tpu.matmul %553, %215, %cst_306 {dimension_numbers = #tpu.dot_dimension_numbers<[1], [0], [0], [1], [0, 0, 1, 1], [], []>} : vector<2x128xbf16>, vector<128x512xbf16>, vector<2x512xf32> -> vector<2x512xf32>
    %555 = arith.addf %552, %554 : vector<2x512xf32>
    %556 = vector.extract_strided_slice %555 {offsets = [0, 0], sizes = [2, 128], strides = [1, 1]} : vector<2x512xf32> to vector<2x128xf32>
    %cst_307 = arith.constant 5.000000e-01 : f32
    %557 = vector.broadcast %cst_307 : f32 to vector<2x128xf32>
    %558 = arith.mulf %557, %556 : vector<2x128xf32>
    %559 = math.tanh %558 : vector<2x128xf32>
    %cst_308 = arith.constant 5.000000e-01 : f32
    %560 = vector.broadcast %cst_308 : f32 to vector<2x128xf32>
    %561 = arith.mulf %560, %559 : vector<2x128xf32>
    %cst_309 = arith.constant 5.000000e-01 : f32
    %562 = vector.broadcast %cst_309 : f32 to vector<2x128xf32>
    %563 = arith.addf %561, %562 : vector<2x128xf32>
    %564 = vector.extract_strided_slice %555 {offsets = [0, 128], sizes = [2, 128], strides = [1, 1]} : vector<2x512xf32> to vector<2x128xf32>
    %cst_310 = arith.constant 5.000000e-01 : f32
    %565 = vector.broadcast %cst_310 : f32 to vector<2x128xf32>
    %566 = arith.mulf %565, %564 : vector<2x128xf32>
    %567 = math.tanh %566 : vector<2x128xf32>
    %cst_311 = arith.constant 5.000000e-01 : f32
    %568 = vector.broadcast %cst_311 : f32 to vector<2x128xf32>
    %569 = arith.mulf %568, %567 : vector<2x128xf32>
    %cst_312 = arith.constant 5.000000e-01 : f32
    %570 = vector.broadcast %cst_312 : f32 to vector<2x128xf32>
    %571 = arith.addf %569, %570 : vector<2x128xf32>
    %572 = vector.extract_strided_slice %555 {offsets = [0, 256], sizes = [2, 128], strides = [1, 1]} : vector<2x512xf32> to vector<2x128xf32>
    %573 = math.tanh %572 : vector<2x128xf32>
    %574 = vector.extract_strided_slice %555 {offsets = [0, 384], sizes = [2, 128], strides = [1, 1]} : vector<2x512xf32> to vector<2x128xf32>
    %cst_313 = arith.constant 5.000000e-01 : f32
    %575 = vector.broadcast %cst_313 : f32 to vector<2x128xf32>
    %576 = arith.mulf %575, %574 : vector<2x128xf32>
    %577 = math.tanh %576 : vector<2x128xf32>
    %cst_314 = arith.constant 5.000000e-01 : f32
    %578 = vector.broadcast %cst_314 : f32 to vector<2x128xf32>
    %579 = arith.mulf %578, %577 : vector<2x128xf32>
    %cst_315 = arith.constant 5.000000e-01 : f32
    %580 = vector.broadcast %cst_315 : f32 to vector<2x128xf32>
    %581 = arith.addf %579, %580 : vector<2x128xf32>
    %582 = arith.mulf %571, %511 : vector<2x128xf32>
    %583 = arith.mulf %563, %573 : vector<2x128xf32>
    %584 = arith.addf %582, %583 : vector<2x128xf32>
    %585 = math.tanh %584 : vector<2x128xf32>
    %586 = arith.mulf %581, %585 : vector<2x128xf32>
    %587 = arith.truncf %586 : vector<2x128xf32> to vector<2x128xbf16>
    %cst_316 = arith.constant dense<0.000000e+00> : vector<2x512xf32>
    %588 = tpu.matmul %587, %216, %cst_316 {dimension_numbers = #tpu.dot_dimension_numbers<[1], [0], [0], [1], [0, 0, 1, 1], [], []>} : vector<2x128xbf16>, vector<128x512xbf16>, vector<2x512xf32> -> vector<2x512xf32>
    %c10_317 = arith.constant 10 : index
    %c0_318 = arith.constant 0 : index
    %589 = vector.load %arg25[%c10_317, %c0_318] : memref<12x512xf32, #tpu.memory_space<vmem>>, vector<2x512xf32>
    %590 = arith.truncf %550 : vector<2x128xf32> to vector<2x128xbf16>
    %cst_319 = arith.constant dense<0.000000e+00> : vector<2x512xf32>
    %591 = tpu.matmul %590, %214, %cst_319 {dimension_numbers = #tpu.dot_dimension_numbers<[1], [0], [0], [1], [0, 0, 1, 1], [], []>} : vector<2x128xbf16>, vector<128x512xbf16>, vector<2x512xf32> -> vector<2x512xf32>
    %592 = arith.addf %589, %591 : vector<2x512xf32>
    %593 = vector.extract_strided_slice %592 {offsets = [0, 0], sizes = [2, 128], strides = [1, 1]} : vector<2x512xf32> to vector<2x128xf32>
    %cst_320 = arith.constant 5.000000e-01 : f32
    %594 = vector.broadcast %cst_320 : f32 to vector<2x128xf32>
    %595 = arith.mulf %594, %593 : vector<2x128xf32>
    %596 = math.tanh %595 : vector<2x128xf32>
    %cst_321 = arith.constant 5.000000e-01 : f32
    %597 = vector.broadcast %cst_321 : f32 to vector<2x128xf32>
    %598 = arith.mulf %597, %596 : vector<2x128xf32>
    %cst_322 = arith.constant 5.000000e-01 : f32
    %599 = vector.broadcast %cst_322 : f32 to vector<2x128xf32>
    %600 = arith.addf %598, %599 : vector<2x128xf32>
    %601 = vector.extract_strided_slice %592 {offsets = [0, 128], sizes = [2, 128], strides = [1, 1]} : vector<2x512xf32> to vector<2x128xf32>
    %cst_323 = arith.constant 5.000000e-01 : f32
    %602 = vector.broadcast %cst_323 : f32 to vector<2x128xf32>
    %603 = arith.mulf %602, %601 : vector<2x128xf32>
    %604 = math.tanh %603 : vector<2x128xf32>
    %cst_324 = arith.constant 5.000000e-01 : f32
    %605 = vector.broadcast %cst_324 : f32 to vector<2x128xf32>
    %606 = arith.mulf %605, %604 : vector<2x128xf32>
    %cst_325 = arith.constant 5.000000e-01 : f32
    %607 = vector.broadcast %cst_325 : f32 to vector<2x128xf32>
    %608 = arith.addf %606, %607 : vector<2x128xf32>
    %609 = vector.extract_strided_slice %592 {offsets = [0, 256], sizes = [2, 128], strides = [1, 1]} : vector<2x512xf32> to vector<2x128xf32>
    %610 = math.tanh %609 : vector<2x128xf32>
    %611 = vector.extract_strided_slice %592 {offsets = [0, 384], sizes = [2, 128], strides = [1, 1]} : vector<2x512xf32> to vector<2x128xf32>
    %cst_326 = arith.constant 5.000000e-01 : f32
    %612 = vector.broadcast %cst_326 : f32 to vector<2x128xf32>
    %613 = arith.mulf %612, %611 : vector<2x128xf32>
    %614 = math.tanh %613 : vector<2x128xf32>
    %cst_327 = arith.constant 5.000000e-01 : f32
    %615 = vector.broadcast %cst_327 : f32 to vector<2x128xf32>
    %616 = arith.mulf %615, %614 : vector<2x128xf32>
    %cst_328 = arith.constant 5.000000e-01 : f32
    %617 = vector.broadcast %cst_328 : f32 to vector<2x128xf32>
    %618 = arith.addf %616, %617 : vector<2x128xf32>
    %619 = arith.mulf %608, %548 : vector<2x128xf32>
    %620 = arith.mulf %600, %610 : vector<2x128xf32>
    %621 = arith.addf %619, %620 : vector<2x128xf32>
    %622 = math.tanh %621 : vector<2x128xf32>
    %623 = arith.mulf %618, %622 : vector<2x128xf32>
    %624 = vector.broadcast %217 : vector<1x512xf32> to vector<2x512xf32>
    %625 = arith.addf %588, %624 : vector<2x512xf32>
    %626 = arith.truncf %623 : vector<2x128xf32> to vector<2x128xbf16>
    %cst_329 = arith.constant dense<0.000000e+00> : vector<2x512xf32>
    %627 = tpu.matmul %626, %215, %cst_329 {dimension_numbers = #tpu.dot_dimension_numbers<[1], [0], [0], [1], [0, 0, 1, 1], [], []>} : vector<2x128xbf16>, vector<128x512xbf16>, vector<2x512xf32> -> vector<2x512xf32>
    %628 = arith.addf %625, %627 : vector<2x512xf32>
    %629 = vector.extract_strided_slice %628 {offsets = [0, 0], sizes = [2, 128], strides = [1, 1]} : vector<2x512xf32> to vector<2x128xf32>
    %cst_330 = arith.constant 5.000000e-01 : f32
    %630 = vector.broadcast %cst_330 : f32 to vector<2x128xf32>
    %631 = arith.mulf %630, %629 : vector<2x128xf32>
    %632 = math.tanh %631 : vector<2x128xf32>
    %cst_331 = arith.constant 5.000000e-01 : f32
    %633 = vector.broadcast %cst_331 : f32 to vector<2x128xf32>
    %634 = arith.mulf %633, %632 : vector<2x128xf32>
    %cst_332 = arith.constant 5.000000e-01 : f32
    %635 = vector.broadcast %cst_332 : f32 to vector<2x128xf32>
    %636 = arith.addf %634, %635 : vector<2x128xf32>
    %637 = vector.extract_strided_slice %628 {offsets = [0, 128], sizes = [2, 128], strides = [1, 1]} : vector<2x512xf32> to vector<2x128xf32>
    %cst_333 = arith.constant 5.000000e-01 : f32
    %638 = vector.broadcast %cst_333 : f32 to vector<2x128xf32>
    %639 = arith.mulf %638, %637 : vector<2x128xf32>
    %640 = math.tanh %639 : vector<2x128xf32>
    %cst_334 = arith.constant 5.000000e-01 : f32
    %641 = vector.broadcast %cst_334 : f32 to vector<2x128xf32>
    %642 = arith.mulf %641, %640 : vector<2x128xf32>
    %cst_335 = arith.constant 5.000000e-01 : f32
    %643 = vector.broadcast %cst_335 : f32 to vector<2x128xf32>
    %644 = arith.addf %642, %643 : vector<2x128xf32>
    %645 = vector.extract_strided_slice %628 {offsets = [0, 256], sizes = [2, 128], strides = [1, 1]} : vector<2x512xf32> to vector<2x128xf32>
    %646 = math.tanh %645 : vector<2x128xf32>
    %647 = vector.extract_strided_slice %628 {offsets = [0, 384], sizes = [2, 128], strides = [1, 1]} : vector<2x512xf32> to vector<2x128xf32>
    %cst_336 = arith.constant 5.000000e-01 : f32
    %648 = vector.broadcast %cst_336 : f32 to vector<2x128xf32>
    %649 = arith.mulf %648, %647 : vector<2x128xf32>
    %650 = math.tanh %649 : vector<2x128xf32>
    %cst_337 = arith.constant 5.000000e-01 : f32
    %651 = vector.broadcast %cst_337 : f32 to vector<2x128xf32>
    %652 = arith.mulf %651, %650 : vector<2x128xf32>
    %cst_338 = arith.constant 5.000000e-01 : f32
    %653 = vector.broadcast %cst_338 : f32 to vector<2x128xf32>
    %654 = arith.addf %652, %653 : vector<2x128xf32>
    %655 = arith.mulf %644, %584 : vector<2x128xf32>
    %656 = arith.mulf %636, %646 : vector<2x128xf32>
    %657 = arith.addf %655, %656 : vector<2x128xf32>
    %658 = math.tanh %657 : vector<2x128xf32>
    %659 = arith.mulf %654, %658 : vector<2x128xf32>
    %660 = arith.truncf %659 : vector<2x128xf32> to vector<2x128xbf16>
    %c0_339 = arith.constant 0 : index
    %c0_340 = arith.constant 0 : index
    %661 = vector.load %arg16[%c0_339, %c0_340] : memref<128x128xbf16, #tpu.memory_space<vmem>>, vector<128x128xbf16>
    %cst_341 = arith.constant dense<0.000000e+00> : vector<2x128xf32>
    %662 = tpu.matmul %660, %661, %cst_341 {dimension_numbers = #tpu.dot_dimension_numbers<[1], [0], [0], [1], [0, 0, 1, 1], [], []>} : vector<2x128xbf16>, vector<128x128xbf16>, vector<2x128xf32> -> vector<2x128xf32>
    %c0_342 = arith.constant 0 : index
    %c0_343 = arith.constant 0 : index
    %663 = vector.load %arg17[%c0_342, %c0_343] : memref<1x128xf32, #tpu.memory_space<vmem>>, vector<1x128xf32>
    %664 = vector.broadcast %663 : vector<1x128xf32> to vector<2x128xf32>
    %665 = arith.addf %662, %664 : vector<2x128xf32>
    %cst_344 = arith.constant 0.000000e+00 : f32
    %666 = vector.broadcast %cst_344 : f32 to vector<2x128xf32>
    %667 = arith.maximumf %665, %666 : vector<2x128xf32>
    %668 = arith.truncf %667 : vector<2x128xf32> to vector<2x128xbf16>
    %c0_345 = arith.constant 0 : index
    %c0_346 = arith.constant 0 : index
    %669 = vector.load %arg18[%c0_345, %c0_346] : memref<128x5xbf16, #tpu.memory_space<vmem>>, vector<128x5xbf16>
    %cst_347 = arith.constant dense<0.000000e+00> : vector<2x5xf32>
    %670 = tpu.matmul %668, %669, %cst_347 {dimension_numbers = #tpu.dot_dimension_numbers<[1], [0], [0], [1], [0, 0, 1, 1], [], []>} : vector<2x128xbf16>, vector<128x5xbf16>, vector<2x5xf32> -> vector<2x5xf32>
    %c0_348 = arith.constant 0 : index
    %c0_349 = arith.constant 0 : index
    %671 = vector.load %arg19[%c0_348, %c0_349] : memref<1x5xf32, #tpu.memory_space<vmem>>, vector<1x5xf32>
    %672 = vector.broadcast %671 : vector<1x5xf32> to vector<2x5xf32>
    %673 = arith.addf %670, %672 : vector<2x5xf32>
    %c0_350 = arith.constant 0 : index
    %c0_351 = arith.constant 0 : index
    %674 = vector.load %arg20[%c0_350, %c0_351] : memref<2x5xf32, #tpu.memory_space<vmem>>, vector<2x5xf32>
    tpu.vector_store %arg20[%c0_350, %c0_351], %673 {strides = array<i32>} : memref<2x5xf32, #tpu.memory_space<vmem>>, vector<2x5xf32>,
    return
  }
}

</mosaic_0001>

<bundles_post_ra>
// kernel: eeg_forward.1
= control target key start
LH: loop header
LB: loop body
LE: loop exit
PB: predicated region body
PF: predicated region fallthrough
CT: control target
= control target key end

     0   :  { %s9006_s0 = inlined_call_operand.vmem [shape: f32[256,4], index: 0, kind: input, shape index: {}]   ;;  %s9007_s1 = inlined_call_operand.vmem [shape: bf16[20,32], index: 1, kind: input, shape index: {}]   ;;  %s9008_s2 = inlined_call_operand.vmem [shape: f32[1,32], index: 2, kind: input, shape index: {}]   ;;  %s9009_s3 = inlined_call_operand.vmem [shape: f32[1,32], index: 3, kind: input, shape index: {}]   ;;  %s9010_s4 = inlined_call_operand.vmem [shape: bf16[96,64], index: 4, kind: input, shape index: {}]   ;;  %s9011_s5 = inlined_call_operand.vmem [shape: f32[1,64], index: 5, kind: input, shape index: {}]   ;;  %s9012_s6 = inlined_call_operand.vmem [shape: f32[1,64], index: 6, kind: input, shape index: {}]   ;;  %s9013_s7 = inlined_call_operand.vmem [shape: bf16[192,128], index: 7, kind: input, shape index: {}]   ;;  %s9014_s8 = inlined_call_operand.vmem [shape: f32[1,128], index: 8, kind: input, shape index: {}]   ;;  %s9015_s9 = inlined_call_operand.vmem [shape: f32[1,128], index: 9, kind: input, shape index: {}]   ;;  %s9016_s10 = inlined_call_operand.vmem [shape: bf16[128,512], index: 10, kind: input, shape index: {}]   ;;  %s9017_s11 = inlined_call_operand.hbm [shape: bf16[128,512], index: 11, kind: input, shape index: {}]   ;;  %s9018_s12 = inlined_call_operand.vmem [shape: f32[1,512], index: 12, kind: input, shape index: {}]   ;;  %s9019_s13 = inlined_call_operand.hbm [shape: bf16[128,512], index: 13, kind: input, shape index: {}]   ;;  %s9020_s14 = inlined_call_operand.hbm [shape: bf16[128,512], index: 14, kind: input, shape index: {}]   ;;  %s9021_s15 = inlined_call_operand.vmem [shape: f32[1,512], index: 15, kind: input, shape index: {}]   ;;  %s9022_s16 = inlined_call_operand.vmem [shape: bf16[128,128], index: 16, kind: input, shape index: {}]   ;;  %s9023_s17 = inlined_call_operand.vmem [shape: f32[1,128], index: 17, kind: input, shape index: {}]   ;;  %s9024_s18 = inlined_call_operand.vmem [shape: bf16[128,5], index: 18, kind: input, shape index: {}]   ;;  %s9025_s19 = inlined_call_operand.vmem [shape: f32[1,5], index: 19, kind: input, shape index: {}]   ;;  %s9026_s20 = inlined_call_operand.hbm [shape: f32[2,5], index: 20, kind: output, shape index: {}]  }
   0x1   :  { %9258 = sst [smem:[#allocation78_spill]] %s9006_s0 }
   0x2   :  { %9259 = sst [smem:[#allocation79_spill]] %s9007_s1 }
   0x3   :  { %9260 = sst [smem:[#allocation80_spill]] %s9008_s2 }
   0x4   :  { %9261 = sst [smem:[#allocation81_spill]] %s9009_s3 }
   0x5   :  { %9262 = sst [smem:[#allocation82_spill]] %s9010_s4 }
   0x6   :  { %25 = vsyncpa [#allocation8], 0 }
   0x7   :  { %26 = vsyncpa [#allocation11], 0 }
   0x8   :  { %27 = vsyncpa [#allocation9], 0  ;;  %s6974_s1 = smov [#allocation10]   ;;  %s6975_s23 = smov [#allocation7]  }
   0x9   :  { %s69_s22 = sshll.u32 %s6974_s1, 4  ;;  %s55_s24 = sshll.u32 %s6975_s23, 4  ;;  %s70_s22 = int_to_ptr.vmem [resolvable:$true] %s69_s22  ;;  %s7088_s24 = int_to_ptr.vmem [resolvable:$true] %s55_s24 }
   0xa   :  { %s6880_s3 = scalar_lea.hbm %s9019_s13, 4096 }
   0xb   :  { %p6881_p0 = scmp.ne.s32.totalorder %s9019_s13, %s6880_s3  ;;  %p6884_p1 = scmp.lt.u32.totalorder %s6880_s3, %s9019_s13 }
   0xd   :  { %p6886_p2 = pnand %p6884_p1, %p6881_p0 }
   0xf   :  { %6889 = shalt.err (!%p6886_p2)
}
  0x10   :  { %s6890_s29 = scalar_lea.vmem %s70_s22, 4096  ;;  %p6895_p4 = scmp.lt.s32.totalorder %s70_s22, %s70_s22 }
  0x11   :  { %p6891_p3 = scmp.ne.s32.totalorder %s70_s22, %s6890_s29  ;;  %p6896_p5 = scmp.lt.s32.totalorder %s6890_s29, %s6890_s29 }
  0x13   :  { %p6897_p6 = por %p6896_p5, %p6895_p4 }
  0x15   :  { %p6898_p7 = pnand %p6897_p6, %p6891_p3 }
  0x17   :  { %6901 = shalt.err (!%p6898_p7)
}
  0x18   :  { %s6976_s30 = smov 256   ;;  %s6977_s0 = smov 16  }
  0x19   :  { %75 = dma.hbm_to_vmem [thread:$0]  %s9019_s13, 4096, %s70_s22, [#allocation11], %s6976_s30, %s6976_s30, %s6977_s0  }
  0x1a   :  { %s6902_s25 = scalar_lea.hbm %s9017_s11, 4096 }
  0x1b   :  { %p6903_p8 = scmp.ne.s32.totalorder %s9017_s11, %s6902_s25  ;;  %p6906_p9 = scmp.lt.u32.totalorder %s6902_s25, %s9017_s11 }
  0x1d   :  { %p6908_p10 = pnand %p6906_p9, %p6903_p8 }
  0x1f   :  { %6911 = shalt.err (!%p6908_p10)
}
  0x20   :  { %s6912_s4 = scalar_lea.vmem %s7088_s24, 4096  ;;  %p6917_p12 = scmp.lt.s32.totalorder %s7088_s24, %s7088_s24 }
  0x21   :  { %p6913_p11 = scmp.ne.s32.totalorder %s7088_s24, %s6912_s4  ;;  %p6918_p13 = scmp.lt.s32.totalorder %s6912_s4, %s6912_s4 }
  0x23   :  { %p6919_p0 = por %p6918_p13, %p6917_p12 }
  0x25   :  { %p6920_p1 = pnand %p6919_p0, %p6913_p11 }
  0x27   :  { %6923 = shalt.err (!%p6920_p1)
}
  0x28   :  { %61 = dma.hbm_to_vmem [thread:$0]  %s9017_s11, 4096, %s7088_s24, [#allocation8], %s6976_s30, %s6976_s30, %s6977_s0  }
  0x29   :  { %s6978_s29 = smov [#allocation12]   ;;  %s6924_s2 = scalar_lea.hbm %s9020_s14, 4096 }
  0x2a   :  { %s81_s21 = sshll.u32 %s6978_s29, 4  ;;  %p6925_p2 = scmp.ne.s32.totalorder %s9020_s14, %s6924_s2  ;;  %s82_s21 = int_to_ptr.vmem [resolvable:$true] %s81_s21 }
  0x2b   :  { %p6928_p3 = scmp.lt.u32.totalorder %s6924_s2, %s9020_s14 }
  0x2d   :  { %p6930_p4 = pnand %p6928_p3, %p6925_p2 }
  0x2f   :  { %6933 = shalt.err (!%p6930_p4)
}
  0x30   :  { %s6934_s28 = scalar_lea.vmem %s82_s21, 4096  ;;  %p6939_p6 = scmp.lt.s32.totalorder %s82_s21, %s82_s21 }
  0x31   :  { %p6935_p5 = scmp.ne.s32.totalorder %s82_s21, %s6934_s28  ;;  %p6940_p7 = scmp.lt.s32.totalorder %s6934_s28, %s6934_s28 }
  0x33   :  { %p6941_p8 = por %p6940_p7, %p6939_p6 }
  0x35   :  { %p6942_p9 = pnand %p6941_p8, %p6935_p5 }
  0x37   :  { %6945 = shalt.err (!%p6942_p9)
}
  0x38   :  { %87 = dma.hbm_to_vmem [thread:$0]  %s9020_s14, 4096, %s82_s21, [#allocation11], %s6976_s30, %s6976_s30, %s6977_s0  }
  0x39   :  { %6968 = dma.done.wait [#allocation8], 4096  }
  0x3a   :  { %6969 = vsyncadd [#allocation8], 4294963200 }
  0x3b   :  { %6970 = dma.done.wait [#allocation11], 8192  }
  0x3c   :  { %6971 = vsyncadd [#allocation11], 4294959104  ;;  %vm166_vm0 = vcmask 1041408   ;;  %vm153_vm1 = vcmask 31744   ;;  %s9263_s22 = sld [smem:[#allocation79_spill]]  ;;  %s9264_s25 = sld [smem:[#allocation78_spill]] }
  0x3d   :  { %s9265_s13 = sld [smem:[#allocation82_spill]]  ;;  %s9266_s28 = sld [smem:[#allocation80_spill]]  ;;  %vm684_vm2 = vcmask 261120   ;;  %vm692_vm3 = vcmask 259072   ;;  %vm6980_vm4 = vmmov 0   ;;  %vm1585_vm5 = vcmask 523264  }
  0x3e   :  { %vm1589_vm6 = vcmask 520192   ;;  %s6982_s24 = smov [#allocation13]   ;;  %vm5492_vm7 = vcmask 33792  }
  0x42   :  { %v6414_v0 = vld [vmem:[%s9263_s22] ss:$0 sps:$4 sm:$0xcc]   ;;  %v5517_v3 = vld [vmem:[%s9264_s25 + $0x1] ss:$2 sm:$0xff] }
  0x43   :  { %v6415_v1 = vld [vmem:[%s9263_s22] ss:$0 sps:$4 sm:$0xcc]   ;;  %v152_v2 = vrot.slane %v6414_v0, 2  ;;  %v5518_v4 = vld [vmem:[%s9264_s25 + $0x11] ss:$2 sm:$0xff] }
  0x44   :  { %v739_v5 = vrot.slane %v6415_v1, 2  ;;  %v144_v6 = vpack.c.bf16 %v5518_v4, %v5517_v3  ;;  %v5581_v7 = vld [vmem:[%s9264_s25 + $0x81] ss:$2 sm:$0xff]  ;;  %v5582_v8 = vld [vmem:[%s9264_s25 + $0x91] ss:$2 sm:$0xff] }
  0x45   :  { %6395 = vmatprep.subr.msk.bf16.mxu0 %vm166_vm0, %v152_v2  ;;  %v168_v9 = vsel %vm166_vm0, %v152_v2, 0  ;;  %v731_v10 = vpack.c.bf16 %v5582_v8, %v5581_v7  ;;  %v5519_v11 = vld [vmem:[%s9264_s25 + $0x21] ss:$2 sm:$0xff]  ;;  %v5520_v12 = vld [vmem:[%s9264_s25 + $0x31] ss:$2 sm:$0xff] }
  0x46   :  { %6400 = vmatprep.subr.msk.bf16.mxu1 %vm166_vm0, %v739_v5  ;;  %5968 = vmatpush3.bf16.msra.mxu0 %v168_v9  ;;  %v753_v13 = vsel %vm166_vm0, %v739_v5, 0  ;;  %v145_v14 = vpack.c.bf16 %v5520_v12, %v5519_v11  ;;  %v127_v15 = vld [vmem:[%s9263_s22] sm:$0x3]  ;;  %v5584_v17 = vld [vmem:[%s9264_s25 + $0xb1] ss:$2 sm:$0xff] }
  0x47   :  { %v5583_v16 = vld [vmem:[%s9264_s25 + $0xa1] ss:$2 sm:$0xff]  ;;  %6018 = vmatpush3.bf16.msra.mxu1 %v753_v13  ;;  %5969 = vmatprep.mubr.msk.bf16.mxu0 %vm153_vm1, %v144_v6  ;;  %v248_v19 = vsel %vm166_vm0, %v127_v15, 0  ;;  %v5522_v23 = vld [vmem:[%s9264_s25 + $0x51] ss:$2 sm:$0xff] }
  0x48   :  { %v714_v18 = vld [vmem:[%s9263_s22] sm:$0x3]  ;;  %6019 = vmatprep.mubr.msk.bf16.mxu1 %vm153_vm1, %v731_v10  ;;  %6396 = vmatprep.subr.msk.bf16.mxu0 %vm166_vm0, %v127_v15  ;;  %v732_v20 = vpack.c.bf16 %v5584_v17, %v5583_v16  ;;  %v5586_v26 = vld [vmem:[%s9264_s25 + $0xd1] ss:$2 sm:$0xff]  ;;  %v5510_v33 = vld [vmem:[%s9264_s25 + $0x10] ss:$2 sm:$0xff] }
  0x49   :  { %v833_v21 = vsel %vm166_vm0, %v714_v18, 0  ;;  %v5521_v22 = vld [vmem:[%s9264_s25 + $0x41] ss:$2 sm:$0xff]  ;;  %5970 = vmatmul.mubr.msk.bf16.vlgmr.msra.gmra.mrb[0].mxu0 %vm153_vm1, %v145_v14  ;;  %6401 = vmatprep.subr.msk.bf16.mxu1 %vm166_vm0, %v714_v18  ;;  %v5524_v29 = vld [vmem:[%s9264_s25 + $0x71] ss:$2 sm:$0x3f] }
  0x4a   :  { %v146_v24 = vpack.c.bf16 %v5522_v23, %v5521_v22  ;;  %v5585_v25 = vld [vmem:[%s9264_s25 + $0xc1] ss:$2 sm:$0xff]  ;;  %6020 = vmatmul.mubr.msk.bf16.vlgmr.msra.gmra.mrb[0].mxu1 %vm153_vm1, %v732_v20  ;;  %5978 = vmatpush3.bf16.msra.mxu0 %v248_v19  ;;  %v5588_v31 = vld [vmem:[%s9264_s25 + $0xf1] ss:$2 sm:$0x3f] }
  0x4b   :  { %v5523_v27 = vld [vmem:[%s9264_s25 + $0x61] ss:$2 sm:$0xff]  ;;  %v733_v28 = vpack.c.bf16 %v5586_v26, %v5585_v25  ;;  %6028 = vmatpush3.bf16.msra.mxu1 %v833_v21  ;;  %v108_v32 = vld [vmem:[%s9264_s25] ss:$2 sm:$0xff]  ;;  %v5574_v35 = vld [vmem:[%s9264_s25 + $0x90] ss:$2 sm:$0xff] }
  0x4c   :  { %v5587_v30 = vld [vmem:[%s9264_s25 + $0xe1] ss:$2 sm:$0xff]  ;;  %5973 = vmatprep.mubr.msk.bf16.mxu0 %vm153_vm1, %v146_v24  ;;  %v5573_v34 = vld [vmem:[%s9264_s25 + $0x80] ss:$2 sm:$0xff]  ;;  %v147_v36 = vpack.c.bf16 %v5524_v29, %v5523_v27  ;;  %v123_v39 = vpack.c.bf16 %v5510_v33, %v108_v32  ;;  %v5512_v43 = vld [vmem:[%s9264_s25 + $0x30] ss:$2 sm:$0xff] }
  0x4d   :  { %6023 = vmatprep.mubr.msk.bf16.mxu1 %vm153_vm1, %v733_v28  ;;  %v335_v37 = vld [vmem:[%s9263_s22 + $0x4] sm:$0x3]  ;;  %v734_v38 = vpack.c.bf16 %v5588_v31, %v5587_v30  ;;  %v710_v41 = vpack.c.bf16 %v5574_v35, %v5573_v34  ;;  %v5576_v45 = vld [vmem:[%s9264_s25 + $0xb0] ss:$2 sm:$0xff]  ;;  %v557_v17 = vld [vmem:[%s9263_s22 + $0x8] sm:$0x3] }
  0x4e   :  { %6397 = vmatprep.subr.msk.bf16.mxu0 %vm166_vm0, %v335_v37  ;;  %v920_v40 = vld [vmem:[%s9263_s22 + $0x4] sm:$0x3]  ;;  %v5514_v47 = vld [vmem:[%s9264_s25 + $0x50] ss:$2 sm:$0xff]  ;;  %v349_v53 = vsel %vm166_vm0, %v335_v37, 0  ;;  %v571_v26 = vsel %vm166_vm0, %v557_v17, 0 }
  0x4f   :  { %6402 = vmatprep.subr.msk.bf16.mxu1 %vm166_vm0, %v920_v40  ;;  %v5511_v42 = vld [vmem:[%s9264_s25 + $0x20] ss:$2 sm:$0xff]  ;;  %v5578_v50 = vld [vmem:[%s9264_s25 + $0xd0] ss:$2 sm:$0xff]  ;;  %v934_v56 = vsel %vm166_vm0, %v920_v40, 0 }
  0x50   :  { %v5575_v44 = vld [vmem:[%s9264_s25 + $0xa0] ss:$2 sm:$0xff]  ;;  %v124_v49 = vpack.c.bf16 %v5512_v43, %v5511_v42  ;;  %v5516_v60 = vld [vmem:[%s9264_s25 + $0x70] ss:$2 sm:$0x3f] }
  0x51   :  { %5974 = vmatmul.mubr.msk.bf16.gmra.mrb[4].mxu0 %vm153_vm1, %v147_v36  ;;  %v5513_v46 = vld [vmem:[%s9264_s25 + $0x40] ss:$2 sm:$0xff]  ;;  %v711_v52 = vpack.c.bf16 %v5576_v45, %v5575_v44  ;;  %v5580_v63 = vld [vmem:[%s9264_s25 + $0xf0] ss:$2 sm:$0x3f] }
  0x52   :  { %6024 = vmatmul.mubr.msk.bf16.gmra.mrb[4].mxu1 %vm153_vm1, %v734_v38  ;;  %5979 = vmatprep.mubr.msk.bf16.mxu0 %vm153_vm1, %v123_v39  ;;  %v5577_v48 = vld [vmem:[%s9264_s25 + $0xc0] ss:$2 sm:$0xff]  ;;  %v125_v54 = vpack.c.bf16 %v5514_v47, %v5513_v46  ;;  %v5541_v25 = vld [vmem:[%s9264_s25 + $0x72] ss:$2 sm:$0x3f] }
  0x53   :  { %6029 = vmatprep.mubr.msk.bf16.mxu1 %vm153_vm1, %v710_v41  ;;  %v6416_v51 = vld [vmem:[%s9263_s22 + $0x4] ss:$0 sps:$4 sm:$0xcc]   ;;  %v712_v57 = vpack.c.bf16 %v5578_v50, %v5577_v48  ;;  %v5535_v1 = vld [vmem:[%s9264_s25 + $0x12] ss:$2 sm:$0xff] }
  0x54   :  { %v6417_v55 = vld [vmem:[%s9263_s22 + $0x4] ss:$0 sps:$4 sm:$0xcc]   ;;  %v448_v59 = vrot.slane %v6416_v51, 2  ;;  %v5599_v3 = vld [vmem:[%s9264_s25 + $0x92] ss:$2 sm:$0xff] }
  0x55   :  { %v5515_v58 = vld [vmem:[%s9264_s25 + $0x60] ss:$2 sm:$0xff]  ;;  %v1033_v61 = vrot.slane %v6417_v55, 2  ;;  %v5605_v29 = vld [vmem:[%s9264_s25 + $0xf2] ss:$2 sm:$0x3f] }
  0x56   :  { %v5579_v62 = vld [vmem:[%s9264_s25 + $0xe0] ss:$2 sm:$0xff]  ;;  %v126_v4 = vpack.c.bf16 %v5516_v60, %v5515_v58  ;;  %v462_v20 = vsel %vm166_vm0, %v448_v59, 0  ;;  %v5546_v30 = vld [vmem:[%s9264_s25 + $0x3] ss:$2 sm:$0xff] }
  0x57   :  { %v5534_v0 = vld [vmem:[%s9264_s25 + $0x2] ss:$2 sm:$0xff]  ;;  %v713_v5 = vpack.c.bf16 %v5580_v63, %v5579_v62  ;;  %v5537_v9 = vld [vmem:[%s9264_s25 + $0x32] ss:$2 sm:$0xff]  ;;  %v1047_v22 = vsel %vm166_vm0, %v1033_v61, 0 }
  0x58   :  { %v5598_v2 = vld [vmem:[%s9264_s25 + $0x82] ss:$2 sm:$0xff]  ;;  %v331_v6 = vpack.c.bf16 %v5535_v1, %v5534_v0  ;;  %v5601_v11 = vld [vmem:[%s9264_s25 + $0xb2] ss:$2 sm:$0xff]  ;;  %v5547_v31 = vld [vmem:[%s9264_s25 + $0x13] ss:$2 sm:$0xff] }
  0x59   :  { %5980 = vmatmul.mubr.msk.bf16.vlgmr.msra.gmra.mrb[0].mxu0 %vm153_vm1, %v124_v49  ;;  %v916_v7 = vpack.c.bf16 %v5599_v3, %v5598_v2  ;;  %v5536_v8 = vld [vmem:[%s9264_s25 + $0x22] ss:$2 sm:$0xff]  ;;  %v5539_v13 = vld [vmem:[%s9264_s25 + $0x52] ss:$2 sm:$0xff]  ;;  %v5610_v32 = vld [vmem:[%s9264_s25 + $0x83] ss:$2 sm:$0xff]  ;;  %v440_v36 = vpack.c.bf16 %v5547_v31, %v5546_v30 }
  0x5a   :  { %6030 = vmatmul.mubr.msk.bf16.vlgmr.msra.gmra.mrb[0].mxu1 %vm153_vm1, %v711_v52  ;;  %5988 = vmatpush3.bf16.msra.mxu0 %v349_v53  ;;  %v5600_v10 = vld [vmem:[%s9264_s25 + $0xa2] ss:$2 sm:$0xff]  ;;  %v332_v15 = vpack.c.bf16 %v5537_v9, %v5536_v8  ;;  %v5603_v16 = vld [vmem:[%s9264_s25 + $0xd2] ss:$2 sm:$0xff]  ;;  %v5611_v33 = vld [vmem:[%s9264_s25 + $0x93] ss:$2 sm:$0xff] }
  0x5b   :  { %6038 = vmatpush3.bf16.msra.mxu1 %v934_v56  ;;  %5983 = vmatprep.mubr.msk.bf16.mxu0 %vm153_vm1, %v125_v54  ;;  %v5538_v12 = vld [vmem:[%s9264_s25 + $0x42] ss:$2 sm:$0xff]  ;;  %v917_v19 = vpack.c.bf16 %v5601_v11, %v5600_v10  ;;  %v1025_v37 = vpack.c.bf16 %v5611_v33, %v5610_v32  ;;  %v5548_v38 = vld [vmem:[%s9264_s25 + $0x23] ss:$2 sm:$0xff]  ;;  %v5549_v39 = vld [vmem:[%s9264_s25 + $0x33] ss:$2 sm:$0xff] }
  0x5c   :  { %6033 = vmatprep.mubr.msk.bf16.mxu1 %vm153_vm1, %v712_v57  ;;  %6398 = vmatprep.subr.msk.bf16.mxu0 %vm166_vm0, %v448_v59  ;;  %v5602_v14 = vld [vmem:[%s9264_s25 + $0xc2] ss:$2 sm:$0xff]  ;;  %v333_v21 = vpack.c.bf16 %v5539_v13, %v5538_v12  ;;  %v5612_v40 = vld [vmem:[%s9264_s25 + $0xa3] ss:$2 sm:$0xff]  ;;  %v5613_v41 = vld [vmem:[%s9264_s25 + $0xb3] ss:$2 sm:$0xff]  ;;  %v441_v46 = vpack.c.bf16 %v5549_v39, %v5548_v38 }
  0x5d   :  { %6403 = vmatprep.subr.msk.bf16.mxu1 %vm166_vm0, %v1033_v61  ;;  %v1142_v18 = vld [vmem:[%s9263_s22 + $0x8] sm:$0x3]  ;;  %v918_v23 = vpack.c.bf16 %v5603_v16, %v5602_v14  ;;  %v5551_v43 = vld [vmem:[%s9264_s25 + $0x53] ss:$2 sm:$0xff]  ;;  %v1026_v47 = vpack.c.bf16 %v5613_v41, %v5612_v40  ;;  %v5560_v55 = vld [vmem:[%s9264_s25 + $0x14] ss:$2 sm:$0xff] }
  0x5e   :  { %v5540_v24 = vld [vmem:[%s9264_s25 + $0x62] ss:$2 sm:$0xff]  ;;  %v1156_v27 = vsel %vm166_vm0, %v1142_v18, 0  ;;  %v5550_v42 = vld [vmem:[%s9264_s25 + $0x43] ss:$2 sm:$0xff]  ;;  %s9267_s22 = sld [smem:[#allocation81_spill]] }
  0x5f   :  { %v5604_v28 = vld [vmem:[%s9264_s25 + $0xe2] ss:$2 sm:$0xff]  ;;  %v334_v34 = vpack.c.bf16 %v5541_v25, %v5540_v24  ;;  %v5614_v44 = vld [vmem:[%s9264_s25 + $0xc3] ss:$2 sm:$0xff]  ;;  %v5615_v45 = vld [vmem:[%s9264_s25 + $0xd3] ss:$2 sm:$0xff]  ;;  %v442_v48 = vpack.c.bf16 %v5551_v43, %v5550_v42 }
  0x60   :  { %v919_v35 = vpack.c.bf16 %v5605_v29, %v5604_v28  ;;  %v1027_v49 = vpack.c.bf16 %v5615_v45, %v5614_v44  ;;  %v5552_v50 = vld [vmem:[%s9264_s25 + $0x63] ss:$2 sm:$0xff]  ;;  %v5553_v51 = vld [vmem:[%s9264_s25 + $0x73] ss:$2 sm:$0x3f] }
  0x61   :  { %5984 = vmatmul.mubr.msk.bf16.gmra.mrb[4].mxu0 %vm153_vm1, %v126_v4  ;;  %v5616_v52 = vld [vmem:[%s9264_s25 + $0xe3] ss:$2 sm:$0xff]  ;;  %v5617_v53 = vld [vmem:[%s9264_s25 + $0xf3] ss:$2 sm:$0x3f]  ;;  %v443_v58 = vpack.c.bf16 %v5553_v51, %v5552_v50 }
  0x62   :  { %6034 = vmatmul.mubr.msk.bf16.gmra.mrb[4].mxu1 %vm153_vm1, %v713_v5  ;;  %5989 = vmatprep.mubr.msk.bf16.mxu0 %vm153_vm1, %v331_v6  ;;  %v5559_v54 = vld [vmem:[%s9264_s25 + $0x4] ss:$2 sm:$0xff]  ;;  %v5624_v57 = vld [vmem:[%s9264_s25 + $0x94] ss:$2 sm:$0xff]  ;;  %v1028_v59 = vpack.c.bf16 %v5617_v53, %v5616_v52 }
  0x63   :  { %6039 = vmatprep.mubr.msk.bf16.mxu1 %vm153_vm1, %v916_v7  ;;  %v5623_v56 = vld [vmem:[%s9264_s25 + $0x84] ss:$2 sm:$0xff]  ;;  %v553_v60 = vpack.c.bf16 %v5560_v55, %v5559_v54  ;;  %v5562_v63 = vld [vmem:[%s9264_s25 + $0x34] ss:$2 sm:$0xff] }
  0x64   :  { %v1138_v61 = vpack.c.bf16 %v5624_v57, %v5623_v56  ;;  %v5561_v62 = vld [vmem:[%s9264_s25 + $0x24] ss:$2 sm:$0xff]  ;;  %v5626_v1 = vld [vmem:[%s9264_s25 + $0xb4] ss:$2 sm:$0xff] }
  0x65   :  { %v5625_v0 = vld [vmem:[%s9264_s25 + $0xa4] ss:$2 sm:$0xff]  ;;  %v5564_v3 = vld [vmem:[%s9264_s25 + $0x54] ss:$2 sm:$0xff]  ;;  %v554_v6 = vpack.c.bf16 %v5562_v63, %v5561_v62 }
  0x66   :  { %v5563_v2 = vld [vmem:[%s9264_s25 + $0x44] ss:$2 sm:$0xff]  ;;  %v5628_v5 = vld [vmem:[%s9264_s25 + $0xd4] ss:$2 sm:$0xff]  ;;  %v1139_v7 = vpack.c.bf16 %v5626_v1, %v5625_v0 }
  0x67   :  { %v5627_v4 = vld [vmem:[%s9264_s25 + $0xc4] ss:$2 sm:$0xff]  ;;  %v555_v8 = vpack.c.bf16 %v5564_v3, %v5563_v2  ;;  %v5566_v11 = vld [vmem:[%s9264_s25 + $0x74] ss:$2 sm:$0x3f] }
  0x68   :  { %v1140_v9 = vpack.c.bf16 %v5628_v5, %v5627_v4  ;;  %v5565_v10 = vld [vmem:[%s9264_s25 + $0x64] ss:$2 sm:$0xff]  ;;  %v5630_v13 = vld [vmem:[%s9264_s25 + $0xf4] ss:$2 sm:$0x3f] }
  0x69   :  { %5990 = vmatmul.mubr.msk.bf16.vlgmr.msra.gmra.mrb[0].mxu0 %vm153_vm1, %v332_v15  ;;  %v5629_v12 = vld [vmem:[%s9264_s25 + $0xe4] ss:$2 sm:$0xff]  ;;  %v556_v14 = vpack.c.bf16 %v5566_v11, %v5565_v10  ;;  %v7502_v24 = vld [vmem:[%s9267_s22] ss:$0 sm:$0xff]  ;;  %s5500_s22 = sshll.u32 %s6982_s24, 4  ;;  %s5501_s22 = int_to_ptr.vmem [resolvable:$true] %s5500_s22 }
  0x6a   :  { %6040 = vmatmul.mubr.msk.bf16.vlgmr.msra.gmra.mrb[0].mxu1 %vm153_vm1, %v917_v19  ;;  %5998 = vmatpush3.bf16.msra.mxu0 %v462_v20  ;;  %v1141_v15 = vpack.c.bf16 %v5630_v13, %v5629_v12  ;;  %v6418_v16 = vld [vmem:[%s9265_s13 + $0x10] sm:$0xff]   ;;  %v6421_v19 = vld [vmem:[%s9265_s13 + $0x18] sm:$0xff]   ;;  %v7485_v20 = vld [vmem:[%s9265_s13] sm:$0xff]   ;;  %p6951_p11 = scmp.lt.s32.totalorder %s5501_s22, %s5501_s22 }
  0x6b   :  { %6048 = vmatpush3.bf16.msra.mxu1 %v1047_v22  ;;  %5993 = vmatprep.mubr.msk.bf16.mxu0 %vm153_vm1, %v333_v21  ;;  %v7491_v21 = vld [vmem:[%s9265_s13] sm:$0xff]  }
  0x6c   :  { %6043 = vmatprep.mubr.msk.bf16.mxu1 %vm153_vm1, %v918_v23  ;;  %6399 = vmatprep.subr.msk.bf16.mxu0 %vm166_vm0, %v557_v17  ;;  %v6419_v17 = vld [vmem:[%s9265_s13 + $0x10] sm:$0xff]   ;;  %v7497_v22 = vld [vmem:[%s9266_s28] ss:$0 sm:$0xff] }
  0x6d   :  { %6404 = vmatprep.subr.msk.bf16.mxu1 %vm166_vm0, %v1142_v18  ;;  %v6420_v18 = vld [vmem:[%s9265_s13 + $0x18] sm:$0xff]  }
  0x71   :  { %5994 = vmatmul.mubr.msk.bf16.gmra.mrb[4].mxu0 %vm153_vm1, %v334_v34 }
  0x72   :  { %6044 = vmatmul.mubr.msk.bf16.gmra.mrb[4].mxu1 %vm153_vm1, %v919_v35  ;;  %5999 = vmatprep.mubr.msk.bf16.mxu0 %vm153_vm1, %v440_v36 }
  0x73   :  { %6049 = vmatprep.mubr.msk.bf16.mxu1 %vm153_vm1, %v1025_v37 }
  0x79   :  { %6000 = vmatmul.mubr.msk.bf16.vlgmr.msra.gmra.mrb[0].mxu0 %vm153_vm1, %v441_v46 }
  0x7a   :  { %6050 = vmatmul.mubr.msk.bf16.vlgmr.msra.gmra.mrb[0].mxu1 %vm153_vm1, %v1026_v47  ;;  %6008 = vmatpush3.bf16.msra.mxu0 %v571_v26 }
  0x7b   :  { %6058 = vmatpush3.bf16.msra.mxu1 %v1156_v27  ;;  %6003 = vmatprep.mubr.msk.bf16.mxu0 %vm153_vm1, %v442_v48 }
  0x7c   :  { %6053 = vmatprep.mubr.msk.bf16.mxu1 %vm153_vm1, %v1027_v49  ;;  %6067 = vmatprep.subr.bf16.mxu0 %v6418_v16 }
  0x7d   :  { %6091 = vmatprep.subr.bf16.mxu1 %v6419_v17 }
  0x81   :  { %6004 = vmatmul.mubr.msk.bf16.gmra.mrb[4].mxu0 %vm153_vm1, %v443_v58 }
  0x82   :  { %6054 = vmatmul.mubr.msk.bf16.gmra.mrb[4].mxu1 %vm153_vm1, %v1028_v59  ;;  %6009 = vmatprep.mubr.msk.bf16.mxu0 %vm153_vm1, %v553_v60 }
  0x83   :  { %6059 = vmatprep.mubr.msk.bf16.mxu1 %vm153_vm1, %v1138_v61 }
  0x89   :  { %6010 = vmatmul.mubr.msk.bf16.vlgmr.msra.gmra.mrb[0].mxu0 %vm153_vm1, %v554_v6 }
  0x8a   :  { %6060 = vmatmul.mubr.msk.bf16.vlgmr.msra.gmra.mrb[0].mxu1 %vm153_vm1, %v1139_v7  ;;  %6013 = vmatprep.mubr.msk.bf16.mxu0 %vm153_vm1, %v555_v8 }
  0x8b   :  { %6063 = vmatprep.mubr.msk.bf16.mxu1 %vm153_vm1, %v1140_v9  ;;  %6068 = vmatpush3.bf16.msra.mxu0 %v6418_v16 }
  0x8c   :  { %6092 = vmatpush3.bf16.msra.mxu1 %v6419_v17  ;;  %6069 = vmatprep.subr.bf16.mxu0 %v6420_v18 }
  0x8d   :  { %6093 = vmatprep.subr.bf16.mxu1 %v6421_v19 }
  0x8f   :  { %6070 = vmatpush3.bf16.msra.mxu0 %v6420_v18 }
  0x90   :  { %6094 = vmatpush3.bf16.msra.mxu1 %v6421_v19  ;;  %6075 = vmatprep.subr.bf16.mxu0 %v7485_v20 }
  0x91   :  { %6014 = vmatmul.mubr.msk.bf16.gmra.mrb[4].mxu0 %vm153_vm1, %v556_v14  ;;  %6099 = vmatprep.subr.bf16.mxu1 %v7491_v21 }
  0x92   :  { %6064 = vmatmul.mubr.msk.bf16.gmra.mrb[4].mxu1 %vm153_vm1, %v1141_v15 }
 0x15c   :  { %v6011_v23 = vpop.f32.mrb[0].mxu0 }
 0x15d   :  { %v655_v25 = vmul.f32 %v6011_v23, %v7497_v22  ;;  %v6061_v26 = vpop.f32.mrb[0].mxu1  ;;  %v607_v27 = vpop.f32.mrb[1].mxu0 }
 0x15e   :  { %v1240_v28 = vmul.f32 %v6061_v26, %v7497_v22  ;;  %v653_v29 = vmul.f32 %v7497_v22, %v607_v27  ;;  %v1192_v30 = vpop.f32.mrb[1].mxu1  ;;  %v6012_v31 = vpop.f32.mrb[2].mxu0 }
 0x15f   :  { %v670_v32 = vadd.f32 %v7502_v24, %v655_v25  ;;  %v1238_v33 = vmul.f32 %v7497_v22, %v1192_v30  ;;  %v656_v34 = vmul.f32 %v6012_v31, %v7497_v22  ;;  %v6062_v35 = vpop.f32.mrb[2].mxu1  ;;  %v610_v36 = vpop.f32.mrb[3].mxu0 }
 0x160   :  { %v1255_v37 = vadd.f32 %v7502_v24, %v1240_v28  ;;  %v668_v38 = vadd.f32 %v7502_v24, %v653_v29  ;;  %v1241_v39 = vmul.f32 %v6062_v35, %v7497_v22  ;;  %v654_v40 = vmul.f32 %v7497_v22, %v610_v36  ;;  %v1195_v41 = vpop.f32.mrb[3].mxu1 }
 0x161   :  { %v678_v42 = vmax.f32 %v670_v32, 0.0  ;;  %v1253_v43 = vadd.f32 %v7502_v24, %v1238_v33  ;;  %v671_v44 = vadd.f32 %v7502_v24, %v656_v34  ;;  %v1239_v45 = vmul.f32 %v7497_v22, %v1195_v41 }
 0x162   :  { %v1263_v46 = vmax.f32 %v1255_v37, 0.0  ;;  %v676_v47 = vmax.f32 %v668_v38, 0.0  ;;  %v1256_v48 = vadd.f32 %v7502_v24, %v1241_v39  ;;  %v669_v49 = vadd.f32 %v7502_v24, %v654_v40 }
 0x163   :  { %687 = vst.msk [vmem:[#allocation2 + $0x10] sm:$0xff] %vm684_vm2, %v678_v42  ;;  %v1261_v50 = vmax.f32 %v1253_v43, 0.0  ;;  %v679_v51 = vmax.f32 %v671_v44, 0.0  ;;  %v1254_v52 = vadd.f32 %v7502_v24, %v1239_v45 }
 0x164   :  { %1271 = vst.msk [vmem:[#allocation2 + $0x4e] sm:$0xff] %vm684_vm2, %v1263_v46  ;;  %685 = vst.msk [vmem:[#allocation2] sm:$0xff] %vm684_vm2, %v676_v47  ;;  %v1264_v53 = vmax.f32 %v1256_v48, 0.0  ;;  %v677_v54 = vmax.f32 %v669_v49, 0.0  ;;  %v6015_v55 = vpop.f32.mrb[4].mxu0 }
 0x165   :  { %1269 = vst.msk [vmem:[#allocation2 + $0x3e] sm:$0xff] %vm684_vm2, %v1261_v50  ;;  %688 = vst.msk [vmem:[#allocation2 + $0x18] sm:$0xff] %vm684_vm2, %v679_v51  ;;  %v1262_v56 = vmax.f32 %v1254_v52, 0.0  ;;  %v659_v57 = vmul.f32 %v6015_v55, %v7497_v22  ;;  %v6065_v58 = vpop.f32.mrb[4].mxu1  ;;  %v623_v59 = vpop.f32.mrb[5].mxu0 }
 0x166   :  { %1272 = vst.msk [vmem:[#allocation2 + $0x56] sm:$0xff] %vm684_vm2, %v1264_v53  ;;  %686 = vst.msk [vmem:[#allocation2 + $0x8] sm:$0xff] %vm684_vm2, %v677_v54  ;;  %v1244_v60 = vmul.f32 %v6065_v58, %v7497_v22  ;;  %v657_v61 = vmul.f32 %v7497_v22, %v623_v59  ;;  %v1208_v62 = vpop.f32.mrb[5].mxu1  ;;  %v6016_v63 = vpop.f32.mrb[6].mxu0 }
 0x167   :  { %1270 = vst.msk [vmem:[#allocation2 + $0x46] sm:$0xff] %vm684_vm2, %v1262_v56  ;;  %v674_v0 = vadd.f32 %v7502_v24, %v659_v57  ;;  %v1242_v1 = vmul.f32 %v7497_v22, %v1208_v62  ;;  %v660_v2 = vmul.f32 %v6016_v63, %v7497_v22  ;;  %v6066_v3 = vpop.f32.mrb[6].mxu1  ;;  %v626_v4 = vpop.f32.mrb[7].mxu0 }
 0x168   :  { %v1259_v5 = vadd.f32 %v7502_v24, %v1244_v60  ;;  %v672_v6 = vadd.f32 %v7502_v24, %v657_v61  ;;  %v1245_v7 = vmul.f32 %v6066_v3, %v7497_v22  ;;  %v658_v8 = vmul.f32 %v7497_v22, %v626_v4  ;;  %v1211_v9 = vpop.f32.mrb[7].mxu1  ;;  %v6425_v4 = vld [vmem:[%s9265_s13 + $0x8] sm:$0xff]  }
 0x169   :  { %v682_v10 = vmax.f32 %v674_v0, 0.0  ;;  %v1257_v11 = vadd.f32 %v7502_v24, %v1242_v1  ;;  %v675_v12 = vadd.f32 %v7502_v24, %v660_v2  ;;  %v1243_v13 = vmul.f32 %v7497_v22, %v1211_v9  ;;  %v6424_v1 = vld [vmem:[%s9265_s13 + $0x8] sm:$0xff]  }
 0x16a   :  { %v1267_v14 = vmax.f32 %v1259_v5, 0.0  ;;  %v680_v15 = vmax.f32 %v672_v6, 0.0  ;;  %v1260_v16 = vadd.f32 %v7502_v24, %v1245_v7  ;;  %v673_v17 = vadd.f32 %v7502_v24, %v658_v8  ;;  %v6426_v8 = vld [vmem:[%s9265_s13 + $0x20] sm:$0xff]  }
 0x16b   :  { %691 = vst.msk [vmem:[#allocation2 + $0x30] sm:$0xff] %vm684_vm2, %v682_v10  ;;  %v1265_v18 = vmax.f32 %v1257_v11, 0.0  ;;  %v683_v19 = vmax.f32 %v675_v12, 0.0  ;;  %v1258_v23 = vadd.f32 %v7502_v24, %v1243_v13 }
 0x16c   :  { %1275 = vst.msk [vmem:[#allocation2 + $0x6e] sm:$0xff] %vm684_vm2, %v1267_v14  ;;  %689 = vst.msk [vmem:[#allocation2 + $0x20] sm:$0xff] %vm684_vm2, %v680_v15  ;;  %v1268_v25 = vmax.f32 %v1260_v16, 0.0  ;;  %v681_v26 = vmax.f32 %v673_v17, 0.0  ;;  %v1279_v29 = vld [vmem:[#allocation2 + $0x10] ss:$2 sm:$0xff] }
 0x16d   :  { %1273 = vst.msk [vmem:[#allocation2 + $0x5e] sm:$0xff] %vm684_vm2, %v1265_v18  ;;  %v1266_v22 = vmax.f32 %v1258_v23, 0.0  ;;  %v1303_v27 = vld [vmem:[#allocation2 + $0x2] ss:$2 sm:$0xff]  ;;  %v1311_v28 = vld [vmem:[#allocation2 + $0x3] ss:$2 sm:$0xff] }
 0x16e   :  { %693 = vst.msk [vmem:[#allocation2 + $0x38] sm:$0x3f] %vm692_vm3, %v683_v19  ;;  %1276 = vst.msk [vmem:[#allocation2 + $0x76] sm:$0x3f] %vm692_vm3, %v1268_v25  ;;  %v1618_v24 = vld [vmem:[#allocation2 + $0x40] ss:$2 sm:$0xff]  ;;  %v1318_v39 = vmax.f32 %v1303_v27, %v1311_v28 }
 0x16f   :  { %690 = vst.msk [vmem:[#allocation2 + $0x28] sm:$0xff] %vm684_vm2, %v681_v26  ;;  %1274 = vst.msk [vmem:[#allocation2 + $0x66] sm:$0xff] %vm684_vm2, %v1266_v22  ;;  %v1287_v30 = vld [vmem:[#allocation2 + $0x11] ss:$2 sm:$0xff]  ;;  %v1626_v31 = vld [vmem:[#allocation2 + $0x41] ss:$2 sm:$0xff] }
 0x170   :  { %v1277_v32 = vld [vmem:[#allocation2] ss:$2 sm:$0xff]  ;;  %v1285_v33 = vld [vmem:[#allocation2 + $0x1] ss:$2 sm:$0xff]  ;;  %v1633_v44 = vmax.f32 %v1618_v24, %v1626_v31  ;;  %v1293_v52 = vmax.f32 %v1279_v29, %v1287_v30 }
 0x171   :  { %v1592_v36 = vld [vmem:[#allocation2 + $0x3e] ss:$2 sm:$0xff]  ;;  %v1594_v37 = vld [vmem:[#allocation2 + $0x4e] ss:$2 sm:$0xff]  ;;  %v1600_v38 = vld [vmem:[#allocation2 + $0x3f] ss:$2 sm:$0xff]  ;;  %v1292_v51 = vmax.f32 %v1277_v32, %v1285_v33 }
 0x172   :  { %v1602_v43 = vld [vmem:[#allocation2 + $0x4f] ss:$2 sm:$0xff]  ;;  %v1607_v60 = vmax.f32 %v1592_v36, %v1600_v38  ;;  %v6427_v14 = vld [vmem:[%s9265_s13 + $0x20] sm:$0xff]  }
 0x173   :  { %v1305_v34 = vld [vmem:[#allocation2 + $0x12] ss:$2 sm:$0xff]  ;;  %v1313_v35 = vld [vmem:[#allocation2 + $0x13] ss:$2 sm:$0xff]  ;;  %v1608_v61 = vmax.f32 %v1594_v37, %v1602_v43  ;;  %v1296_v2 = vpack.c.bf16 %v1293_v52, %v1292_v51  ;;  %v1778_v28 = vld [vmem:[#allocation2 + $0x42] ss:$2 sm:$0xff] }
 0x174   :  { %v1319_v40 = vmax.f32 %v1305_v34, %v1313_v35  ;;  %v1620_v41 = vld [vmem:[#allocation2 + $0x50] ss:$2 sm:$0xff]  ;;  %v1628_v42 = vld [vmem:[#allocation2 + $0x51] ss:$2 sm:$0xff]  ;;  %v6428_v32 = vld [vmem:[%s9265_s13 + $0x28] sm:$0xff]  }
 0x175   :  { %v1634_v45 = vmax.f32 %v1620_v41, %v1628_v42  ;;  %v1309_v47 = vld [vmem:[#allocation2 + $0x32] ss:$2 sm:$0x1f]  ;;  %v1317_v50 = vld [vmem:[#allocation2 + $0x33] ss:$2 sm:$0x1f]  ;;  %v1611_v5 = vpack.c.bf16 %v1608_v61, %v1607_v60 }
 0x176   :  { %v1307_v46 = vld [vmem:[#allocation2 + $0x22] ss:$2 sm:$0xff]  ;;  %v1322_v48 = vpack.c.bf16 %v1319_v40, %v1318_v39  ;;  %v1315_v49 = vld [vmem:[#allocation2 + $0x23] ss:$2 sm:$0xff]  ;;  %v1321_v55 = vmax.f32 %v1309_v47, %v1317_v50  ;;  %v1788_v25 = vld [vmem:[#allocation2 + $0x53] ss:$2 sm:$0xff] }
 0x177   :  { %v1637_v53 = vpack.c.bf16 %v1634_v45, %v1633_v44  ;;  %v1320_v54 = vmax.f32 %v1307_v46, %v1315_v49  ;;  %v1622_v56 = vld [vmem:[#allocation2 + $0x60] ss:$2 sm:$0xff]  ;;  %v1624_v57 = vld [vmem:[#allocation2 + $0x70] ss:$2 sm:$0x1f] }
 0x178   :  { %6071 = vmatprep.mubr.msk.bf16.mxu0 %vm684_vm2, %v1322_v48  ;;  %v1630_v58 = vld [vmem:[#allocation2 + $0x61] ss:$2 sm:$0xff]  ;;  %v1632_v59 = vld [vmem:[#allocation2 + $0x71] ss:$2 sm:$0x1f] }
 0x179   :  { %6095 = vmatprep.mubr.msk.bf16.mxu1 %vm684_vm2, %v1637_v53  ;;  %v1323_v62 = vpack.c.bf16 %v1321_v55, %v1320_v54  ;;  %v1635_v63 = vmax.f32 %v1622_v56, %v1630_v58  ;;  %v1636_v0 = vmax.f32 %v1624_v57, %v1632_v59  ;;  %v1281_v6 = vld [vmem:[#allocation2 + $0x20] ss:$2 sm:$0xff]  ;;  %v1283_v7 = vld [vmem:[#allocation2 + $0x30] ss:$2 sm:$0x1f]  ;;  %v9030_v54 = vmov 0.0  }
 0x17a   :  { %v1465_v9 = vld [vmem:[#allocation2 + $0x14] ss:$2 sm:$0xff]  ;;  %v1473_v10 = vld [vmem:[#allocation2 + $0x15] ss:$2 sm:$0xff]  ;;  %v1463_v15 = vld [vmem:[#allocation2 + $0x4] ss:$2 sm:$0xff] }
 0x17b   :  { %6072 = vmatmul.mubr.msk.bf16.vlgmr.msra.gmra.mrb[8].mxu0 %vm684_vm2, %v1323_v62  ;;  %v1638_v3 = vpack.c.bf16 %v1636_v0, %v1635_v63  ;;  %v1289_v11 = vld [vmem:[#allocation2 + $0x21] ss:$2 sm:$0xff]  ;;  %v1596_v12 = vld [vmem:[#allocation2 + $0x5e] ss:$2 sm:$0xff]  ;;  %v1479_v26 = vmax.f32 %v1465_v9, %v1473_v10  ;;  %v6434_v57 = vld [vmem:[%s9013_s7 + $0x30] sm:$0xff]  }
 0x17c   :  { %6076 = vmatpush3.bf16.msra.mxu0 %v7485_v20  ;;  %6079 = vmatprep.mubr.msk.bf16.mxu0 %vm684_vm2, %v1296_v2  ;;  %v1291_v20 = vld [vmem:[#allocation2 + $0x31] ss:$2 sm:$0x1f]  ;;  %v1598_v13 = vld [vmem:[#allocation2 + $0x6e] ss:$2 sm:$0x1f]  ;;  %v1294_v18 = vmax.f32 %v1281_v6, %v1289_v11 }
 0x17d   :  { %6096 = vmatmul.mubr.msk.bf16.vlgmr.msra.gmra.mrb[8].mxu1 %vm684_vm2, %v1638_v3  ;;  %6077 = vmatprep.subr.bf16.mxu0 %v6424_v1  ;;  %v1604_v16 = vld [vmem:[#allocation2 + $0x5f] ss:$2 sm:$0xff]  ;;  %v1606_v17 = vld [vmem:[#allocation2 + $0x6f] ss:$2 sm:$0x1f]  ;;  %v1295_v19 = vmax.f32 %v1283_v7, %v1291_v20 }
 0x17e   :  { %6100 = vmatpush3.bf16.msra.mxu1 %v7491_v21  ;;  %6103 = vmatprep.mubr.msk.bf16.mxu1 %vm684_vm2, %v1611_v5  ;;  %v1471_v23 = vld [vmem:[#allocation2 + $0x5] ss:$2 sm:$0xff]  ;;  %v1780_v21 = vld [vmem:[#allocation2 + $0x52] ss:$2 sm:$0xff]  ;;  %v1609_v22 = vmax.f32 %v1596_v12, %v1604_v16  ;;  %v1610_v27 = vmax.f32 %v1598_v13, %v1606_v17  ;;  %v1782_v42 = vld [vmem:[#allocation2 + $0x62] ss:$2 sm:$0xff] }
 0x17f   :  { %6101 = vmatprep.subr.bf16.mxu1 %v6425_v4  ;;  %v1786_v24 = vld [vmem:[#allocation2 + $0x43] ss:$2 sm:$0xff]  ;;  %v1478_v29 = vmax.f32 %v1463_v15, %v1471_v23  ;;  %v1794_v30 = vmax.f32 %v1780_v21, %v1788_v25  ;;  %v1297_v31 = vpack.c.bf16 %v1295_v19, %v1294_v18  ;;  %v1467_v38 = vld [vmem:[#allocation2 + $0x24] ss:$2 sm:$0xff]  ;;  %v6436_v59 = vld [vmem:[%s9013_s7 + $0x38] sm:$0xff]  }
 0x180   :  { %6078 = vmatpush3.bf16.msra.mxu0 %v6424_v1  ;;  %v1793_v34 = vmax.f32 %v1778_v28, %v1786_v24  ;;  %v1612_v35 = vpack.c.bf16 %v1610_v27, %v1609_v22  ;;  %v6429_v36 = vld [vmem:[%s9265_s13 + $0x28] sm:$0xff]   ;;  %v1469_v39 = vld [vmem:[#allocation2 + $0x34] ss:$2 sm:$0x1f]  ;;  %v6430_v52 = vld [vmem:[%s9013_s7 + $0x20] sm:$0xff]  }
 0x181   :  { %6083 = vmatprep.subr.bf16.mxu0 %v6426_v8  ;;  %v1482_v33 = vpack.c.bf16 %v1479_v26, %v1478_v29  ;;  %v1475_v40 = vld [vmem:[#allocation2 + $0x25] ss:$2 sm:$0xff]  ;;  %v1477_v41 = vld [vmem:[#allocation2 + $0x35] ss:$2 sm:$0x1f] }
 0x182   :  { %6102 = vmatpush3.bf16.msra.mxu1 %v6425_v4  ;;  %v1797_v37 = vpack.c.bf16 %v1794_v30, %v1793_v34  ;;  %v1784_v43 = vld [vmem:[#allocation2 + $0x72] ss:$2 sm:$0x1f]  ;;  %v1790_v44 = vld [vmem:[#allocation2 + $0x63] ss:$2 sm:$0xff]  ;;  %v1480_v46 = vmax.f32 %v1467_v38, %v1475_v40  ;;  %v1481_v47 = vmax.f32 %v1469_v39, %v1477_v41 }
 0x183   :  { %6107 = vmatprep.subr.bf16.mxu1 %v6427_v14  ;;  %v1792_v45 = vld [vmem:[#allocation2 + $0x73] ss:$2 sm:$0x1f]  ;;  %v1795_v48 = vmax.f32 %v1782_v42, %v1790_v44  ;;  %v6431_v53 = vld [vmem:[%s9013_s7 + $0x20] sm:$0xff]   ;;  %v6432_v55 = vld [vmem:[%s9013_s7 + $0x28] sm:$0xff]  }
 0x184   :  { %v1796_v49 = vmax.f32 %v1784_v43, %v1792_v45  ;;  %v1483_v50 = vpack.c.bf16 %v1481_v47, %v1480_v46  ;;  %v6433_v56 = vld [vmem:[%s9013_s7 + $0x28] sm:$0xff]   ;;  %v6435_v58 = vld [vmem:[%s9013_s7 + $0x30] sm:$0xff]   ;;  %v6437_v60 = vld [vmem:[%s9013_s7 + $0x38] sm:$0xff]  }
 0x185   :  { %v5649_v61 = vld [vmem:[%s9011_s5] ss:$0 sm:$0xff]  ;;  %v6440_v47 = vld [vmem:[%s9013_s7 + $0x8] sm:$0xff]  }
 0x186   :  { %v1798_v51 = vpack.c.bf16 %v1796_v49, %v1795_v48  ;;  %v5650_v63 = vld [vmem:[%s9012_s6] ss:$0 sm:$0xff]  ;;  %v6441_v48 = vld [vmem:[%s9013_s7 + $0x8] sm:$0xff]   ;;  %v6442_v49 = vld [vmem:[%s9013_s7 + $0x10] sm:$0xff]  }
 0x187   :  { %6080 = vmatmul.mubr.msk.bf16.vlgmr.msra.gmra.mrb[8].mxu0 %vm684_vm2, %v1297_v31  ;;  %v6438_v39 = vld [vmem:[%s9013_s7] sm:$0xff]  }
 0x188   :  { %6084 = vmatpush3.bf16.msra.mxu0 %v6426_v8  ;;  %6087 = vmatprep.mubr.msk.bf16.mxu0 %vm684_vm2, %v1482_v33  ;;  %v6439_v45 = vld [vmem:[%s9013_s7] sm:$0xff]  }
 0x189   :  { %6104 = vmatmul.mubr.msk.bf16.vlgmr.msra.gmra.mrb[8].mxu1 %vm684_vm2, %v1612_v35  ;;  %6085 = vmatprep.subr.bf16.mxu0 %v6428_v32 }
 0x18a   :  { %6108 = vmatpush3.bf16.msra.mxu1 %v6427_v14  ;;  %6111 = vmatprep.mubr.msk.bf16.mxu1 %vm684_vm2, %v1797_v37 }
 0x18b   :  { %6109 = vmatprep.subr.bf16.mxu1 %v6429_v36 }
 0x18c   :  { %6086 = vmatpush3.bf16.msra.mxu0 %v6428_v32 }
 0x18d   :  { %6115 = vmatprep.subr.bf16.mxu0 %v9030_v54 }
 0x18e   :  { %6110 = vmatpush3.bf16.msra.mxu1 %v6429_v36 }
 0x18f   :  { %6151 = vmatprep.subr.bf16.mxu1 %v9030_v54 }
 0x193   :  { %6088 = vmatmul.mubr.msk.bf16.vlgmr.msra.gmra.mrb[8].mxu0 %vm684_vm2, %v1483_v50  ;;  %v6443_v50 = vld [vmem:[%s9013_s7 + $0x10] sm:$0xff]  }
 0x194   :  { %6116 = vmatpush3.bf16.msra.mxu0 %v6430_v52  ;;  %6123 = vmatprep.mubr.msk.bf16.mxu0 %vm6980_vm4, %v9030_v54 }
 0x195   :  { %6112 = vmatmul.mubr.msk.bf16.vlgmr.msra.gmra.mrb[8].mxu1 %vm684_vm2, %v1798_v51  ;;  %6117 = vmatprep.subr.bf16.mxu0 %v9030_v54 }
 0x196   :  { %6152 = vmatpush3.bf16.msra.mxu1 %v6431_v53  ;;  %6159 = vmatprep.mubr.msk.bf16.mxu1 %vm6980_vm4, %v9030_v54 }
 0x197   :  { %6153 = vmatprep.subr.bf16.mxu1 %v9030_v54 }
 0x198   :  { %6118 = vmatpush3.bf16.msra.mxu0 %v6432_v55 }
 0x199   :  { %6119 = vmatprep.subr.bf16.mxu0 %v9030_v54 }
 0x19a   :  { %6154 = vmatpush3.bf16.msra.mxu1 %v6433_v56  ;;  %v6444_v56 = vld [vmem:[%s9013_s7 + $0x18] sm:$0xff]  }
 0x19b   :  { %6155 = vmatprep.subr.bf16.mxu1 %v9030_v54 }
 0x19c   :  { %6120 = vmatpush3.bf16.msra.mxu0 %v6434_v57 }
 0x19d   :  { %6121 = vmatprep.subr.bf16.mxu0 %v9030_v54 }
 0x19e   :  { %6156 = vmatpush3.bf16.msra.mxu1 %v6435_v58 }
 0x19f   :  { %6157 = vmatprep.subr.bf16.mxu1 %v9030_v54 }
 0x1a0   :  { %6122 = vmatpush3.bf16.msra.mxu0 %v6436_v59  ;;  %v6445_v59 = vld [vmem:[%s9013_s7 + $0x18] sm:$0xff]  }
 0x1a1   :  { %6127 = vmatprep.subr.bf16.mxu0 %v9030_v54 }
 0x1a2   :  { %6158 = vmatpush3.bf16.msra.mxu1 %v6437_v60 }
 0x1a3   :  { %6163 = vmatprep.subr.bf16.mxu1 %v9030_v54 }
 0x266   :  { %v6089_v62 = vpop.f32.mrb[8].mxu0 }
 0x267   :  { %v1568_v0 = vmul.f32 %v6089_v62, %v5649_v61  ;;  %v1540_v1 = vpop.f32.mrb[9].mxu0 }
 0x268   :  { %v6113_v2 = vpop.f32.mrb[8].mxu1  ;;  %v1566_v3 = vmul.f32 %v5649_v61, %v1540_v1  ;;  %v6090_v4 = vpop.f32.mrb[10].mxu0  ;;  %v6446_v1 = vld [vmem:[%s9013_s7 + $0x40] sm:$0xff]  }
 0x269   :  { %v1579_v5 = vadd.f32 %v5650_v63, %v1568_v0  ;;  %v1883_v6 = vmul.f32 %v6113_v2, %v5649_v61  ;;  %v1855_v7 = vpop.f32.mrb[9].mxu1  ;;  %v1569_v8 = vmul.f32 %v6090_v4, %v5649_v61  ;;  %v1543_v9 = vpop.f32.mrb[11].mxu0  ;;  %v6447_v4 = vld [vmem:[%s9013_s7 + $0x40] sm:$0xff]  }
 0x26a   :  { %v1577_v10 = vadd.f32 %v5650_v63, %v1566_v3  ;;  %v1881_v11 = vmul.f32 %v5649_v61, %v1855_v7  ;;  %v6114_v20 = vpop.f32.mrb[10].mxu1  ;;  %v1567_v12 = vmul.f32 %v5649_v61, %v1543_v9  ;;  %v6449_v7 = vld [vmem:[%s9013_s7 + $0x48] sm:$0xff]  }
 0x26b   :  { %v1583_v13 = vmax.f32 %v1579_v5, 0.0  ;;  %v1894_v14 = vadd.f32 %v5650_v63, %v1883_v6  ;;  %v1580_v15 = vadd.f32 %v5650_v63, %v1569_v8  ;;  %v1884_v16 = vmul.f32 %v6114_v20, %v5649_v61  ;;  %v1858_v17 = vpop.f32.mrb[11].mxu1  ;;  %v6448_v6 = vld [vmem:[%s9013_s7 + $0x48] sm:$0xff]   ;;  %v6450_v8 = vld [vmem:[%s9013_s7 + $0x50] sm:$0xff]  }
 0x26c   :  { %v1581_v18 = vmax.f32 %v1577_v10, 0.0  ;;  %v1892_v19 = vadd.f32 %v5650_v63, %v1881_v11  ;;  %v1578_v23 = vadd.f32 %v5650_v63, %v1567_v12  ;;  %v1882_v21 = vmul.f32 %v5649_v61, %v1858_v17  ;;  %v6451_v11 = vld [vmem:[%s9013_s7 + $0x50] sm:$0xff]  }
 0x26d   :  { %1588 = vst.msk [vmem:[#allocation3 + $0x10] sm:$0xff] %vm1585_vm5, %v1583_v13  ;;  %v1898_v25 = vmax.f32 %v1894_v14, 0.0  ;;  %v1584_v26 = vmax.f32 %v1580_v15, 0.0  ;;  %v1895_v22 = vadd.f32 %v5650_v63, %v1884_v16  ;;  %v6452_v15 = vld [vmem:[%s9013_s7 + $0x58] sm:$0xff]  }
 0x26e   :  { %1586 = vst.msk [vmem:[#allocation3] sm:$0xff] %vm1585_vm5, %v1581_v18  ;;  %v1896_v27 = vmax.f32 %v1892_v19, 0.0  ;;  %v1582_v28 = vmax.f32 %v1578_v23, 0.0  ;;  %v1893_v24 = vadd.f32 %v5650_v63, %v1882_v21  ;;  %v6456_v23 = vld [vmem:[%s9016_s10 + $0x4] ss:$16 sps:$4 sm:$0xff]   ;;  %v6453_v21 = vld [vmem:[%s9013_s7 + $0x58] sm:$0xff]  }
 0x26f   :  { %1902 = vst.msk [vmem:[#allocation3 + $0x2d] sm:$0xff] %vm1585_vm5, %v1898_v25  ;;  %v1899_v29 = vmax.f32 %v1895_v22, 0.0  ;;  %v6459_v22 = vld [vmem:[%s9016_s10 + $0xc] ss:$16 sps:$4 sm:$0xff]  }
 0x270   :  { %1590 = vst.msk [vmem:[#allocation3 + $0x18] sm:$0x1f] %vm1589_vm6, %v1584_v26  ;;  %v1897_v30 = vmax.f32 %v1893_v24, 0.0  ;;  %v6457_v24 = vld [vmem:[%s9016_s10 + $0x8] ss:$16 sps:$4 sm:$0xff]  }
 0x271   :  { %1900 = vst.msk [vmem:[#allocation3 + $0x1d] sm:$0xff] %vm1585_vm5, %v1896_v27  ;;  %1587 = vst.msk [vmem:[#allocation3 + $0x8] sm:$0xff] %vm1585_vm5, %v1582_v28  ;;  %v6454_v27 = vld [vmem:[%s9016_s10] ss:$16 sps:$4 sm:$0xff]  }
 0x272   :  { %1903 = vst.msk [vmem:[#allocation3 + $0x35] sm:$0x1f] %vm1589_vm6, %v1899_v29 }
 0x273   :  { %1901 = vst.msk [vmem:[#allocation3 + $0x25] sm:$0xff] %vm1585_vm5, %v1897_v30  ;;  %v6462_v30 = vld [vmem:[%s9016_s10 + $0x24] ss:$16 sps:$4 sm:$0xff]  }
 0x274   :  { %v1906_v53 = vld [vmem:[#allocation3 + $0x10] ss:$2 sm:$0xf]  ;;  %v1910_v55 = vld [vmem:[#allocation3 + $0x11] ss:$2 sm:$0xf] }
 0x275   :  { %v1912_v63 = vmax.f32 %v1906_v53, %v1910_v55  ;;  %v6493_v53 = vld [vmem:[%s9016_s10 + $0xc8] ss:$16 sps:$4 sm:$0xff]   ;;  %v6498_v55 = vld [vmem:[%s9016_s10 + $0xe4] ss:$16 sps:$4 sm:$0xff]  }
 0x276   :  { %v2191_v61 = vld [vmem:[#allocation3 + $0x2d] ss:$2 sm:$0xf]  ;;  %v2195_v62 = vld [vmem:[#allocation3 + $0x2e] ss:$2 sm:$0xf] }
 0x277   :  { %v1925_v31 = vld [vmem:[#allocation3 + $0x12] ss:$2 sm:$0xf]  ;;  %v1929_v32 = vld [vmem:[#allocation3 + $0x13] ss:$2 sm:$0xf]  ;;  %v2197_v3 = vmax.f32 %v2191_v61, %v2195_v62 }
 0x278   :  { %v1923_v33 = vld [vmem:[#allocation3 + $0x2] ss:$2 sm:$0xff]  ;;  %v1927_v34 = vld [vmem:[#allocation3 + $0x3] ss:$2 sm:$0xff]  ;;  %v1931_v35 = vmax.f32 %v1925_v31, %v1929_v32  ;;  %v5680_v62 = vld [vmem:[%s9014_s8] ss:$0 sm:$0xff] }
 0x279   :  { %v1930_v36 = vmax.f32 %v1923_v33, %v1927_v34  ;;  %v2210_v37 = vld [vmem:[#allocation3 + $0x2f] ss:$2 sm:$0xf]  ;;  %v2214_v38 = vld [vmem:[#allocation3 + $0x30] ss:$2 sm:$0xf] }
 0x27a   :  { %v2208_v40 = vld [vmem:[#allocation3 + $0x1f] ss:$2 sm:$0xff]  ;;  %v2212_v41 = vld [vmem:[#allocation3 + $0x20] ss:$2 sm:$0xff]  ;;  %v2216_v42 = vmax.f32 %v2210_v37, %v2214_v38 }
 0x27b   :  { %v1932_v43 = vpack.c.bf16 %v1931_v35, %v1930_v36  ;;  %v2215_v44 = vmax.f32 %v2208_v40, %v2212_v41  ;;  %v1904_v51 = vld [vmem:[#allocation3] ss:$2 sm:$0xff]  ;;  %v1908_v52 = vld [vmem:[#allocation3 + $0x1] ss:$2 sm:$0xff] }
 0x27c   :  { %v2189_v57 = vld [vmem:[#allocation3 + $0x1d] ss:$2 sm:$0xff]  ;;  %v2193_v58 = vld [vmem:[#allocation3 + $0x1e] ss:$2 sm:$0xff]  ;;  %v1911_v60 = vmax.f32 %v1904_v51, %v1908_v52 }
 0x27d   :  { %6124 = vmatmul.mubr.msk.bf16.vlgmr.msra.gmra.mrb[12].mxu0 %vm1585_vm5, %v1932_v43  ;;  %v2217_v46 = vpack.c.bf16 %v2216_v42, %v2215_v44  ;;  %v2196_v0 = vmax.f32 %v2189_v57, %v2193_v58  ;;  %v2078_v9 = vld [vmem:[#allocation3 + $0x4] ss:$2 sm:$0xff]  ;;  %v2080_v10 = vld [vmem:[#allocation3 + $0x14] ss:$2 sm:$0xf]  ;;  %v9032_v57 = vmov 0  }
 0x27e   :  { %6128 = vmatpush3.bf16.msra.mxu0 %v6438_v39  ;;  %6135 = vmatprep.mubr.msk.bf16.mxu0 %vm6980_vm4, %v9030_v54  ;;  %v1913_v2 = vpack.c.bf16 %v1912_v63, %v1911_v60  ;;  %v2082_v20 = vld [vmem:[#allocation3 + $0x5] ss:$2 sm:$0xff]  ;;  %v2084_v12 = vld [vmem:[#allocation3 + $0x15] ss:$2 sm:$0xf] }
 0x27f   :  { %6160 = vmatmul.mubr.msk.bf16.vlgmr.msra.gmra.mrb[12].mxu1 %vm1585_vm5, %v2217_v46  ;;  %6129 = vmatprep.subr.bf16.mxu0 %v9030_v54  ;;  %v2198_v5 = vpack.c.bf16 %v2197_v3, %v2196_v0  ;;  %v2363_v13 = vld [vmem:[#allocation3 + $0x21] ss:$2 sm:$0xff]  ;;  %v2365_v14 = vld [vmem:[#allocation3 + $0x31] ss:$2 sm:$0xf]  ;;  %v2085_v18 = vmax.f32 %v2078_v9, %v2082_v20  ;;  %v2086_v19 = vmax.f32 %v2080_v10, %v2084_v12 }
 0x280   :  { %6164 = vmatpush3.bf16.msra.mxu1 %v6439_v45  ;;  %6171 = vmatprep.mubr.msk.bf16.mxu1 %vm6980_vm4, %v9030_v54  ;;  %v2367_v16 = vld [vmem:[#allocation3 + $0x22] ss:$2 sm:$0xff]  ;;  %v2369_v17 = vld [vmem:[#allocation3 + $0x32] ss:$2 sm:$0xf] }
 0x281   :  { %6165 = vmatprep.subr.bf16.mxu1 %v9030_v54  ;;  %v2370_v25 = vmax.f32 %v2363_v13, %v2367_v16  ;;  %v2371_v26 = vmax.f32 %v2365_v14, %v2369_v17  ;;  %v2087_v28 = vpack.c.bf16 %v2086_v19, %v2085_v18  ;;  %v6465_v31 = vld [vmem:[%s9016_s10 + $0x2c] ss:$16 sps:$4 sm:$0xff]   ;;  %v6460_v32 = vld [vmem:[%s9016_s10 + $0x20] ss:$16 sps:$4 sm:$0xff]   ;;  %v6463_v33 = vld [vmem:[%s9016_s10 + $0x28] ss:$16 sps:$4 sm:$0xff]  }
 0x282   :  { %6130 = vmatpush3.bf16.msra.mxu0 %v6440_v47  ;;  %v6468_v34 = vld [vmem:[%s9016_s10 + $0x44] ss:$16 sps:$4 sm:$0xff]   ;;  %v6471_v35 = vld [vmem:[%s9016_s10 + $0x4c] ss:$16 sps:$4 sm:$0xff]   ;;  %v6466_v36 = vld [vmem:[%s9016_s10 + $0x40] ss:$16 sps:$4 sm:$0xff]  }
 0x283   :  { %6131 = vmatprep.subr.bf16.mxu0 %v9030_v54  ;;  %v2372_v29 = vpack.c.bf16 %v2371_v26, %v2370_v25  ;;  %v6469_v37 = vld [vmem:[%s9016_s10 + $0x48] ss:$16 sps:$4 sm:$0xff]   ;;  %v6474_v38 = vld [vmem:[%s9016_s10 + $0x64] ss:$16 sps:$4 sm:$0xff]   ;;  %v6477_v39 = vld [vmem:[%s9016_s10 + $0x6c] ss:$16 sps:$4 sm:$0xff]  }
 0x284   :  { %6166 = vmatpush3.bf16.msra.mxu1 %v6441_v48  ;;  %v6472_v40 = vld [vmem:[%s9016_s10 + $0x60] ss:$16 sps:$4 sm:$0xff]   ;;  %v6475_v41 = vld [vmem:[%s9016_s10 + $0x68] ss:$16 sps:$4 sm:$0xff]   ;;  %v6480_v42 = vld [vmem:[%s9016_s10 + $0x84] ss:$16 sps:$4 sm:$0xff]  }
 0x285   :  { %6167 = vmatprep.subr.bf16.mxu1 %v9030_v54  ;;  %v6483_v43 = vld [vmem:[%s9016_s10 + $0x8c] ss:$16 sps:$4 sm:$0xff]   ;;  %v6478_v44 = vld [vmem:[%s9016_s10 + $0x80] ss:$16 sps:$4 sm:$0xff]   ;;  %v6481_v45 = vld [vmem:[%s9016_s10 + $0x88] ss:$16 sps:$4 sm:$0xff]  }
 0x286   :  { %6132 = vmatpush3.bf16.msra.mxu0 %v6442_v49  ;;  %v6484_v46 = vld [vmem:[%s9016_s10 + $0xa0] ss:$16 sps:$4 sm:$0xff]   ;;  %v6486_v47 = vld [vmem:[%s9016_s10 + $0xa4] ss:$16 sps:$4 sm:$0xff]   ;;  %v6487_v48 = vld [vmem:[%s9016_s10 + $0xa8] ss:$16 sps:$4 sm:$0xff]  }
 0x287   :  { %6133 = vmatprep.subr.bf16.mxu0 %v9030_v54  ;;  %v6489_v49 = vld [vmem:[%s9016_s10 + $0xac] ss:$16 sps:$4 sm:$0xff]   ;;  %v6490_v52 = vld [vmem:[%s9016_s10 + $0xc0] ss:$16 sps:$4 sm:$0xff]   ;;  %v7812_v61 = vld [vmem:[#allocation7 + $0xc] ss:$16 sps:$4 sm:$0xff]  }
 0x288   :  { %6168 = vmatpush3.bf16.msra.mxu1 %v6443_v50  ;;  %v6492_v50 = vld [vmem:[%s9016_s10 + $0xc4] ss:$16 sps:$4 sm:$0xff]   ;;  %v6495_v51 = vld [vmem:[%s9016_s10 + $0xcc] ss:$16 sps:$4 sm:$0xff]   ;;  %v6496_v58 = vld [vmem:[%s9016_s10 + $0xe0] ss:$16 sps:$4 sm:$0xff]  }
 0x289   :  { %6169 = vmatprep.subr.bf16.mxu1 %v9030_v54  ;;  %v7810_v60 = vld [vmem:[#allocation7 + $0x4] ss:$16 sps:$4 sm:$0xff]   ;;  %v5681_v0 = vld [vmem:[%s9015_s9] ss:$0 sm:$0xff] }
 0x28a   :  { %6134 = vmatpush3.bf16.msra.mxu0 %v6444_v56  ;;  %v6501_v56 = vld [vmem:[%s9016_s10 + $0xec] ss:$16 sps:$4 sm:$0xff]  }
 0x28b   :  { %6139 = vmatprep.subr.bf16.mxu0 %v9030_v54 }
 0x28c   :  { %6170 = vmatpush3.bf16.msra.mxu1 %v6445_v59  ;;  %v6499_v59 = vld [vmem:[%s9016_s10 + $0xe8] ss:$16 sps:$4 sm:$0xff]  }
 0x28d   :  { %6136 = vmatmul.mubr.msk.bf16.vlgmr.msra.gmra.mrb[12].mxu0 %vm1585_vm5, %v1913_v2  ;;  %6175 = vmatprep.subr.bf16.mxu1 %v9030_v54 }
 0x28e   :  { %6140 = vmatpush3.bf16.msra.mxu0 %v6446_v1  ;;  %6147 = vmatprep.mubr.msk.bf16.mxu0 %vm6980_vm4, %v9030_v54 }
 0x28f   :  { %6172 = vmatmul.mubr.msk.bf16.vlgmr.msra.gmra.mrb[12].mxu1 %vm1585_vm5, %v2198_v5  ;;  %6141 = vmatprep.subr.bf16.mxu0 %v9030_v54 }
 0x290   :  { %6176 = vmatpush3.bf16.msra.mxu1 %v6447_v4  ;;  %6183 = vmatprep.mubr.msk.bf16.mxu1 %vm6980_vm4, %v9030_v54 }
 0x291   :  { %6177 = vmatprep.subr.bf16.mxu1 %v9030_v54 }
 0x292   :  { %6142 = vmatpush3.bf16.msra.mxu0 %v6448_v6 }
 0x293   :  { %6143 = vmatprep.subr.bf16.mxu0 %v9030_v54 }
 0x294   :  { %6178 = vmatpush3.bf16.msra.mxu1 %v6449_v7 }
 0x295   :  { %6179 = vmatprep.subr.bf16.mxu1 %v9030_v54 }
 0x296   :  { %6144 = vmatpush3.bf16.msra.mxu0 %v6450_v8 }
 0x297   :  { %6145 = vmatprep.subr.bf16.mxu0 %v9030_v54 }
 0x298   :  { %6180 = vmatpush3.bf16.msra.mxu1 %v6451_v11 }
 0x299   :  { %6181 = vmatprep.subr.bf16.mxu1 %v9030_v54  ;;  %v8006_v54 = vld [vmem:[#allocation12 + $0xe0] ss:$16 sps:$4 sm:$0xff]  }
 0x29a   :  { %6146 = vmatpush3.bf16.msra.mxu0 %v6452_v15  ;;  %9290 = vst [vmem:[#allocation39_spill] sm:$0xff] %v8006_v54 }
 0x29b   :  { %2725 = vmatprep.subr.bf16.mxu0 %v6456_v23 }
 0x29c   :  { %6182 = vmatpush3.bf16.msra.mxu1 %v6453_v21 }
 0x29d   :  { %6148 = vmatmul.mubr.msk.bf16.vlgmr.msra.gmra.mrb[12].mxu0 %vm1585_vm5, %v2087_v28  ;;  %2768 = vmatprep.subr.bf16.mxu1 %v6459_v22 }
 0x29e   :  { %2726 = vmatpush1.bf16.msra.mxu0 %v6454_v27  ;;  %2757 = vmatprep.mubr.bf16.mxu0 %v9032_v57 }
 0x29f   :  { %6184 = vmatmul.mubr.msk.bf16.vlgmr.msra.gmra.mrb[12].mxu1 %vm1585_vm5, %v2372_v29  ;;  %2727 = vmatprep.subr.bf16.mxu0 %v6462_v30 }
 0x2a0   :  { %2769 = vmatpush1.bf16.msra.mxu1 %v6457_v24  ;;  %2800 = vmatprep.mubr.bf16.mxu1 %v9032_v57 }
 0x2a1   :  { %2770 = vmatprep.subr.bf16.mxu1 %v6465_v31 }
 0x2a2   :  { %2728 = vmatpush1.bf16.msra.mxu0 %v6460_v32 }
 0x2a3   :  { %2729 = vmatprep.subr.bf16.mxu0 %v6468_v34 }
 0x2a4   :  { %2771 = vmatpush1.bf16.msra.mxu1 %v6463_v33 }
 0x2a5   :  { %2772 = vmatprep.subr.bf16.mxu1 %v6471_v35 }
 0x2a6   :  { %2730 = vmatpush1.bf16.msra.mxu0 %v6466_v36 }
 0x2a7   :  { %2731 = vmatprep.subr.bf16.mxu0 %v6474_v38  ;;  %v7822_v38 = vld [vmem:[#allocation7] ss:$16 sps:$4 sm:$0xff]  }
 0x2a8   :  { %2773 = vmatpush1.bf16.msra.mxu1 %v6469_v37 }
 0x2a9   :  { %2774 = vmatprep.subr.bf16.mxu1 %v6477_v39 }
 0x2aa   :  { %2732 = vmatpush1.bf16.msra.mxu0 %v6472_v40 }
 0x2ab   :  { %2733 = vmatprep.subr.bf16.mxu0 %v6480_v42 }
 0x2ac   :  { %2775 = vmatpush1.bf16.msra.mxu1 %v6475_v41  ;;  %v7824_v41 = vld [vmem:[#allocation7 + $0x8] ss:$16 sps:$4 sm:$0xff]  }
 0x2ad   :  { %2776 = vmatprep.subr.bf16.mxu1 %v6483_v43  ;;  %v7826_v43 = vld [vmem:[#allocation7 + $0x24] ss:$16 sps:$4 sm:$0xff]  }
 0x2ae   :  { %2734 = vmatpush1.bf16.msra.mxu0 %v6478_v44  ;;  %v7828_v44 = vld [vmem:[#allocation7 + $0x2c] ss:$16 sps:$4 sm:$0xff]  }
 0x2af   :  { %2735 = vmatprep.subr.bf16.mxu0 %v6486_v47  ;;  %v7838_v47 = vld [vmem:[#allocation7 + $0x44] ss:$16 sps:$4 sm:$0xff]  }
 0x2b0   :  { %2777 = vmatpush1.bf16.msra.mxu1 %v6481_v45  ;;  %v7832_v45 = vld [vmem:[#allocation7 + $0x20] ss:$16 sps:$4 sm:$0xff]  }
 0x2b1   :  { %2778 = vmatprep.subr.bf16.mxu1 %v6489_v49  ;;  %v7846_v49 = vld [vmem:[#allocation7 + $0x40] ss:$16 sps:$4 sm:$0xff]  }
 0x2b2   :  { %2736 = vmatpush1.bf16.msra.mxu0 %v6484_v46  ;;  %v7834_v46 = vld [vmem:[#allocation7 + $0x28] ss:$16 sps:$4 sm:$0xff]  }
 0x2b3   :  { %2737 = vmatprep.subr.bf16.mxu0 %v6492_v50  ;;  %v7848_v50 = vld [vmem:[#allocation7 + $0x48] ss:$16 sps:$4 sm:$0xff]  }
 0x2b4   :  { %2779 = vmatpush1.bf16.msra.mxu1 %v6487_v48  ;;  %v7840_v48 = vld [vmem:[#allocation7 + $0x4c] ss:$16 sps:$4 sm:$0xff]  }
 0x2b5   :  { %2780 = vmatprep.subr.bf16.mxu1 %v6495_v51  ;;  %v7852_v51 = vld [vmem:[#allocation7 + $0x64] ss:$16 sps:$4 sm:$0xff]  }
 0x2b6   :  { %2738 = vmatpush1.bf16.msra.mxu0 %v6490_v52  ;;  %v7854_v52 = vld [vmem:[#allocation7 + $0x6c] ss:$16 sps:$4 sm:$0xff]  }
 0x2b7   :  { %2739 = vmatprep.subr.bf16.mxu0 %v6498_v55  ;;  %v7860_v55 = vld [vmem:[#allocation7 + $0x68] ss:$16 sps:$4 sm:$0xff]  }
 0x2b8   :  { %2781 = vmatpush1.bf16.msra.mxu1 %v6493_v53  ;;  %v7858_v53 = vld [vmem:[#allocation7 + $0x60] ss:$16 sps:$4 sm:$0xff]  }
 0x2b9   :  { %2782 = vmatprep.subr.bf16.mxu1 %v6501_v56  ;;  %v7864_v56 = vld [vmem:[#allocation7 + $0x84] ss:$16 sps:$4 sm:$0xff]  }
 0x2ba   :  { %2740 = vmatpush1.bf16.msra.mxu0 %v6496_v58  ;;  %v7866_v58 = vld [vmem:[#allocation7 + $0x8c] ss:$16 sps:$4 sm:$0xff]  }
 0x2bb   :  { %3080 = vmatprep.subr.bf16.mxu0 %v7810_v60 }
 0x2bc   :  { %2783 = vmatpush1.bf16.msra.mxu1 %v6499_v59  ;;  %v7870_v59 = vld [vmem:[#allocation7 + $0x80] ss:$16 sps:$4 sm:$0xff]  }
 0x2bd   :  { %3121 = vmatprep.subr.bf16.mxu1 %v7812_v61 }
 0x370   :  { %v2157_v63 = vpop.f32.mrb[12].mxu0 }
 0x371   :  { %v2173_v1 = vmul.f32 %v5680_v62, %v2157_v63  ;;  %v6149_v2 = vpop.f32.mrb[13].mxu0  ;;  %v7876_v63 = vld [vmem:[#allocation7 + $0xa4] ss:$16 sps:$4 sm:$0xff]  }
 0x372   :  { %v2442_v3 = vpop.f32.mrb[12].mxu1  ;;  %v2160_v4 = vpop.f32.mrb[14].mxu0  ;;  %v7884_v2 = vld [vmem:[#allocation7 + $0xa8] ss:$16 sps:$4 sm:$0xff]  }
 0x373   :  { %v2182_v5 = vadd.f32 %v5681_v0, %v2173_v1  ;;  %v2458_v6 = vmul.f32 %v5680_v62, %v2442_v3  ;;  %v6185_v7 = vpop.f32.mrb[13].mxu1  ;;  %v2174_v8 = vmul.f32 %v5680_v62, %v2160_v4  ;;  %v6150_v9 = vpop.f32.mrb[15].mxu0  ;;  %v7882_v1 = vld [vmem:[#allocation7 + $0xa0] ss:$16 sps:$4 sm:$0xff]   ;;  %v7888_v3 = vld [vmem:[#allocation7 + $0xc4] ss:$16 sps:$4 sm:$0xff]  }
 0x374   :  { %v2445_v10 = vpop.f32.mrb[14].mxu1  ;;  %v7890_v4 = vld [vmem:[#allocation7 + $0xcc] ss:$16 sps:$4 sm:$0xff]   ;;  %v7900_v7 = vld [vmem:[#allocation7 + $0xe4] ss:$16 sps:$4 sm:$0xff]  }
 0x375   :  { %v2184_v11 = vmax.f32 %v2182_v5, 0.0  ;;  %v2467_v20 = vadd.f32 %v5681_v0, %v2458_v6  ;;  %v2183_v12 = vadd.f32 %v5681_v0, %v2174_v8  ;;  %v2459_v13 = vmul.f32 %v5680_v62, %v2445_v10  ;;  %v6186_v14 = vpop.f32.mrb[15].mxu1  ;;  %v7872_v62 = vld [vmem:[#allocation7 + $0x88] ss:$16 sps:$4 sm:$0xff]   ;;  %v7894_v5 = vld [vmem:[#allocation7 + $0xc0] ss:$16 sps:$4 sm:$0xff]  }
 0x376   :  { %v7896_v6 = vld [vmem:[#allocation7 + $0xc8] ss:$16 sps:$4 sm:$0xff]   ;;  %v7902_v8 = vld [vmem:[#allocation7 + $0xec] ss:$16 sps:$4 sm:$0xff]   ;;  %v7906_v9 = vld [vmem:[#allocation7 + $0xe0] ss:$16 sps:$4 sm:$0xff]  }
 0x377   :  { %2186 = vst [vmem:[#allocation4] sm:$0xff] %v2184_v11  ;;  %v2469_v15 = vmax.f32 %v2467_v20, 0.0  ;;  %v2185_v16 = vmax.f32 %v2183_v12, 0.0  ;;  %v2468_v17 = vadd.f32 %v5681_v0, %v2459_v13  ;;  %v7878_v0 = vld [vmem:[#allocation7 + $0xac] ss:$16 sps:$4 sm:$0xff]  }
 0x378   :  { %v7908_v10 = vld [vmem:[#allocation7 + $0xe8] ss:$16 sps:$4 sm:$0xff]   ;;  %v7918_v11 = vld [vmem:[#allocation12 + $0x4] ss:$16 sps:$4 sm:$0xff]   ;;  %v7920_v20 = vld [vmem:[#allocation12 + $0xc] ss:$16 sps:$4 sm:$0xff]  }
 0x379   :  { %2471 = vst [vmem:[#allocation4 + $0xc] sm:$0xff] %v2469_v15  ;;  %2187 = vst [vmem:[#allocation4 + $0x8] sm:$0xf] %v2185_v16  ;;  %v2470_v18 = vmax.f32 %v2468_v17, 0.0  ;;  %v7922_v12 = vld [vmem:[#allocation12] ss:$16 sps:$4 sm:$0xff]  }
 0x37a   :  { %v7924_v13 = vld [vmem:[#allocation12 + $0x8] ss:$16 sps:$4 sm:$0xff]   ;;  %v7926_v14 = vld [vmem:[#allocation12 + $0x24] ss:$16 sps:$4 sm:$0xff]   ;;  %v7928_v15 = vld [vmem:[#allocation12 + $0x2c] ss:$16 sps:$4 sm:$0xff]  }
 0x37b   :  { %2472 = vst [vmem:[#allocation4 + $0x14] sm:$0xf] %v2470_v18  ;;  %v7934_v16 = vld [vmem:[#allocation12 + $0x20] ss:$16 sps:$4 sm:$0xff]   ;;  %v7936_v17 = vld [vmem:[#allocation12 + $0x28] ss:$16 sps:$4 sm:$0xff]  }
 0x37c   :  { %v7940_v18 = vld [vmem:[#allocation12 + $0x44] ss:$16 sps:$4 sm:$0xff]  }
 0x37d   :  { %9268 = vst [vmem:[#allocation17_spill] sm:$0xff] %v7940_v18 }
 0x380   :  { %v2473_v19 = vld [vmem:[#allocation4] ss:$12 sm:$0x3]  ;;  %v2475_v23 = vld [vmem:[#allocation4 + $0x1] ss:$12 sm:$0x3] }
 0x381   :  { %v2476_v21 = vmax.f32 %v2473_v19, %v2475_v23  ;;  %v2479_v25 = vld [vmem:[#allocation4 + $0x2] ss:$12 sm:$0x3]  ;;  %v2481_v26 = vld [vmem:[#allocation4 + $0x3] ss:$12 sm:$0x3] }
 0x382   :  { %v2482_v22 = vmax.f32 %v2479_v25, %v2481_v26  ;;  %v2485_v27 = vld [vmem:[#allocation4 + $0x4] ss:$12 sm:$0x3]  ;;  %v2487_v28 = vld [vmem:[#allocation4 + $0x5] ss:$12 sm:$0x3] }
 0x383   :  { %2477 = vst [vmem:[#allocation5] sm:$0x3] %v2476_v21  ;;  %v2488_v24 = vmax.f32 %v2485_v27, %v2487_v28  ;;  %v2491_v29 = vld [vmem:[#allocation4 + $0x6] ss:$12 sm:$0x3] }
 0x384   :  { %v2493_v30 = vld [vmem:[#allocation4 + $0x7] ss:$12 sm:$0x3]  ;;  %2483 = vst [vmem:[#allocation5 + $0x2] sm:$0x3] %v2482_v22 }
 0x385   :  { %v2494_v31 = vmax.f32 %v2491_v29, %v2493_v30  ;;  %v2497_v32 = vld [vmem:[#allocation4 + $0x8] ss:$12 sm:$0x3]  ;;  %v2499_v33 = vld [vmem:[#allocation4 + $0x9] ss:$12 sm:$0x3] }
 0x386   :  { %2489 = vst [vmem:[#allocation5 + $0x4] sm:$0x3] %v2488_v24  ;;  %v2500_v34 = vmax.f32 %v2497_v32, %v2499_v33  ;;  %v2503_v35 = vld [vmem:[#allocation4 + $0xa] ss:$12 sm:$0x3] }
 0x387   :  { %v2505_v36 = vld [vmem:[#allocation4 + $0xb] ss:$12 sm:$0x3]  ;;  %2495 = vst [vmem:[#allocation5 + $0x6] sm:$0x3] %v2494_v31 }
 0x388   :  { %v2506_v37 = vmax.f32 %v2503_v35, %v2505_v36  ;;  %2501 = vst [vmem:[#allocation5 + $0x8] sm:$0x3] %v2500_v34  ;;  %v7942_v19 = vld [vmem:[#allocation12 + $0x4c] ss:$16 sps:$4 sm:$0xff]   ;;  %v7946_v23 = vld [vmem:[#allocation12 + $0x40] ss:$16 sps:$4 sm:$0xff]  }
 0x389   :  { %9269 = vst [vmem:[#allocation18_spill] sm:$0xff] %v7942_v19  ;;  %9270 = vst [vmem:[#allocation19_spill] sm:$0xff] %v7946_v23  ;;  %v7948_v21 = vld [vmem:[#allocation12 + $0x48] ss:$16 sps:$4 sm:$0xff]   ;;  %v7952_v25 = vld [vmem:[#allocation12 + $0x64] ss:$16 sps:$4 sm:$0xff]  }
 0x38a   :  { %2507 = vst [vmem:[#allocation5 + $0xa] sm:$0x3] %v2506_v37  ;;  %9271 = vst [vmem:[#allocation20_spill] sm:$0xff] %v7948_v21  ;;  %v7954_v26 = vld [vmem:[#allocation12 + $0x6c] ss:$16 sps:$4 sm:$0xff]  }
 0x38b   :  { %9272 = vst [vmem:[#allocation21_spill] sm:$0xff] %v7952_v25  ;;  %9273 = vst [vmem:[#allocation22_spill] sm:$0xff] %v7954_v26  ;;  %v7958_v22 = vld [vmem:[#allocation12 + $0x60] ss:$16 sps:$4 sm:$0xff]   ;;  %v7960_v27 = vld [vmem:[#allocation12 + $0x68] ss:$16 sps:$4 sm:$0xff]  }
 0x38c   :  { %9274 = vst [vmem:[#allocation23_spill] sm:$0xff] %v7958_v22  ;;  %9275 = vst [vmem:[#allocation24_spill] sm:$0xff] %v7960_v27  ;;  %v7964_v28 = vld [vmem:[#allocation12 + $0x84] ss:$16 sps:$4 sm:$0xff]   ;;  %v7966_v24 = vld [vmem:[#allocation12 + $0x8c] ss:$16 sps:$4 sm:$0xff]  }
 0x38d   :  { %9276 = vst [vmem:[#allocation25_spill] sm:$0xff] %v7964_v28  ;;  %9277 = vst [vmem:[#allocation26_spill] sm:$0xff] %v7966_v24  ;;  %v7970_v29 = vld [vmem:[#allocation12 + $0x80] ss:$16 sps:$4 sm:$0xff]   ;;  %v7972_v30 = vld [vmem:[#allocation12 + $0x88] ss:$16 sps:$4 sm:$0xff]  }
 0x38e   :  { %v2508_v39 = vld [vmem:[#allocation5] sm:$0xff]  ;;  %9278 = vst [vmem:[#allocation27_spill] sm:$0xff] %v7970_v29  ;;  %9279 = vst [vmem:[#allocation28_spill] sm:$0xff] %v7972_v30  ;;  %v7978_v32 = vld [vmem:[#allocation12 + $0xac] ss:$16 sps:$4 sm:$0xff]  }
 0x38f   :  { %v7976_v31 = vld [vmem:[#allocation12 + $0xa4] ss:$16 sps:$4 sm:$0xff]   ;;  %9281 = vst [vmem:[#allocation30_spill] sm:$0xff] %v7978_v32  ;;  %v7982_v33 = vld [vmem:[#allocation12 + $0xa0] ss:$16 sps:$4 sm:$0xff]  }
 0x390   :  { %9280 = vst [vmem:[#allocation29_spill] sm:$0xff] %v7976_v31  ;;  %9282 = vst [vmem:[#allocation31_spill] sm:$0xff] %v7982_v33  ;;  %v7984_v34 = vld [vmem:[#allocation12 + $0xa8] ss:$16 sps:$4 sm:$0xff]   ;;  %v7988_v35 = vld [vmem:[#allocation12 + $0xc4] ss:$16 sps:$4 sm:$0xff]  }
 0x391   :  { %v2509_v40 = vld [vmem:[#allocation5 + $0x8] sm:$0xf]  ;;  %9283 = vst [vmem:[#allocation32_spill] sm:$0xff] %v7984_v34  ;;  %9284 = vst [vmem:[#allocation33_spill] sm:$0xff] %v7988_v35  ;;  %v7990_v36 = vld [vmem:[#allocation12 + $0xcc] ss:$16 sps:$4 sm:$0xff]  }
 0x392   :  { %v2510_v42 = vpack.c.bf16 %v2509_v40, %v2508_v39  ;;  %9285 = vst [vmem:[#allocation34_spill] sm:$0xff] %v7990_v36  ;;  %v7996_v37 = vld [vmem:[#allocation12 + $0xc0] ss:$16 sps:$4 sm:$0xff]   ;;  %v7998_v39 = vld [vmem:[#allocation12 + $0xc8] ss:$16 sps:$4 sm:$0xff]  }
 0x393   :  { %9286 = vst [vmem:[#allocation35_spill] sm:$0xff] %v7996_v37  ;;  %9287 = vst [vmem:[#allocation36_spill] sm:$0xff] %v7998_v39  ;;  %v8002_v40 = vld [vmem:[#allocation12 + $0xe4] ss:$16 sps:$4 sm:$0xff]  }
 0x394   :  { %2758 = vmatmul.mubr.bf16.vlgmr.msra.gmra.mrb[16].mxu0 %v2510_v42  ;;  %2801 = vmatmul.mubr.bf16.vlgmr.msra.gmra.mrb[16].mxu1 %v2510_v42  ;;  %9288 = vst [vmem:[#allocation37_spill] sm:$0xff] %v8002_v40  ;;  %v8004_v42 = vld [vmem:[#allocation12 + $0xec] ss:$16 sps:$4 sm:$0xff]  }
 0x395   :  { %3081 = vmatpush1.bf16.msra.mxu0 %v7822_v38  ;;  %3122 = vmatpush1.bf16.msra.mxu1 %v7824_v41  ;;  %9289 = vst [vmem:[#allocation38_spill] sm:$0xff] %v8004_v42 }
 0x396   :  { %3082 = vmatprep.subr.bf16.mxu0 %v7826_v43  ;;  %3123 = vmatprep.subr.bf16.mxu1 %v7828_v44 }
 0x397   :  { %3112 = vmatprep.mubr.bf16.mxu0 %v9032_v57  ;;  %3153 = vmatprep.mubr.bf16.mxu1 %v9032_v57 }
 0x399   :  { %3083 = vmatpush1.bf16.msra.mxu0 %v7832_v45  ;;  %3124 = vmatpush1.bf16.msra.mxu1 %v7834_v46 }
 0x39a   :  { %3084 = vmatprep.subr.bf16.mxu0 %v7838_v47  ;;  %3125 = vmatprep.subr.bf16.mxu1 %v7840_v48 }
 0x39d   :  { %3085 = vmatpush1.bf16.msra.mxu0 %v7846_v49  ;;  %3126 = vmatpush1.bf16.msra.mxu1 %v7848_v50 }
 0x39e   :  { %3086 = vmatprep.subr.bf16.mxu0 %v7852_v51  ;;  %3127 = vmatprep.subr.bf16.mxu1 %v7854_v52 }
 0x3a1   :  { %3087 = vmatpush1.bf16.msra.mxu0 %v7858_v53  ;;  %3128 = vmatpush1.bf16.msra.mxu1 %v7860_v55 }
 0x3a2   :  { %3088 = vmatprep.subr.bf16.mxu0 %v7864_v56  ;;  %3129 = vmatprep.subr.bf16.mxu1 %v7866_v58 }
 0x3a5   :  { %3089 = vmatpush1.bf16.msra.mxu0 %v7870_v59  ;;  %3130 = vmatpush1.bf16.msra.mxu1 %v7872_v62 }
 0x3a6   :  { %3090 = vmatprep.subr.bf16.mxu0 %v7876_v63  ;;  %3131 = vmatprep.subr.bf16.mxu1 %v7878_v0 }
 0x3a9   :  { %3091 = vmatpush1.bf16.msra.mxu0 %v7882_v1  ;;  %3132 = vmatpush1.bf16.msra.mxu1 %v7884_v2 }
 0x3aa   :  { %3092 = vmatprep.subr.bf16.mxu0 %v7888_v3  ;;  %3133 = vmatprep.subr.bf16.mxu1 %v7890_v4 }
 0x3ad   :  { %3093 = vmatpush1.bf16.msra.mxu0 %v7894_v5  ;;  %3134 = vmatpush1.bf16.msra.mxu1 %v7896_v6 }
 0x3ae   :  { %3094 = vmatprep.subr.bf16.mxu0 %v7900_v7  ;;  %3135 = vmatprep.subr.bf16.mxu1 %v7902_v8 }
 0x3b1   :  { %3095 = vmatpush1.bf16.msra.mxu0 %v7906_v9  ;;  %3136 = vmatpush1.bf16.msra.mxu1 %v7908_v10 }
 0x3b2   :  { %3365 = vmatprep.subr.bf16.mxu0 %v7918_v11  ;;  %3406 = vmatprep.subr.bf16.mxu1 %v7920_v20 }
 0x3b4   :  { %3113 = vmatmul.mubr.bf16.vlgmr.msra.gmra.mrb[20].mxu0 %v9032_v57  ;;  %3154 = vmatmul.mubr.bf16.vlgmr.msra.gmra.mrb[20].mxu1 %v9032_v57 }
 0x3b5   :  { %3397 = vmatprep.mubr.bf16.mxu0 %v9032_v57  ;;  %3438 = vmatprep.mubr.bf16.mxu1 %v9032_v57  ;;  %v8008_v57 = vld [vmem:[#allocation12 + $0xe8] ss:$16 sps:$4 sm:$0xff]  }
 0x3b6   :  { %3366 = vmatpush1.bf16.msra.mxu0 %v7922_v12  ;;  %3407 = vmatpush1.bf16.msra.mxu1 %v7924_v13  ;;  %9291 = vst [vmem:[#allocation40_spill] sm:$0xff] %v8008_v57 }
 0x3b7   :  { %3367 = vmatprep.subr.bf16.mxu0 %v7926_v14  ;;  %3408 = vmatprep.subr.bf16.mxu1 %v7928_v15 }
 0x3ba   :  { %3368 = vmatpush1.bf16.msra.mxu0 %v7934_v16  ;;  %3409 = vmatpush1.bf16.msra.mxu1 %v7936_v17 }
 0x3bb   :  { %3369 = vmatprep.subr.bf16.mxu0 %v7940_v18  ;;  %3410 = vmatprep.subr.bf16.mxu1 %v7942_v19 }
 0x3be   :  { %3370 = vmatpush1.bf16.msra.mxu0 %v7946_v23  ;;  %3411 = vmatpush1.bf16.msra.mxu1 %v7948_v21 }
 0x3bf   :  { %3371 = vmatprep.subr.bf16.mxu0 %v7952_v25  ;;  %3412 = vmatprep.subr.bf16.mxu1 %v7954_v26 }
 0x3c2   :  { %3372 = vmatpush1.bf16.msra.mxu0 %v7958_v22  ;;  %3413 = vmatpush1.bf16.msra.mxu1 %v7960_v27 }
 0x3c3   :  { %3373 = vmatprep.subr.bf16.mxu0 %v7964_v28  ;;  %3414 = vmatprep.subr.bf16.mxu1 %v7966_v24 }
 0x3c6   :  { %3374 = vmatpush1.bf16.msra.mxu0 %v7970_v29  ;;  %3415 = vmatpush1.bf16.msra.mxu1 %v7972_v30 }
 0x3c7   :  { %3375 = vmatprep.subr.bf16.mxu0 %v7976_v31  ;;  %3416 = vmatprep.subr.bf16.mxu1 %v7978_v32 }
 0x3ca   :  { %3376 = vmatpush1.bf16.msra.mxu0 %v7982_v33  ;;  %3417 = vmatpush1.bf16.msra.mxu1 %v7984_v34  ;;  %v9296_v34 = vmov 0  }
 0x3cb   :  { %3377 = vmatprep.subr.bf16.mxu0 %v7988_v35  ;;  %3418 = vmatprep.subr.bf16.mxu1 %v7990_v36  ;;  %v8014_v36 = vld [vmem:[#allocation10 + $0x4] ss:$16 sps:$4 sm:$0xff]   ;;  %v8020_v35 = vld [vmem:[#allocation10 + $0x8] ss:$16 sps:$4 sm:$0xff]  }
 0x3cc   :  { %9292 = vst [vmem:[#allocation41_spill] sm:$0xff] %v8014_v36  ;;  %9295 = vst [vmem:[#allocation44_spill] sm:$0xff] %v8020_v35 }
 0x3ce   :  { %3378 = vmatpush1.bf16.msra.mxu0 %v7996_v37  ;;  %3419 = vmatpush1.bf16.msra.mxu1 %v7998_v39  ;;  %v8016_v37 = vld [vmem:[#allocation10 + $0xc] ss:$16 sps:$4 sm:$0xff]   ;;  %v8018_v39 = vld [vmem:[#allocation10] ss:$16 sps:$4 sm:$0xff]  }
 0x3cf   :  { %3379 = vmatprep.subr.bf16.mxu0 %v8002_v40  ;;  %3420 = vmatprep.subr.bf16.mxu1 %v8004_v42  ;;  %9293 = vst [vmem:[#allocation42_spill] sm:$0xff] %v8016_v37  ;;  %9294 = vst [vmem:[#allocation43_spill] sm:$0xff] %v8018_v39  ;;  %v8032_v42 = vld [vmem:[#allocation10 + $0x20] ss:$16 sps:$4 sm:$0xff]   ;;  %v8034_v40 = vld [vmem:[#allocation10 + $0x28] ss:$16 sps:$4 sm:$0xff]  }
 0x3d0   :  { %9299 = vst [vmem:[#allocation47_spill] sm:$0xff] %v8032_v42  ;;  %9300 = vst [vmem:[#allocation48_spill] sm:$0xff] %v8034_v40 }
 0x3d2   :  { %3380 = vmatpush1.bf16.msra.mxu0 %v8006_v54  ;;  %3421 = vmatpush1.bf16.msra.mxu1 %v8008_v57  ;;  %v8028_v57 = vld [vmem:[#allocation10 + $0x24] ss:$16 sps:$4 sm:$0xff]   ;;  %v8030_v54 = vld [vmem:[#allocation10 + $0x2c] ss:$16 sps:$4 sm:$0xff]  }
 0x3d3   :  { %3608 = vmatprep.subr.bf16.mxu0 %v8014_v36  ;;  %3649 = vmatprep.subr.bf16.mxu1 %v8016_v37  ;;  %9297 = vst [vmem:[#allocation45_spill] sm:$0xff] %v8028_v57  ;;  %9298 = vst [vmem:[#allocation46_spill] sm:$0xff] %v8030_v54  ;;  %v8046_v37 = vld [vmem:[#allocation10 + $0x40] ss:$16 sps:$4 sm:$0xff]   ;;  %v8048_v36 = vld [vmem:[#allocation10 + $0x48] ss:$16 sps:$4 sm:$0xff]  }
 0x3d4   :  { %9303 = vst [vmem:[#allocation51_spill] sm:$0xff] %v8046_v37  ;;  %9304 = vst [vmem:[#allocation52_spill] sm:$0xff] %v8048_v36 }
 0x3d5   :  { %3398 = vmatmul.mubr.bf16.vlgmr.msra.gmra.mrb[24].mxu0 %v9296_v34  ;;  %3439 = vmatmul.mubr.bf16.vlgmr.msra.gmra.mrb[24].mxu1 %v9296_v34 }
 0x3d6   :  { %3609 = vmatpush1.bf16.msra.mxu0 %v8018_v39  ;;  %3650 = vmatpush1.bf16.msra.mxu1 %v8020_v35  ;;  %v8042_v35 = vld [vmem:[#allocation10 + $0x44] ss:$16 sps:$4 sm:$0xff]   ;;  %v8044_v39 = vld [vmem:[#allocation10 + $0x4c] ss:$16 sps:$4 sm:$0xff]  }
 0x3d7   :  { %3640 = vmatprep.mubr.bf16.mxu0 %v9296_v34  ;;  %3681 = vmatprep.mubr.bf16.mxu1 %v9296_v34  ;;  %9301 = vst [vmem:[#allocation49_spill] sm:$0xff] %v8042_v35  ;;  %9302 = vst [vmem:[#allocation50_spill] sm:$0xff] %v8044_v39 }
 0x3d8   :  { %3610 = vmatprep.subr.bf16.mxu0 %v8028_v57  ;;  %3651 = vmatprep.subr.bf16.mxu1 %v8030_v54  ;;  %v8054_v54 = vld [vmem:[#allocation10 + $0x64] ss:$16 sps:$4 sm:$0xff]   ;;  %v8060_v57 = vld [vmem:[#allocation10 + $0x68] ss:$16 sps:$4 sm:$0xff]  }
 0x3d9   :  { %9305 = vst [vmem:[#allocation53_spill] sm:$0xff] %v8054_v54  ;;  %9308 = vst [vmem:[#allocation56_spill] sm:$0xff] %v8060_v57 }
 0x3da   :  { %3611 = vmatpush1.bf16.msra.mxu0 %v8032_v42  ;;  %3652 = vmatpush1.bf16.msra.mxu1 %v8034_v40  ;;  %v8056_v42 = vld [vmem:[#allocation10 + $0x6c] ss:$16 sps:$4 sm:$0xff]   ;;  %v8058_v40 = vld [vmem:[#allocation10 + $0x60] ss:$16 sps:$4 sm:$0xff]  }
 0x3db   :  { %3612 = vmatprep.subr.bf16.mxu0 %v8042_v35  ;;  %3653 = vmatprep.subr.bf16.mxu1 %v8044_v39  ;;  %9306 = vst [vmem:[#allocation54_spill] sm:$0xff] %v8056_v42  ;;  %9307 = vst [vmem:[#allocation55_spill] sm:$0xff] %v8058_v40  ;;  %v8066_v39 = vld [vmem:[#allocation10 + $0x84] ss:$16 sps:$4 sm:$0xff]   ;;  %v8072_v35 = vld [vmem:[#allocation10 + $0x88] ss:$16 sps:$4 sm:$0xff]  }
 0x3dc   :  { %9309 = vst [vmem:[#allocation57_spill] sm:$0xff] %v8066_v39  ;;  %9312 = vst [vmem:[#allocation60_spill] sm:$0xff] %v8072_v35 }
 0x3de   :  { %3613 = vmatpush1.bf16.msra.mxu0 %v8046_v37  ;;  %3654 = vmatpush1.bf16.msra.mxu1 %v8048_v36  ;;  %v8068_v37 = vld [vmem:[#allocation10 + $0x8c] ss:$16 sps:$4 sm:$0xff]   ;;  %v8070_v36 = vld [vmem:[#allocation10 + $0x80] ss:$16 sps:$4 sm:$0xff]  }
 0x3df   :  { %3614 = vmatprep.subr.bf16.mxu0 %v8054_v54  ;;  %3655 = vmatprep.subr.bf16.mxu1 %v8056_v42  ;;  %9310 = vst [vmem:[#allocation58_spill] sm:$0xff] %v8068_v37  ;;  %9311 = vst [vmem:[#allocation59_spill] sm:$0xff] %v8070_v36  ;;  %v8078_v42 = vld [vmem:[#allocation10 + $0xa4] ss:$16 sps:$4 sm:$0xff]   ;;  %v8084_v54 = vld [vmem:[#allocation10 + $0xa8] ss:$16 sps:$4 sm:$0xff]  }
 0x3e0   :  { %9313 = vst [vmem:[#allocation61_spill] sm:$0xff] %v8078_v42  ;;  %9316 = vst [vmem:[#allocation64_spill] sm:$0xff] %v8084_v54 }
 0x3e2   :  { %3615 = vmatpush1.bf16.msra.mxu0 %v8058_v40  ;;  %3656 = vmatpush1.bf16.msra.mxu1 %v8060_v57  ;;  %v8080_v40 = vld [vmem:[#allocation10 + $0xac] ss:$16 sps:$4 sm:$0xff]   ;;  %v8082_v57 = vld [vmem:[#allocation10 + $0xa0] ss:$16 sps:$4 sm:$0xff]  }
 0x3e3   :  { %3616 = vmatprep.subr.bf16.mxu0 %v8066_v39  ;;  %3657 = vmatprep.subr.bf16.mxu1 %v8068_v37  ;;  %9314 = vst [vmem:[#allocation62_spill] sm:$0xff] %v8080_v40  ;;  %9315 = vst [vmem:[#allocation63_spill] sm:$0xff] %v8082_v57  ;;  %v8090_v37 = vld [vmem:[#allocation10 + $0xc4] ss:$16 sps:$4 sm:$0xff]   ;;  %v8096_v39 = vld [vmem:[#allocation10 + $0xc8] ss:$16 sps:$4 sm:$0xff]  }
 0x3e4   :  { %9317 = vst [vmem:[#allocation65_spill] sm:$0xff] %v8090_v37  ;;  %9320 = vst [vmem:[#allocation68_spill] sm:$0xff] %v8096_v39 }
 0x3e6   :  { %3617 = vmatpush1.bf16.msra.mxu0 %v8070_v36  ;;  %3658 = vmatpush1.bf16.msra.mxu1 %v8072_v35  ;;  %v8092_v36 = vld [vmem:[#allocation10 + $0xcc] ss:$16 sps:$4 sm:$0xff]   ;;  %v8094_v35 = vld [vmem:[#allocation10 + $0xc0] ss:$16 sps:$4 sm:$0xff]  }
 0x3e7   :  { %3618 = vmatprep.subr.bf16.mxu0 %v8078_v42  ;;  %3659 = vmatprep.subr.bf16.mxu1 %v8080_v40  ;;  %9318 = vst [vmem:[#allocation66_spill] sm:$0xff] %v8092_v36  ;;  %9319 = vst [vmem:[#allocation67_spill] sm:$0xff] %v8094_v35  ;;  %v8102_v40 = vld [vmem:[#allocation10 + $0xe4] ss:$16 sps:$4 sm:$0xff]   ;;  %v8108_v42 = vld [vmem:[#allocation10 + $0xe8] ss:$16 sps:$4 sm:$0xff]  }
 0x3e8   :  { %9321 = vst [vmem:[#allocation69_spill] sm:$0xff] %v8102_v40  ;;  %9324 = vst [vmem:[#allocation72_spill] sm:$0xff] %v8108_v42 }
 0x3ea   :  { %3619 = vmatpush1.bf16.msra.mxu0 %v8082_v57  ;;  %3660 = vmatpush1.bf16.msra.mxu1 %v8084_v54  ;;  %v8104_v57 = vld [vmem:[#allocation10 + $0xec] ss:$16 sps:$4 sm:$0xff]   ;;  %v8106_v54 = vld [vmem:[#allocation10 + $0xe0] ss:$16 sps:$4 sm:$0xff]  }
 0x3eb   :  { %3620 = vmatprep.subr.bf16.mxu0 %v8090_v37  ;;  %3661 = vmatprep.subr.bf16.mxu1 %v8092_v36  ;;  %9322 = vst [vmem:[#allocation70_spill] sm:$0xff] %v8104_v57  ;;  %9323 = vst [vmem:[#allocation71_spill] sm:$0xff] %v8106_v54 }
 0x3ee   :  { %3621 = vmatpush1.bf16.msra.mxu0 %v8094_v35  ;;  %3662 = vmatpush1.bf16.msra.mxu1 %v8096_v39  ;;  %v2545_v39 = vlaneseq }
 0x3ef   :  { %3622 = vmatprep.subr.bf16.mxu0 %v8102_v40  ;;  %3663 = vmatprep.subr.bf16.mxu1 %v8104_v57  ;;  %v2543_v40 = vld [vmem:[%s9018_s12] sm:$0xf] }
 0x3f0   :  { %v8116_v35 = vshrl.u32 %v2545_v39, 7 }
 0x3f2   :  { %3623 = vmatpush1.bf16.msra.mxu0 %v8106_v54  ;;  %3664 = vmatpush1.bf16.msra.mxu1 %v8108_v42  ;;  %9325 = vst [vmem:[#allocation73_spill] sm:$0xff] %v8116_v35  ;;  %v9136_v36 = vsub.s32 0, %v8116_v35  ;;  %v9137_v37 = vsub.s32 2, %v8116_v35  ;;  %v9142_v57 = vsub.s32 1, %v8116_v35  ;;  %v9143_v54 = vsub.s32 3, %v8116_v35 }
 0x3f3   :  { %3717 = vmatprep.subr.bf16.mxu0 %v7810_v60  ;;  %3758 = vmatprep.subr.bf16.mxu1 %v7812_v61 }
 0x3f4   :  { %v2548_v60 = vrot.slane %v2543_v40, %v9136_v36  ;;  %v2556_v61 = vrot.slane %v2543_v40, %v9137_v37  ;;  %v2552_v39 = vrot.slane %v2543_v40, %v9142_v57  ;;  %v2560_v42 = vrot.slane %v2543_v40, %v9143_v54 }
 0x467   :  { %v2759_v33 = vpop.f32.mrb[16].mxu0  ;;  %v2802_v32 = vpop.f32.mrb[16].mxu1 }
 0x468   :  { %v2760_v31 = vadd.f32 %v2759_v33, %v2548_v60  ;;  %v2803_v30 = vadd.f32 %v2802_v32, %v2556_v61  ;;  %v2761_v29 = vpop.f32.mrb[17].mxu0  ;;  %v2804_v24 = vpop.f32.mrb[17].mxu1 }
 0x469   :  { %v2762_v28 = vadd.f32 %v2761_v29, %v2552_v39  ;;  %v2805_v27 = vadd.f32 %v2804_v24, %v2560_v42  ;;  %v2763_v22 = vpop.f32.mrb[18].mxu0  ;;  %v2806_v26 = vpop.f32.mrb[18].mxu1 }
 0x46a   :  { %2811 = vst [vmem:[#allocation6] sm:$0xff] %v2760_v31  ;;  %2813 = vst [vmem:[#allocation6 + $0x10] sm:$0xff] %v2803_v30  ;;  %v2764_v36 = vadd.f32 %v2763_v22, %v2548_v60  ;;  %v2807_v37 = vadd.f32 %v2806_v26, %v2556_v61  ;;  %v2765_v25 = vpop.f32.mrb[19].mxu0  ;;  %v2808_v21 = vpop.f32.mrb[19].mxu1 }
 0x46b   :  { %2812 = vst [vmem:[#allocation6 + $0x8] sm:$0xff] %v2762_v28  ;;  %2814 = vst [vmem:[#allocation6 + $0x18] sm:$0xff] %v2805_v27  ;;  %v2766_v57 = vadd.f32 %v2765_v25, %v2552_v39  ;;  %v2809_v40 = vadd.f32 %v2808_v21, %v2560_v42 }
 0x46c   :  { %2815 = vst [vmem:[#allocation6 + $0x20] sm:$0xf] %v2764_v36  ;;  %2817 = vst [vmem:[#allocation6 + $0x30] sm:$0xf] %v2807_v37 }
 0x46d   :  { %2816 = vst [vmem:[#allocation6 + $0x28] sm:$0xf] %v2766_v57  ;;  %2818 = vst [vmem:[#allocation6 + $0x38] sm:$0xf] %v2809_v40 }
 0x471   :  { %v2916_v32 = vld [vmem:[#allocation6] sm:$0x3]  ;;  %v2918_v27 = vld [vmem:[#allocation6 + $0x10] sm:$0x3] }
 0x472   :  { %v2917_v54 = vld [vmem:[#allocation6 + $0x8] sm:$0x3]  ;;  %v2919_v57 = vld [vmem:[#allocation6 + $0x18] sm:$0x3] }
 0x487   :  { %v3114_v33 = vpop.f32.mrb[20].mxu0  ;;  %v3155_v29 = vpop.f32.mrb[20].mxu1 }
 0x488   :  { %v3162_v24 = vadd.f32 %v3114_v33, %v2916_v32  ;;  %v3116_v35 = vpop.f32.mrb[21].mxu0  ;;  %v3157_v31 = vpop.f32.mrb[21].mxu1  ;;  %v3164_v21 = vadd.f32 %v3155_v29, %v2918_v27  ;;  %v9326_v27 = vld [vmem:[#allocation20_spill] sm:$0xff] }
 0x489   :  { %v3163_v30 = vadd.f32 %v3116_v35, %v2917_v54  ;;  %v3118_v22 = vpop.f32.mrb[22].mxu0  ;;  %v3159_v26 = vpop.f32.mrb[22].mxu1  ;;  %v3165_v36 = vadd.f32 %v3157_v31, %v2919_v57  ;;  %v9329_v57 = vld [vmem:[#allocation23_spill] sm:$0xff] }
 0x48a   :  { %v3166_v60 = vmul.f32 0.5, %v3162_v24  ;;  %v3119_v61 = vpop.f32.mrb[23].mxu0  ;;  %v3160_v28 = vpop.f32.mrb[23].mxu1 }
 0x48b   :  { %v3170_v25 = vmul.f32 0.5, %v3163_v30  ;;  %v3175_v37 = vmul.f32 0.5, %v3165_v36  ;;  %v9330_v36 = vld [vmem:[#allocation24_spill] sm:$0xff] }
 0x48c   :  { %6662 = vtanh.f32 %v3166_v60 }
 0x48d   :  { %6664 = vtanh.f32 %v3170_v25  ;;  %v9327_v25 = vld [vmem:[#allocation21_spill] sm:$0xff] }
 0x48e   :  { %6666 = vtanh.f32 %v3164_v21  ;;  %v9328_v21 = vld [vmem:[#allocation22_spill] sm:$0xff] }
 0x48f   :  { %6668 = vtanh.f32 %v3175_v37  ;;  %v9331_v37 = vld [vmem:[#allocation25_spill] sm:$0xff] }
 0x496   :  { %v6663_v42 = vpop.eup %6662 }
 0x497   :  { %v6665_v39 = vpop.eup %6664  ;;  %v3168_v40 = vmul.f32 0.5, %v6663_v42  ;;  %v9332_v42 = vld [vmem:[#allocation26_spill] sm:$0xff] }
 0x498   :  { %v3172_v32 = vmul.f32 0.5, %v6665_v39  ;;  %v6667_v35 = vpop.eup %6666  ;;  %v9333_v39 = vld [vmem:[#allocation27_spill] sm:$0xff] }
 0x499   :  { %v3169_v54 = vadd.f32 0.5, %v3168_v40  ;;  %v6669_v29 = vpop.eup %6668  ;;  %v9334_v40 = vld [vmem:[#allocation28_spill] sm:$0xff] }
 0x49a   :  { %v3173_v33 = vadd.f32 0.5, %v3172_v32  ;;  %v3177_v30 = vmul.f32 0.5, %v6669_v29  ;;  %v9335_v32 = vld [vmem:[#allocation29_spill] sm:$0xff]  ;;  %v9341_v29 = vld [vmem:[#allocation35_spill] sm:$0xff] }
 0x49b   :  { %v3180_v24 = vmul.f32 %v6667_v35, %v3169_v54  ;;  %v9336_v54 = vld [vmem:[#allocation30_spill] sm:$0xff]  ;;  %v9337_v35 = vld [vmem:[#allocation31_spill] sm:$0xff] }
 0x49c   :  { %v3179_v22 = vmul.f32 0.0, %v3173_v33  ;;  %v3178_v60 = vadd.f32 0.5, %v3177_v30  ;;  %v9338_v33 = vld [vmem:[#allocation32_spill] sm:$0xff] }
 0x49d   :  { %v9342_v30 = vld [vmem:[#allocation36_spill] sm:$0xff] }
 0x49e   :  { %v8133_v26 = vadd.f32 %v3180_v24, %v3179_v22  ;;  %v9339_v24 = vld [vmem:[#allocation33_spill] sm:$0xff]  ;;  %v9340_v22 = vld [vmem:[#allocation34_spill] sm:$0xff] }
 0x4a0   :  { %6670 = vtanh.f32 %v8133_v26 }
 0x4aa   :  { %v6671_v61 = vpop.eup %6670 }
 0x4ab   :  { %v3183_v31 = vmul.f32 %v6671_v61, %v3178_v60  ;;  %v9343_v60 = vld [vmem:[#allocation37_spill] sm:$0xff]  ;;  %v9344_v61 = vld [vmem:[#allocation38_spill] sm:$0xff] }
 0x4ad   :  { %v3447_v28 = vpack.c.bf16 %v3183_v31, %v3183_v31  ;;  %v9345_v31 = vld [vmem:[#allocation39_spill] sm:$0xff] }
 0x4af   :  { %3641 = vmatmul.mubr.bf16.vlgmr.msra.gmra.mrb[24].mxu0 %v3447_v28  ;;  %3682 = vmatmul.mubr.bf16.vlgmr.msra.gmra.mrb[24].mxu1 %v3447_v28 }
 0x4b0   :  { %3718 = vmatpush1.bf16.msra.mxu0 %v7822_v38  ;;  %3759 = vmatpush1.bf16.msra.mxu1 %v7824_v41 }
 0x4b1   :  { %3719 = vmatprep.subr.bf16.mxu0 %v7826_v43  ;;  %3760 = vmatprep.subr.bf16.mxu1 %v7828_v44 }
 0x4b2   :  { %3749 = vmatprep.mubr.bf16.mxu0 %v9296_v34  ;;  %3790 = vmatprep.mubr.bf16.mxu1 %v9296_v34 }
 0x4b4   :  { %3720 = vmatpush1.bf16.msra.mxu0 %v7832_v45  ;;  %3761 = vmatpush1.bf16.msra.mxu1 %v7834_v46 }
 0x4b5   :  { %3721 = vmatprep.subr.bf16.mxu0 %v7838_v47  ;;  %3762 = vmatprep.subr.bf16.mxu1 %v7840_v48 }
 0x4b8   :  { %3722 = vmatpush1.bf16.msra.mxu0 %v7846_v49  ;;  %3763 = vmatpush1.bf16.msra.mxu1 %v7848_v50 }
 0x4b9   :  { %3723 = vmatprep.subr.bf16.mxu0 %v7852_v51  ;;  %3764 = vmatprep.subr.bf16.mxu1 %v7854_v52 }
 0x4bc   :  { %3724 = vmatpush1.bf16.msra.mxu0 %v7858_v53  ;;  %3765 = vmatpush1.bf16.msra.mxu1 %v7860_v55 }
 0x4bd   :  { %3725 = vmatprep.subr.bf16.mxu0 %v7864_v56  ;;  %3766 = vmatprep.subr.bf16.mxu1 %v7866_v58 }
 0x4c0   :  { %3726 = vmatpush1.bf16.msra.mxu0 %v7870_v59  ;;  %3767 = vmatpush1.bf16.msra.mxu1 %v7872_v62 }
 0x4c1   :  { %3727 = vmatprep.subr.bf16.mxu0 %v7876_v63  ;;  %3768 = vmatprep.subr.bf16.mxu1 %v7878_v0 }
 0x4c4   :  { %3728 = vmatpush1.bf16.msra.mxu0 %v7882_v1  ;;  %3769 = vmatpush1.bf16.msra.mxu1 %v7884_v2 }
 0x4c5   :  { %3729 = vmatprep.subr.bf16.mxu0 %v7888_v3  ;;  %3770 = vmatprep.subr.bf16.mxu1 %v7890_v4 }
 0x4c8   :  { %3730 = vmatpush1.bf16.msra.mxu0 %v7894_v5  ;;  %3771 = vmatpush1.bf16.msra.mxu1 %v7896_v6 }
 0x4c9   :  { %3731 = vmatprep.subr.bf16.mxu0 %v7900_v7  ;;  %3772 = vmatprep.subr.bf16.mxu1 %v7902_v8 }
 0x4cc   :  { %3732 = vmatpush1.bf16.msra.mxu0 %v7906_v9  ;;  %3773 = vmatpush1.bf16.msra.mxu1 %v7908_v10 }
 0x4cd   :  { %3836 = vmatprep.subr.bf16.mxu0 %v7918_v11  ;;  %3877 = vmatprep.subr.bf16.mxu1 %v7920_v20 }
 0x4cf   :  { %3750 = vmatmul.mubr.bf16.vlgmr.msra.gmra.mrb[28].mxu0 %v3447_v28  ;;  %3791 = vmatmul.mubr.bf16.vlgmr.msra.gmra.mrb[28].mxu1 %v3447_v28  ;;  %v9346_v28 = vld [vmem:[#allocation40_spill] sm:$0xff] }
 0x4d0   :  { %3837 = vmatpush1.bf16.msra.mxu0 %v7922_v12  ;;  %3878 = vmatpush1.bf16.msra.mxu1 %v7924_v13 }
 0x4d1   :  { %3838 = vmatprep.subr.bf16.mxu0 %v7926_v14  ;;  %3879 = vmatprep.subr.bf16.mxu1 %v7928_v15 }
 0x4d2   :  { %3868 = vmatprep.mubr.bf16.mxu0 %v9296_v34  ;;  %3909 = vmatprep.mubr.bf16.mxu1 %v9296_v34 }
 0x4d4   :  { %3839 = vmatpush1.bf16.msra.mxu0 %v7934_v16  ;;  %3880 = vmatpush1.bf16.msra.mxu1 %v7936_v17 }
 0x4d5   :  { %3840 = vmatprep.subr.bf16.mxu0 %v7940_v18  ;;  %3881 = vmatprep.subr.bf16.mxu1 %v7942_v19 }
 0x4d8   :  { %3841 = vmatpush1.bf16.msra.mxu0 %v7946_v23  ;;  %3882 = vmatpush1.bf16.msra.mxu1 %v9326_v27  ;;  %v3715_v23 = vld [vmem:[#allocation6 + $0x10] sm:$0xc] }
 0x4d9   :  { %3842 = vmatprep.subr.bf16.mxu0 %v9327_v25  ;;  %3883 = vmatprep.subr.bf16.mxu1 %v9328_v21 }
 0x4dc   :  { %3843 = vmatpush1.bf16.msra.mxu0 %v9329_v57  ;;  %3884 = vmatpush1.bf16.msra.mxu1 %v9330_v36 }
 0x4dd   :  { %3844 = vmatprep.subr.bf16.mxu0 %v9331_v37  ;;  %3885 = vmatprep.subr.bf16.mxu1 %v9332_v42 }
 0x4e0   :  { %3845 = vmatpush1.bf16.msra.mxu0 %v9333_v39  ;;  %3886 = vmatpush1.bf16.msra.mxu1 %v9334_v40 }
 0x4e1   :  { %3846 = vmatprep.subr.bf16.mxu0 %v9335_v32  ;;  %3887 = vmatprep.subr.bf16.mxu1 %v9336_v54  ;;  %v9347_v54 = vld [vmem:[#allocation41_spill] sm:$0xff] }
 0x4e4   :  { %3847 = vmatpush1.bf16.msra.mxu0 %v9337_v35  ;;  %3888 = vmatpush1.bf16.msra.mxu1 %v9338_v33  ;;  %v9348_v35 = vld [vmem:[#allocation42_spill] sm:$0xff] }
 0x4e5   :  { %3848 = vmatprep.subr.bf16.mxu0 %v9339_v24  ;;  %3889 = vmatprep.subr.bf16.mxu1 %v9340_v22  ;;  %v2915_v22 = vld [vmem:[%s9021_s15] sm:$0xf]  ;;  %v9349_v24 = vld [vmem:[#allocation73_spill] sm:$0xff] }
 0x4e8   :  { %3849 = vmatpush1.bf16.msra.mxu0 %v9341_v29  ;;  %3890 = vmatpush1.bf16.msra.mxu1 %v9342_v30  ;;  %v9350_v29 = vsub.s32 0, %v9349_v24 }
 0x4e9   :  { %3850 = vmatprep.subr.bf16.mxu0 %v9343_v60  ;;  %3891 = vmatprep.subr.bf16.mxu1 %v9344_v61  ;;  %v9352_v60 = vsub.s32 1, %v9349_v24 }
 0x4ea   :  { %v8209_v33 = vrot.slane %v2915_v22, %v9350_v29 }
 0x4eb   :  { %v8213_v30 = vrot.slane %v2915_v22, %v9352_v60  ;;  %v9356_v60 = vsub.s32 3, %v9349_v24 }
 0x4ec   :  { %3851 = vmatpush1.bf16.msra.mxu0 %v9345_v31  ;;  %3892 = vmatpush1.bf16.msra.mxu1 %v9346_v28  ;;  %9351 = vst [vmem:[#allocation73_spill] sm:$0xff] %v8209_v33  ;;  %v9354_v28 = vsub.s32 2, %v9349_v24 }
 0x4ed   :  { %3922 = vmatprep.subr.bf16.mxu0 %v9347_v54  ;;  %3963 = vmatprep.subr.bf16.mxu1 %v9348_v35  ;;  %9353 = vst [vmem:[#allocation74_spill] sm:$0xff] %v8213_v30  ;;  %v8223_v25 = vrot.slane %v2915_v22, %v9356_v60 }
 0x4ee   :  { %v8217_v32 = vrot.slane %v2915_v22, %v9354_v28 }
 0x4ef   :  { %9357 = vst [vmem:[#allocation76_spill] sm:$0xff] %v8223_v25 }
 0x4f0   :  { %9355 = vst [vmem:[#allocation75_spill] sm:$0xff] %v8217_v32 }
 0x582   :  { %v3642_v61 = vpop.f32.mrb[24].mxu0  ;;  %v3683_v31 = vpop.f32.mrb[24].mxu1 }
 0x583   :  { %v6227_v35 = vadd.f32 %v3642_v61, %v8209_v33  ;;  %v3644_v54 = vpop.f32.mrb[25].mxu0  ;;  %v3685_v40 = vpop.f32.mrb[25].mxu1  ;;  %v6229_v28 = vadd.f32 %v3683_v31, %v8217_v32 }
 0x584   :  { %v6228_v39 = vadd.f32 %v3644_v54, %v8213_v30  ;;  %v3646_v42 = vpop.f32.mrb[26].mxu0  ;;  %v3687_v37 = vpop.f32.mrb[26].mxu1  ;;  %v6230_v61 = vadd.f32 %v3685_v40, %v8223_v25 }
 0x585   :  { %v3694_v29 = vmul.f32 0.5, %v6227_v35  ;;  %v3647_v36 = vpop.f32.mrb[27].mxu0  ;;  %v3688_v57 = vpop.f32.mrb[27].mxu1 }
 0x586   :  { %v3698_v21 = vmul.f32 0.5, %v6228_v39  ;;  %v3703_v33 = vmul.f32 0.5, %v6230_v61 }
 0x587   :  { %6672 = vtanh.f32 %v3694_v29 }
 0x588   :  { %6674 = vtanh.f32 %v3698_v21 }
 0x589   :  { %6676 = vtanh.f32 %v6229_v28 }
 0x58a   :  { %6678 = vtanh.f32 %v3703_v33 }
 0x591   :  { %v6673_v27 = vpop.eup %6672 }
 0x592   :  { %v6675_v54 = vpop.eup %6674  ;;  %v3696_v42 = vmul.f32 0.5, %v6673_v27  ;;  %v3713_v27 = vld [vmem:[#allocation6] sm:$0xc] }
 0x593   :  { %v3700_v37 = vmul.f32 0.5, %v6675_v54  ;;  %v6677_v57 = vpop.eup %6676 }
 0x594   :  { %v3697_v36 = vadd.f32 0.5, %v3696_v42  ;;  %v6679_v31 = vpop.eup %6678 }
 0x595   :  { %v3701_v39 = vadd.f32 0.5, %v3700_v37  ;;  %v3705_v21 = vmul.f32 0.5, %v6679_v31 }
 0x596   :  { %v3708_v35 = vmul.f32 %v6677_v57, %v3697_v36  ;;  %v3714_v57 = vld [vmem:[#allocation6 + $0x8] sm:$0xc] }
 0x597   :  { %v3707_v24 = vmul.f32 0.0, %v3701_v39  ;;  %v3706_v25 = vadd.f32 0.5, %v3705_v21  ;;  %v9359_v21 = vld [vmem:[#allocation43_spill] sm:$0xff] }
 0x599   :  { %v8227_v22 = vadd.f32 %v3708_v35, %v3707_v24 }
 0x59b   :  { %9358 = vst [vmem:[#allocation77_spill] sm:$0xff] %v8227_v22  ;;  %6680 = vtanh.f32 %v8227_v22 }
 0x5a2   :  { %v3751_v29 = vpop.f32.mrb[28].mxu0  ;;  %v3792_v60 = vpop.f32.mrb[28].mxu1 }
 0x5a3   :  { %v3803_v40 = vrot.slane %v3751_v29, 6  ;;  %v3753_v28 = vpop.f32.mrb[29].mxu0  ;;  %v3794_v61 = vpop.f32.mrb[29].mxu1  ;;  %v3805_v36 = vrot.slane %v3792_v60, 6  ;;  %v3716_v60 = vld [vmem:[#allocation6 + $0x18] sm:$0xc] }
 0x5a4   :  { %v3804_v54 = vrot.slane %v3753_v28, 6  ;;  %v3755_v33 = vpop.f32.mrb[30].mxu0  ;;  %v3796_v42 = vpop.f32.mrb[30].mxu1  ;;  %v3806_v18 = vrot.slane %v3794_v61, 6  ;;  %v9360_v28 = vld [vmem:[#allocation44_spill] sm:$0xff] }
 0x5a5   :  { %v6681_v32 = vpop.eup %6680  ;;  %v3811_v37 = vadd.f32 %v3803_v40, %v3713_v27  ;;  %v3756_v39 = vpop.f32.mrb[31].mxu0  ;;  %v3813_v29 = vadd.f32 %v3805_v36, %v3715_v23  ;;  %v9361_v40 = vld [vmem:[#allocation45_spill] sm:$0xff]  ;;  %v9362_v27 = vld [vmem:[#allocation46_spill] sm:$0xff]  ;;  %v9363_v23 = vld [vmem:[#allocation47_spill] sm:$0xff] }
 0x5a6   :  { %v3797_v35 = vpop.f32.mrb[31].mxu1  ;;  %v3711_v24 = vmul.f32 %v6681_v32, %v3706_v25  ;;  %v3812_v22 = vadd.f32 %v3804_v54, %v3714_v57  ;;  %v3814_v25 = vadd.f32 %v3806_v18, %v3716_v60  ;;  %v9365_v32 = vld [vmem:[#allocation49_spill] sm:$0xff]  ;;  %v9367_v54 = vld [vmem:[#allocation51_spill] sm:$0xff]  ;;  %v9368_v33 = vld [vmem:[#allocation52_spill] sm:$0xff] }
 0x5a7   :  { %v3815_v30 = vmul.f32 0.5, %v3811_v37  ;;  %v9369_v37 = vld [vmem:[#allocation53_spill] sm:$0xff]  ;;  %v9370_v36 = vld [vmem:[#allocation54_spill] sm:$0xff]  ;;  %v9372_v60 = vld [vmem:[#allocation56_spill] sm:$0xff] }
 0x5a8   :  { %v3712_v31 = vpack.c.bf16 %v3711_v24, %v3711_v24  ;;  %v3819_v19 = vmul.f32 0.5, %v3812_v22  ;;  %v3824_v22 = vmul.f32 0.5, %v3814_v25  ;;  %v3829_v24 = vrot.slane %v8133_v26, 6  ;;  %v9378_v26 = vld [vmem:[#allocation62_spill] sm:$0xff] }
 0x5a9   :  { %6682 = vtanh.f32 %v3815_v30  ;;  %v9366_v30 = vld [vmem:[#allocation50_spill] sm:$0xff] }
 0x5aa   :  { %6684 = vtanh.f32 %v3819_v19  ;;  %3869 = vmatmul.mubr.bf16.vlgmr.msra.gmra.mrb[32].mxu0 %v3712_v31  ;;  %3910 = vmatmul.mubr.bf16.vlgmr.msra.gmra.mrb[32].mxu1 %v3712_v31  ;;  %v9364_v19 = vld [vmem:[#allocation48_spill] sm:$0xff] }
 0x5ab   :  { %3923 = vmatpush1.bf16.msra.mxu0 %v9359_v21  ;;  %3964 = vmatpush1.bf16.msra.mxu1 %v9360_v28  ;;  %6686 = vtanh.f32 %v3813_v29  ;;  %v9371_v29 = vld [vmem:[#allocation55_spill] sm:$0xff] }
 0x5ac   :  { %3924 = vmatprep.subr.bf16.mxu0 %v9361_v40  ;;  %3965 = vmatprep.subr.bf16.mxu1 %v9362_v27  ;;  %6688 = vtanh.f32 %v3824_v22  ;;  %v9376_v22 = vld [vmem:[#allocation60_spill] sm:$0xff] }
 0x5ad   :  { %3954 = vmatprep.mubr.bf16.mxu0 %v9296_v34  ;;  %3995 = vmatprep.mubr.bf16.mxu1 %v9296_v34 }
 0x5af   :  { %3925 = vmatpush1.bf16.msra.mxu0 %v9363_v23  ;;  %3966 = vmatpush1.bf16.msra.mxu1 %v9364_v19 }
 0x5b0   :  { %3926 = vmatprep.subr.bf16.mxu0 %v9365_v32  ;;  %3967 = vmatprep.subr.bf16.mxu1 %v9366_v30 }
 0x5b3   :  { %v6683_v61 = vpop.eup %6682  ;;  %3927 = vmatpush1.bf16.msra.mxu0 %v9367_v54  ;;  %3968 = vmatpush1.bf16.msra.mxu1 %v9368_v33  ;;  %v9373_v54 = vld [vmem:[#allocation57_spill] sm:$0xff]  ;;  %v9374_v33 = vld [vmem:[#allocation58_spill] sm:$0xff] }
 0x5b4   :  { %v6685_v42 = vpop.eup %6684  ;;  %v3817_v18 = vmul.f32 0.5, %v6683_v61  ;;  %3928 = vmatprep.subr.bf16.mxu0 %v9369_v37  ;;  %3969 = vmatprep.subr.bf16.mxu1 %v9370_v36  ;;  %v9375_v36 = vld [vmem:[#allocation59_spill] sm:$0xff] }
 0x5b5   :  { %v3821_v57 = vmul.f32 0.5, %v6685_v42  ;;  %v6687_v35 = vpop.eup %6686  ;;  %v9377_v42 = vld [vmem:[#allocation61_spill] sm:$0xff] }
 0x5b6   :  { %v3818_v39 = vadd.f32 0.5, %v3817_v18  ;;  %v6689_v18 = vpop.eup %6688 }
 0x5b7   :  { %v3822_v31 = vadd.f32 0.5, %v3821_v57  ;;  %3929 = vmatpush1.bf16.msra.mxu0 %v9371_v29  ;;  %3970 = vmatpush1.bf16.msra.mxu1 %v9372_v60  ;;  %v9379_v57 = vld [vmem:[#allocation63_spill] sm:$0xff] }
 0x5b8   :  { %v3832_v25 = vmul.f32 %v6687_v35, %v3818_v39  ;;  %3930 = vmatprep.subr.bf16.mxu0 %v9373_v54  ;;  %3971 = vmatprep.subr.bf16.mxu1 %v9374_v33  ;;  %v9380_v39 = vld [vmem:[#allocation64_spill] sm:$0xff]  ;;  %v9381_v35 = vld [vmem:[#allocation65_spill] sm:$0xff]  ;;  %v9387_v33 = vld [vmem:[#allocation71_spill] sm:$0xff] }
 0x5b9   :  { %v3831_v61 = vmul.f32 %v3829_v24, %v3822_v31  ;;  %v9382_v24 = vld [vmem:[#allocation66_spill] sm:$0xff]  ;;  %v3826_v31 = vmul.f32 0.5, %v6689_v18 }
 0x5bb   :  { %v8249_v37 = vadd.f32 %v3832_v25, %v3831_v61  ;;  %3931 = vmatpush1.bf16.msra.mxu0 %v9375_v36  ;;  %3972 = vmatpush1.bf16.msra.mxu1 %v9376_v22  ;;  %v9383_v25 = vld [vmem:[#allocation67_spill] sm:$0xff]  ;;  %v9384_v61 = vld [vmem:[#allocation68_spill] sm:$0xff]  ;;  %v9385_v22 = vld [vmem:[#allocation69_spill] sm:$0xff] }
 0x5bc   :  { %3932 = vmatprep.subr.bf16.mxu0 %v9377_v42  ;;  %3973 = vmatprep.subr.bf16.mxu1 %v9378_v26  ;;  %v9386_v42 = vld [vmem:[#allocation70_spill] sm:$0xff]  ;;  %v3827_v26 = vadd.f32 0.5, %v3826_v31  ;;  %v9417_v31 = vld [vmem:[#allocation75_spill] sm:$0xff] }
 0x5bd   :  { %6690 = vtanh.f32 %v8249_v37 }
 0x5bf   :  { %3933 = vmatpush1.bf16.msra.mxu0 %v9379_v57  ;;  %3974 = vmatpush1.bf16.msra.mxu1 %v9380_v39  ;;  %v9388_v57 = vld [vmem:[#allocation72_spill] sm:$0xff]  ;;  %v8266_v39 = vld [vmem:[#allocation7 + $0x4] ss:$16 sps:$4 sm:$0xff]  }
 0x5c0   :  { %3934 = vmatprep.subr.bf16.mxu0 %v9381_v35  ;;  %3975 = vmatprep.subr.bf16.mxu1 %v9382_v24  ;;  %v8269_v24 = vld [vmem:[#allocation7 + $0xc] ss:$16 sps:$4 sm:$0xff]  }
 0x5c3   :  { %3935 = vmatpush1.bf16.msra.mxu0 %v9383_v25  ;;  %3976 = vmatpush1.bf16.msra.mxu1 %v9384_v61 }
 0x5c4   :  { %3936 = vmatprep.subr.bf16.mxu0 %v9385_v22  ;;  %3977 = vmatprep.subr.bf16.mxu1 %v9386_v42 }
 0x5c7   :  { %v6691_v36 = vpop.eup %6690  ;;  %3937 = vmatpush1.bf16.msra.mxu0 %v9387_v33  ;;  %3978 = vmatpush1.bf16.msra.mxu1 %v9388_v57 }
 0x5c8   :  { %4031 = vmatprep.subr.bf16.mxu0 %v8266_v39  ;;  %4072 = vmatprep.subr.bf16.mxu1 %v8269_v24  ;;  %v3835_v18 = vmul.f32 %v6691_v36, %v3827_v26 }
 0x5ca   :  { %v3918_v61 = vpack.c.bf16 %v3835_v18, %v3835_v18 }
 0x5cc   :  { %v3920_v25 = vrot.slane %v3918_v61, 1  ;;  %v9418_v61 = vld [vmem:[#allocation76_spill] sm:$0xff] }
 0x5ce   :  { %3955 = vmatmul.mubr.bf16.vlgmr.msra.gmra.mrb[32].mxu0 %v3920_v25  ;;  %3996 = vmatmul.mubr.bf16.vlgmr.msra.gmra.mrb[32].mxu1 %v3920_v25 }
 0x5cf   :  { %4032 = vmatpush1.bf16.msra.mxu0 %v7822_v38  ;;  %4073 = vmatpush1.bf16.msra.mxu1 %v7824_v41  ;;  %v9389_v38 = vld [vmem:[#allocation17_spill] sm:$0xff]  ;;  %v9390_v41 = vld [vmem:[#allocation18_spill] sm:$0xff] }
 0x5d0   :  { %4033 = vmatprep.subr.bf16.mxu0 %v7826_v43  ;;  %4074 = vmatprep.subr.bf16.mxu1 %v7828_v44  ;;  %v9391_v43 = vld [vmem:[#allocation19_spill] sm:$0xff]  ;;  %v9392_v44 = vld [vmem:[#allocation20_spill] sm:$0xff] }
 0x5d1   :  { %4063 = vmatprep.mubr.bf16.mxu0 %v9296_v34  ;;  %4104 = vmatprep.mubr.bf16.mxu1 %v9296_v34 }
 0x5d3   :  { %4034 = vmatpush1.bf16.msra.mxu0 %v7832_v45  ;;  %4075 = vmatpush1.bf16.msra.mxu1 %v7834_v46  ;;  %v9393_v45 = vld [vmem:[#allocation21_spill] sm:$0xff]  ;;  %v9394_v46 = vld [vmem:[#allocation22_spill] sm:$0xff] }
 0x5d4   :  { %4035 = vmatprep.subr.bf16.mxu0 %v7838_v47  ;;  %4076 = vmatprep.subr.bf16.mxu1 %v7840_v48  ;;  %v9395_v47 = vld [vmem:[#allocation23_spill] sm:$0xff]  ;;  %v9396_v48 = vld [vmem:[#allocation24_spill] sm:$0xff] }
 0x5d7   :  { %4036 = vmatpush1.bf16.msra.mxu0 %v7846_v49  ;;  %4077 = vmatpush1.bf16.msra.mxu1 %v7848_v50  ;;  %v9397_v49 = vld [vmem:[#allocation25_spill] sm:$0xff]  ;;  %v9398_v50 = vld [vmem:[#allocation26_spill] sm:$0xff] }
 0x5d8   :  { %4037 = vmatprep.subr.bf16.mxu0 %v7852_v51  ;;  %4078 = vmatprep.subr.bf16.mxu1 %v7854_v52  ;;  %v9399_v51 = vld [vmem:[#allocation27_spill] sm:$0xff]  ;;  %v9400_v52 = vld [vmem:[#allocation28_spill] sm:$0xff] }
 0x5db   :  { %4038 = vmatpush1.bf16.msra.mxu0 %v7858_v53  ;;  %4079 = vmatpush1.bf16.msra.mxu1 %v7860_v55  ;;  %v9401_v53 = vld [vmem:[#allocation29_spill] sm:$0xff]  ;;  %v9402_v55 = vld [vmem:[#allocation30_spill] sm:$0xff] }
 0x5dc   :  { %4039 = vmatprep.subr.bf16.mxu0 %v7864_v56  ;;  %4080 = vmatprep.subr.bf16.mxu1 %v7866_v58  ;;  %v9403_v56 = vld [vmem:[#allocation31_spill] sm:$0xff]  ;;  %v9404_v58 = vld [vmem:[#allocation32_spill] sm:$0xff] }
 0x5df   :  { %4040 = vmatpush1.bf16.msra.mxu0 %v7870_v59  ;;  %4081 = vmatpush1.bf16.msra.mxu1 %v7872_v62  ;;  %v9405_v59 = vld [vmem:[#allocation33_spill] sm:$0xff]  ;;  %v9406_v62 = vld [vmem:[#allocation34_spill] sm:$0xff] }
 0x5e0   :  { %4041 = vmatprep.subr.bf16.mxu0 %v7876_v63  ;;  %4082 = vmatprep.subr.bf16.mxu1 %v7878_v0  ;;  %v9407_v63 = vld [vmem:[#allocation35_spill] sm:$0xff]  ;;  %v9408_v0 = vld [vmem:[#allocation36_spill] sm:$0xff] }
 0x5e3   :  { %4042 = vmatpush1.bf16.msra.mxu0 %v7882_v1  ;;  %4083 = vmatpush1.bf16.msra.mxu1 %v7884_v2  ;;  %v9409_v1 = vld [vmem:[#allocation37_spill] sm:$0xff]  ;;  %v9410_v2 = vld [vmem:[#allocation38_spill] sm:$0xff] }
 0x5e4   :  { %4043 = vmatprep.subr.bf16.mxu0 %v7888_v3  ;;  %4084 = vmatprep.subr.bf16.mxu1 %v7890_v4  ;;  %v9411_v3 = vld [vmem:[#allocation39_spill] sm:$0xff]  ;;  %v9412_v4 = vld [vmem:[#allocation40_spill] sm:$0xff] }
 0x5e7   :  { %4044 = vmatpush1.bf16.msra.mxu0 %v7894_v5  ;;  %4085 = vmatpush1.bf16.msra.mxu1 %v7896_v6  ;;  %v9413_v5 = vld [vmem:[#allocation41_spill] sm:$0xff]  ;;  %v9414_v6 = vld [vmem:[#allocation42_spill] sm:$0xff] }
 0x5e8   :  { %4045 = vmatprep.subr.bf16.mxu0 %v7900_v7  ;;  %4086 = vmatprep.subr.bf16.mxu1 %v7902_v8 }
 0x5eb   :  { %4046 = vmatpush1.bf16.msra.mxu0 %v7906_v9  ;;  %4087 = vmatpush1.bf16.msra.mxu1 %v7908_v10  ;;  %v9415_v9 = vld [vmem:[#allocation73_spill] sm:$0xff] }
 0x5ec   :  { %4150 = vmatprep.subr.bf16.mxu0 %v7918_v11  ;;  %4191 = vmatprep.subr.bf16.mxu1 %v7920_v20 }
 0x5ee   :  { %4064 = vmatmul.mubr.bf16.vlgmr.msra.gmra.mrb[36].mxu0 %v3920_v25  ;;  %4105 = vmatmul.mubr.bf16.vlgmr.msra.gmra.mrb[36].mxu1 %v3920_v25 }
 0x5ef   :  { %4151 = vmatpush1.bf16.msra.mxu0 %v7922_v12  ;;  %4192 = vmatpush1.bf16.msra.mxu1 %v7924_v13  ;;  %v9416_v12 = vld [vmem:[#allocation74_spill] sm:$0xff] }
 0x5f0   :  { %4152 = vmatprep.subr.bf16.mxu0 %v7926_v14  ;;  %4193 = vmatprep.subr.bf16.mxu1 %v7928_v15 }
 0x5f1   :  { %4182 = vmatprep.mubr.bf16.mxu0 %v9296_v34  ;;  %4223 = vmatprep.mubr.bf16.mxu1 %v9296_v34 }
 0x5f3   :  { %4153 = vmatpush1.bf16.msra.mxu0 %v7934_v16  ;;  %4194 = vmatpush1.bf16.msra.mxu1 %v7936_v17 }
 0x5f4   :  { %4154 = vmatprep.subr.bf16.mxu0 %v9389_v38  ;;  %4195 = vmatprep.subr.bf16.mxu1 %v9390_v41 }
 0x5f7   :  { %4155 = vmatpush1.bf16.msra.mxu0 %v9391_v43  ;;  %4196 = vmatpush1.bf16.msra.mxu1 %v9392_v44 }
 0x5f8   :  { %4156 = vmatprep.subr.bf16.mxu0 %v9393_v45  ;;  %4197 = vmatprep.subr.bf16.mxu1 %v9394_v46 }
 0x5fb   :  { %4157 = vmatpush1.bf16.msra.mxu0 %v9395_v47  ;;  %4198 = vmatpush1.bf16.msra.mxu1 %v9396_v48 }
 0x5fc   :  { %4158 = vmatprep.subr.bf16.mxu0 %v9397_v49  ;;  %4199 = vmatprep.subr.bf16.mxu1 %v9398_v50  ;;  %v9419_v50 = vld [vmem:[#allocation77_spill] sm:$0xff] }
 0x5ff   :  { %4159 = vmatpush1.bf16.msra.mxu0 %v9399_v51  ;;  %4200 = vmatpush1.bf16.msra.mxu1 %v9400_v52 }
 0x600   :  { %4160 = vmatprep.subr.bf16.mxu0 %v9401_v53  ;;  %4201 = vmatprep.subr.bf16.mxu1 %v9402_v55 }
 0x603   :  { %4161 = vmatpush1.bf16.msra.mxu0 %v9403_v56  ;;  %4202 = vmatpush1.bf16.msra.mxu1 %v9404_v58 }
 0x604   :  { %4162 = vmatprep.subr.bf16.mxu0 %v9405_v59  ;;  %4203 = vmatprep.subr.bf16.mxu1 %v9406_v62 }
 0x607   :  { %4163 = vmatpush1.bf16.msra.mxu0 %v9407_v63  ;;  %4204 = vmatpush1.bf16.msra.mxu1 %v9408_v0 }
 0x608   :  { %4164 = vmatprep.subr.bf16.mxu0 %v9409_v1  ;;  %4205 = vmatprep.subr.bf16.mxu1 %v9410_v2  ;;  %v4027_v1 = vld [vmem:[#allocation6] sm:$0x30] }
 0x60b   :  { %4165 = vmatpush1.bf16.msra.mxu0 %v9411_v3  ;;  %4206 = vmatpush1.bf16.msra.mxu1 %v9412_v4 }
 0x60c   :  { %4236 = vmatprep.subr.bf16.mxu0 %v9413_v5  ;;  %4277 = vmatprep.subr.bf16.mxu1 %v9414_v6 }
 0x6a1   :  { %v3956_v7 = vpop.f32.mrb[32].mxu0  ;;  %v3997_v8 = vpop.f32.mrb[32].mxu1 }
 0x6a2   :  { %v6231_v10 = vadd.f32 %v3956_v7, %v9415_v9  ;;  %v3958_v11 = vpop.f32.mrb[33].mxu0  ;;  %v3999_v20 = vpop.f32.mrb[33].mxu1  ;;  %v6233_v25 = vadd.f32 %v3997_v8, %v9417_v31  ;;  %v4028_v8 = vld [vmem:[#allocation6 + $0x8] sm:$0x30] }
 0x6a3   :  { %v6232_v13 = vadd.f32 %v3958_v11, %v9416_v12  ;;  %v3960_v14 = vpop.f32.mrb[34].mxu0  ;;  %v4001_v15 = vpop.f32.mrb[34].mxu1  ;;  %v6234_v18 = vadd.f32 %v3999_v20, %v9418_v61 }
 0x6a4   :  { %v4008_v16 = vmul.f32 0.5, %v6231_v10  ;;  %v3961_v17 = vpop.f32.mrb[35].mxu0  ;;  %v4002_v36 = vpop.f32.mrb[35].mxu1 }
 0x6a5   :  { %v4012_v26 = vmul.f32 0.5, %v6232_v13  ;;  %v4017_v38 = vmul.f32 0.5, %v6234_v18 }
 0x6a6   :  { %6692 = vtanh.f32 %v4008_v16  ;;  %v4029_v16 = vld [vmem:[#allocation6 + $0x10] sm:$0x30] }
 0x6a7   :  { %6694 = vtanh.f32 %v4012_v26 }
 0x6a8   :  { %6696 = vtanh.f32 %v6233_v25  ;;  %v4030_v25 = vld [vmem:[#allocation6 + $0x18] sm:$0x30] }
 0x6a9   :  { %6698 = vtanh.f32 %v4017_v38  ;;  %v9420_v38 = vld [vmem:[#allocation51_spill] sm:$0xff] }
 0x6b0   :  { %v6693_v41 = vpop.eup %6692 }
 0x6b1   :  { %v6695_v43 = vpop.eup %6694  ;;  %v4010_v44 = vmul.f32 0.5, %v6693_v41 }
 0x6b2   :  { %v4014_v45 = vmul.f32 0.5, %v6695_v43  ;;  %v6697_v47 = vpop.eup %6696  ;;  %v9422_v43 = vld [vmem:[#allocation53_spill] sm:$0xff] }
 0x6b3   :  { %v4011_v46 = vadd.f32 0.5, %v4010_v44  ;;  %v6699_v53 = vpop.eup %6698  ;;  %v9423_v44 = vld [vmem:[#allocation54_spill] sm:$0xff] }
 0x6b4   :  { %v4015_v48 = vadd.f32 0.5, %v4014_v45  ;;  %v4019_v55 = vmul.f32 0.5, %v6699_v53  ;;  %v9427_v53 = vld [vmem:[#allocation61_spill] sm:$0xff] }
 0x6b5   :  { %v4022_v49 = vmul.f32 %v6697_v47, %v4011_v46  ;;  %v9424_v47 = vld [vmem:[#allocation58_spill] sm:$0xff] }
 0x6b6   :  { %v4021_v51 = vmul.f32 %v4015_v48, %v9419_v50  ;;  %v4020_v0 = vadd.f32 0.5, %v4019_v55  ;;  %v9425_v50 = vld [vmem:[#allocation59_spill] sm:$0xff]  ;;  %v9428_v55 = vld [vmem:[#allocation62_spill] sm:$0xff] }
 0x6b8   :  { %v8345_v52 = vadd.f32 %v4022_v49, %v4021_v51  ;;  %v9426_v51 = vld [vmem:[#allocation60_spill] sm:$0xff] }
 0x6ba   :  { %6700 = vtanh.f32 %v8345_v52 }
 0x6c1   :  { %v4065_v56 = vpop.f32.mrb[36].mxu0  ;;  %v4106_v58 = vpop.f32.mrb[36].mxu1 }
 0x6c2   :  { %v4117_v59 = vrot.slane %v4065_v56, 4  ;;  %v4067_v62 = vpop.f32.mrb[37].mxu0  ;;  %v4108_v63 = vpop.f32.mrb[37].mxu1  ;;  %v4119_v7 = vrot.slane %v4106_v58, 4  ;;  %v9432_v58 = vld [vmem:[#allocation67_spill] sm:$0xff] }
 0x6c3   :  { %v4118_v2 = vrot.slane %v4067_v62, 4  ;;  %v4069_v3 = vpop.f32.mrb[38].mxu0  ;;  %v4110_v4 = vpop.f32.mrb[38].mxu1  ;;  %v4120_v26 = vrot.slane %v4108_v63, 4 }
 0x6c4   :  { %v6701_v5 = vpop.eup %6700  ;;  %v4125_v6 = vadd.f32 %v4117_v59, %v4027_v1  ;;  %v4070_v10 = vpop.f32.mrb[39].mxu0  ;;  %v4127_v36 = vadd.f32 %v4119_v7, %v4029_v16  ;;  %v9433_v59 = vld [vmem:[#allocation68_spill] sm:$0xff]  ;;  %v8410_v4 = vld [vmem:[#allocation7 + $0x44] ss:$16 sps:$4 sm:$0xff]  }
 0x6c5   :  { %v4111_v11 = vpop.f32.mrb[39].mxu1  ;;  %v4025_v20 = vmul.f32 %v6701_v5, %v4020_v0  ;;  %v4126_v13 = vadd.f32 %v4118_v2, %v4028_v8  ;;  %v4128_v18 = vadd.f32 %v4120_v26, %v4030_v25  ;;  %v8404_v2 = vld [vmem:[#allocation7 + $0x20] ss:$16 sps:$4 sm:$0xff]   ;;  %v8407_v3 = vld [vmem:[#allocation7 + $0x28] ss:$16 sps:$4 sm:$0xff]  }
 0x6c6   :  { %v4129_v14 = vmul.f32 0.5, %v4125_v6  ;;  %v8413_v5 = vld [vmem:[#allocation7 + $0x4c] ss:$16 sps:$4 sm:$0xff]   ;;  %v8416_v6 = vld [vmem:[#allocation7 + $0x40] ss:$16 sps:$4 sm:$0xff]  }
 0x6c7   :  { %v4026_v15 = vpack.c.bf16 %v4025_v20, %v4025_v20  ;;  %v4133_v17 = vmul.f32 0.5, %v4126_v13  ;;  %v8419_v7 = vld [vmem:[#allocation7 + $0x48] ss:$16 sps:$4 sm:$0xff]   ;;  %v8422_v8 = vld [vmem:[#allocation7 + $0x64] ss:$16 sps:$4 sm:$0xff]  }
 0x6c8   :  { %6702 = vtanh.f32 %v4129_v14  ;;  %v8425_v10 = vld [vmem:[#allocation7 + $0x6c] ss:$16 sps:$4 sm:$0xff]   ;;  %v8428_v11 = vld [vmem:[#allocation7 + $0x60] ss:$16 sps:$4 sm:$0xff]   ;;  %v8431_v20 = vld [vmem:[#allocation7 + $0x68] ss:$16 sps:$4 sm:$0xff]  }
 0x6c9   :  { %6704 = vtanh.f32 %v4133_v17  ;;  %4183 = vmatmul.mubr.bf16.vlgmr.msra.gmra.mrb[40].mxu0 %v4026_v15  ;;  %4224 = vmatmul.mubr.bf16.vlgmr.msra.gmra.mrb[40].mxu1 %v4026_v15  ;;  %v8434_v13 = vld [vmem:[#allocation7 + $0x84] ss:$16 sps:$4 sm:$0xff]   ;;  %v8437_v14 = vld [vmem:[#allocation7 + $0x8c] ss:$16 sps:$4 sm:$0xff]   ;;  %v8440_v15 = vld [vmem:[#allocation7 + $0x80] ss:$16 sps:$4 sm:$0xff]  }
 0x6ca   :  { %4237 = vmatpush1.bf16.msra.mxu0 %v9359_v21  ;;  %4278 = vmatpush1.bf16.msra.mxu1 %v9360_v28  ;;  %6706 = vtanh.f32 %v4127_v36  ;;  %v4138_v21 = vmul.f32 0.5, %v4128_v18  ;;  %v8443_v16 = vld [vmem:[#allocation7 + $0x88] ss:$16 sps:$4 sm:$0xff]   ;;  %v8446_v17 = vld [vmem:[#allocation7 + $0xa4] ss:$16 sps:$4 sm:$0xff]  }
 0x6cb   :  { %4238 = vmatprep.subr.bf16.mxu0 %v9361_v40  ;;  %4279 = vmatprep.subr.bf16.mxu1 %v9362_v27  ;;  %v9421_v40 = vld [vmem:[#allocation52_spill] sm:$0xff]  ;;  %v8458_v18 = vld [vmem:[#allocation7 + $0xc4] ss:$16 sps:$4 sm:$0xff]  }
 0x6cc   :  { %4268 = vmatprep.mubr.bf16.mxu0 %v9296_v34  ;;  %4309 = vmatprep.mubr.bf16.mxu1 %v9296_v34  ;;  %6708 = vtanh.f32 %v4138_v21  ;;  %v8449_v36 = vld [vmem:[#allocation7 + $0xac] ss:$16 sps:$4 sm:$0xff]   ;;  %v8452_v26 = vld [vmem:[#allocation7 + $0xa0] ss:$16 sps:$4 sm:$0xff]   ;;  %v8455_v25 = vld [vmem:[#allocation7 + $0xa8] ss:$16 sps:$4 sm:$0xff]  }
 0x6cd   :  { %9434 = vst [vmem:[#allocation43_spill] sm:$0xff] %v8458_v18  ;;  %v8461_v21 = vld [vmem:[#allocation7 + $0xcc] ss:$16 sps:$4 sm:$0xff]  }
 0x6ce   :  { %4239 = vmatpush1.bf16.msra.mxu0 %v9363_v23  ;;  %4280 = vmatpush1.bf16.msra.mxu1 %v9364_v19  ;;  %9435 = vst [vmem:[#allocation44_spill] sm:$0xff] %v8461_v21 }
 0x6cf   :  { %4240 = vmatprep.subr.bf16.mxu0 %v9365_v32  ;;  %4281 = vmatprep.subr.bf16.mxu1 %v9366_v30  ;;  %v4143_v32 = vrot.slane %v8249_v37, 6 }
 0x6d2   :  { %v6703_v28 = vpop.eup %6702  ;;  %4241 = vmatpush1.bf16.msra.mxu0 %v9420_v38  ;;  %4282 = vmatpush1.bf16.msra.mxu1 %v9421_v40  ;;  %v8467_v38 = vld [vmem:[#allocation7 + $0xc8] ss:$16 sps:$4 sm:$0xff]   ;;  %v8470_v40 = vld [vmem:[#allocation7 + $0xe4] ss:$16 sps:$4 sm:$0xff]  }
 0x6d3   :  { %v6705_v27 = vpop.eup %6704  ;;  %v4131_v41 = vmul.f32 0.5, %v6703_v28  ;;  %4242 = vmatprep.subr.bf16.mxu0 %v9422_v43  ;;  %4283 = vmatprep.subr.bf16.mxu1 %v9423_v44  ;;  %v8464_v28 = vld [vmem:[#allocation7 + $0xc0] ss:$16 sps:$4 sm:$0xff]   ;;  %9437 = vst [vmem:[#allocation46_spill] sm:$0xff] %v8467_v38  ;;  %9438 = vst [vmem:[#allocation47_spill] sm:$0xff] %v8470_v40 }
 0x6d4   :  { %v4135_v45 = vmul.f32 0.5, %v6705_v27  ;;  %v6707_v19 = vpop.eup %6706  ;;  %9436 = vst [vmem:[#allocation45_spill] sm:$0xff] %v8464_v28  ;;  %v8473_v27 = vld [vmem:[#allocation7 + $0xec] ss:$16 sps:$4 sm:$0xff]   ;;  %v8479_v43 = vld [vmem:[#allocation7 + $0xe8] ss:$16 sps:$4 sm:$0xff]  }
 0x6d5   :  { %v4132_v23 = vadd.f32 0.5, %v4131_v41  ;;  %9439 = vst [vmem:[#allocation48_spill] sm:$0xff] %v8473_v27  ;;  %v8476_v41 = vld [vmem:[#allocation7 + $0xe0] ss:$16 sps:$4 sm:$0xff]   ;;  %9441 = vst [vmem:[#allocation50_spill] sm:$0xff] %v8479_v43 }
 0x6d6   :  { %v4136_v46 = vadd.f32 0.5, %v4135_v45  ;;  %4243 = vmatpush1.bf16.msra.mxu0 %v9371_v29  ;;  %4284 = vmatpush1.bf16.msra.mxu1 %v9372_v60  ;;  %v6709_v37 = vpop.eup %6708  ;;  %v9429_v29 = vld [vmem:[#allocation63_spill] sm:$0xff]  ;;  %v9430_v60 = vld [vmem:[#allocation64_spill] sm:$0xff]  ;;  %9440 = vst [vmem:[#allocation49_spill] sm:$0xff] %v8476_v41 }
 0x6d7   :  { %v4146_v30 = vmul.f32 %v6707_v19, %v4132_v23  ;;  %4244 = vmatprep.subr.bf16.mxu0 %v9373_v54  ;;  %4285 = vmatprep.subr.bf16.mxu1 %v9424_v47  ;;  %v9431_v54 = vld [vmem:[#allocation66_spill] sm:$0xff]  ;;  %v4140_v56 = vmul.f32 0.5, %v6709_v37  ;;  %v8482_v44 = vld [vmem:[#allocation12 + $0x4] ss:$16 sps:$4 sm:$0xff]  }
 0x6d8   :  { %v4145_v48 = vmul.f32 %v4143_v32, %v4136_v46  ;;  %9442 = vst [vmem:[#allocation55_spill] sm:$0xff] %v8482_v44  ;;  %v8485_v45 = vld [vmem:[#allocation12 + $0xc] ss:$16 sps:$4 sm:$0xff]   ;;  %v8490_v23 = vld [vmem:[#allocation12] ss:$16 sps:$4 sm:$0xff]  }
 0x6d9   :  { %v4141_v62 = vadd.f32 0.5, %v4140_v56  ;;  %9443 = vst [vmem:[#allocation56_spill] sm:$0xff] %v8485_v45  ;;  %9444 = vst [vmem:[#allocation57_spill] sm:$0xff] %v8490_v23  ;;  %v8493_v19 = vld [vmem:[#allocation12 + $0x8] ss:$16 sps:$4 sm:$0xff]  }
 0x6da   :  { %v8367_v49 = vadd.f32 %v4146_v30, %v4145_v48  ;;  %4245 = vmatpush1.bf16.msra.mxu0 %v9425_v50  ;;  %4286 = vmatpush1.bf16.msra.mxu1 %v9426_v51  ;;  %9445 = vst [vmem:[#allocation65_spill] sm:$0xff] %v8493_v19  ;;  %v8496_v46 = vld [vmem:[#allocation12 + $0x24] ss:$16 sps:$4 sm:$0xff]   ;;  %v8499_v32 = vld [vmem:[#allocation12 + $0x2c] ss:$16 sps:$4 sm:$0xff]  }
 0x6db   :  { %4246 = vmatprep.subr.bf16.mxu0 %v9427_v53  ;;  %4287 = vmatprep.subr.bf16.mxu1 %v9428_v55  ;;  %9446 = vst [vmem:[#allocation69_spill] sm:$0xff] %v8496_v46  ;;  %9447 = vst [vmem:[#allocation70_spill] sm:$0xff] %v8499_v32  ;;  %v8504_v30 = vld [vmem:[#allocation12 + $0x20] ss:$16 sps:$4 sm:$0xff]   ;;  %v8507_v47 = vld [vmem:[#allocation12 + $0x28] ss:$16 sps:$4 sm:$0xff]  }
 0x6dc   :  { %6710 = vtanh.f32 %v8367_v49  ;;  %9448 = vst [vmem:[#allocation71_spill] sm:$0xff] %v8504_v30  ;;  %9449 = vst [vmem:[#allocation72_spill] sm:$0xff] %v8507_v47  ;;  %v8510_v48 = vld [vmem:[#allocation12 + $0x44] ss:$16 sps:$4 sm:$0xff]   ;;  %v8513_v50 = vld [vmem:[#allocation12 + $0x4c] ss:$16 sps:$4 sm:$0xff]  }
 0x6dd   :  { %9450 = vst [vmem:[#allocation17_spill] sm:$0xff] %v8510_v48  ;;  %9451 = vst [vmem:[#allocation18_spill] sm:$0xff] %v8513_v50  ;;  %v8516_v51 = vld [vmem:[#allocation12 + $0x40] ss:$16 sps:$4 sm:$0xff]   ;;  %v8519_v53 = vld [vmem:[#allocation12 + $0x48] ss:$16 sps:$4 sm:$0xff]  }
 0x6de   :  { %4247 = vmatpush1.bf16.msra.mxu0 %v9429_v29  ;;  %4288 = vmatpush1.bf16.msra.mxu1 %v9430_v60  ;;  %9452 = vst [vmem:[#allocation19_spill] sm:$0xff] %v8516_v51  ;;  %9453 = vst [vmem:[#allocation20_spill] sm:$0xff] %v8519_v53  ;;  %v8522_v55 = vld [vmem:[#allocation12 + $0x64] ss:$16 sps:$4 sm:$0xff]   ;;  %v8525_v37 = vld [vmem:[#allocation12 + $0x6c] ss:$16 sps:$4 sm:$0xff]  }
 0x6df   :  { %4248 = vmatprep.subr.bf16.mxu0 %v9381_v35  ;;  %4289 = vmatprep.subr.bf16.mxu1 %v9431_v54  ;;  %9454 = vst [vmem:[#allocation21_spill] sm:$0xff] %v8522_v55  ;;  %9455 = vst [vmem:[#allocation22_spill] sm:$0xff] %v8525_v37  ;;  %v8528_v29 = vld [vmem:[#allocation12 + $0x60] ss:$16 sps:$4 sm:$0xff]   ;;  %v8531_v60 = vld [vmem:[#allocation12 + $0x68] ss:$16 sps:$4 sm:$0xff]  }
 0x6e0   :  { %9456 = vst [vmem:[#allocation23_spill] sm:$0xff] %v8528_v29  ;;  %9457 = vst [vmem:[#allocation24_spill] sm:$0xff] %v8531_v60  ;;  %v8534_v54 = vld [vmem:[#allocation12 + $0x84] ss:$16 sps:$4 sm:$0xff]   ;;  %v8537_v56 = vld [vmem:[#allocation12 + $0x8c] ss:$16 sps:$4 sm:$0xff]  }
 0x6e1   :  { %9458 = vst [vmem:[#allocation25_spill] sm:$0xff] %v8534_v54  ;;  %9459 = vst [vmem:[#allocation26_spill] sm:$0xff] %v8537_v56 }
 0x6e2   :  { %4249 = vmatpush1.bf16.msra.mxu0 %v9432_v58  ;;  %4290 = vmatpush1.bf16.msra.mxu1 %v9433_v59  ;;  %v8540_v58 = vld [vmem:[#allocation12 + $0x80] ss:$16 sps:$4 sm:$0xff]   ;;  %v8543_v59 = vld [vmem:[#allocation12 + $0x88] ss:$16 sps:$4 sm:$0xff]  }
 0x6e3   :  { %4250 = vmatprep.subr.bf16.mxu0 %v9385_v22  ;;  %4291 = vmatprep.subr.bf16.mxu1 %v9386_v42  ;;  %v8390_v22 = vld [vmem:[#allocation7] ss:$16 sps:$4 sm:$0xff]   ;;  %v8393_v42 = vld [vmem:[#allocation7 + $0x8] ss:$16 sps:$4 sm:$0xff]   ;;  %9460 = vst [vmem:[#allocation27_spill] sm:$0xff] %v8540_v58  ;;  %9461 = vst [vmem:[#allocation28_spill] sm:$0xff] %v8543_v59 }
 0x6e6   :  { %v6711_v63 = vpop.eup %6710  ;;  %4251 = vmatpush1.bf16.msra.mxu0 %v9387_v33  ;;  %4292 = vmatpush1.bf16.msra.mxu1 %v9388_v57  ;;  %v8396_v33 = vld [vmem:[#allocation7 + $0x24] ss:$16 sps:$4 sm:$0xff]   ;;  %v8399_v57 = vld [vmem:[#allocation7 + $0x2c] ss:$16 sps:$4 sm:$0xff]  }
 0x6e7   :  { %4345 = vmatprep.subr.bf16.mxu0 %v8266_v39  ;;  %4386 = vmatprep.subr.bf16.mxu1 %v8269_v24  ;;  %v4149_v35 = vmul.f32 %v6711_v63, %v4141_v62  ;;  %v8546_v62 = vld [vmem:[#allocation12 + $0xa4] ss:$16 sps:$4 sm:$0xff]   ;;  %v8549_v63 = vld [vmem:[#allocation12 + $0xac] ss:$16 sps:$4 sm:$0xff]  }
 0x6e8   :  { %9462 = vst [vmem:[#allocation29_spill] sm:$0xff] %v8546_v62  ;;  %9463 = vst [vmem:[#allocation30_spill] sm:$0xff] %v8549_v63 }
 0x6e9   :  { %v4232_v0 = vpack.c.bf16 %v4149_v35, %v4149_v35  ;;  %v8552_v35 = vld [vmem:[#allocation12 + $0xa0] ss:$16 sps:$4 sm:$0xff]  }
 0x6ea   :  { %9464 = vst [vmem:[#allocation31_spill] sm:$0xff] %v8552_v35 }
 0x6eb   :  { %v8386_v1 = vrot.slane %v4232_v0, 2  ;;  %v8555_v0 = vld [vmem:[#allocation12 + $0xa8] ss:$16 sps:$4 sm:$0xff]  }
 0x6ec   :  { %9465 = vst [vmem:[#allocation32_spill] sm:$0xff] %v8555_v0 }
 0x6ed   :  { %4269 = vmatmul.mubr.bf16.vlgmr.msra.gmra.mrb[40].mxu0 %v8386_v1  ;;  %4310 = vmatmul.mubr.bf16.vlgmr.msra.gmra.mrb[40].mxu1 %v8386_v1 }
 0x6ee   :  { %4346 = vmatpush1.bf16.msra.mxu0 %v8390_v22  ;;  %4387 = vmatpush1.bf16.msra.mxu1 %v8393_v42 }
 0x6ef   :  { %4347 = vmatprep.subr.bf16.mxu0 %v8396_v33  ;;  %4388 = vmatprep.subr.bf16.mxu1 %v8399_v57 }
 0x6f0   :  { %4377 = vmatprep.mubr.bf16.mxu0 %v9296_v34  ;;  %4418 = vmatprep.mubr.bf16.mxu1 %v9296_v34 }
 0x6f2   :  { %4348 = vmatpush1.bf16.msra.mxu0 %v8404_v2  ;;  %4389 = vmatpush1.bf16.msra.mxu1 %v8407_v3 }
 0x6f3   :  { %4349 = vmatprep.subr.bf16.mxu0 %v8410_v4  ;;  %4390 = vmatprep.subr.bf16.mxu1 %v8413_v5 }
 0x6f6   :  { %4350 = vmatpush1.bf16.msra.mxu0 %v8416_v6  ;;  %4391 = vmatpush1.bf16.msra.mxu1 %v8419_v7 }
 0x6f7   :  { %4351 = vmatprep.subr.bf16.mxu0 %v8422_v8  ;;  %4392 = vmatprep.subr.bf16.mxu1 %v8425_v10 }
 0x6fa   :  { %4352 = vmatpush1.bf16.msra.mxu0 %v8428_v11  ;;  %4393 = vmatpush1.bf16.msra.mxu1 %v8431_v20 }
 0x6fb   :  { %4353 = vmatprep.subr.bf16.mxu0 %v8434_v13  ;;  %4394 = vmatprep.subr.bf16.mxu1 %v8437_v14 }
 0x6fe   :  { %4354 = vmatpush1.bf16.msra.mxu0 %v8440_v15  ;;  %4395 = vmatpush1.bf16.msra.mxu1 %v8443_v16 }
 0x6ff   :  { %4355 = vmatprep.subr.bf16.mxu0 %v8446_v17  ;;  %4396 = vmatprep.subr.bf16.mxu1 %v8449_v36 }
 0x702   :  { %4356 = vmatpush1.bf16.msra.mxu0 %v8452_v26  ;;  %4397 = vmatpush1.bf16.msra.mxu1 %v8455_v25 }
 0x703   :  { %4357 = vmatprep.subr.bf16.mxu0 %v8458_v18  ;;  %4398 = vmatprep.subr.bf16.mxu1 %v8461_v21 }
 0x706   :  { %4358 = vmatpush1.bf16.msra.mxu0 %v8464_v28  ;;  %4399 = vmatpush1.bf16.msra.mxu1 %v8467_v38 }
 0x707   :  { %4359 = vmatprep.subr.bf16.mxu0 %v8470_v40  ;;  %4400 = vmatprep.subr.bf16.mxu1 %v8473_v27 }
 0x70a   :  { %4360 = vmatpush1.bf16.msra.mxu0 %v8476_v41  ;;  %4401 = vmatpush1.bf16.msra.mxu1 %v8479_v43 }
 0x70b   :  { %4464 = vmatprep.subr.bf16.mxu0 %v8482_v44  ;;  %4505 = vmatprep.subr.bf16.mxu1 %v8485_v45 }
 0x70d   :  { %4378 = vmatmul.mubr.bf16.vlgmr.msra.gmra.mrb[44].mxu0 %v8386_v1  ;;  %4419 = vmatmul.mubr.bf16.vlgmr.msra.gmra.mrb[44].mxu1 %v8386_v1  ;;  %v8558_v1 = vld [vmem:[#allocation12 + $0xc4] ss:$16 sps:$4 sm:$0xff]  }
 0x70e   :  { %4465 = vmatpush1.bf16.msra.mxu0 %v8490_v23  ;;  %4506 = vmatpush1.bf16.msra.mxu1 %v8493_v19  ;;  %9466 = vst [vmem:[#allocation33_spill] sm:$0xff] %v8558_v1 }
 0x70f   :  { %4466 = vmatprep.subr.bf16.mxu0 %v8496_v46  ;;  %4507 = vmatprep.subr.bf16.mxu1 %v8499_v32 }
 0x710   :  { %4496 = vmatprep.mubr.bf16.mxu0 %v9296_v34  ;;  %4537 = vmatprep.mubr.bf16.mxu1 %v9296_v34 }
 0x712   :  { %4467 = vmatpush1.bf16.msra.mxu0 %v8504_v30  ;;  %4508 = vmatpush1.bf16.msra.mxu1 %v8507_v47 }
 0x713   :  { %4468 = vmatprep.subr.bf16.mxu0 %v8510_v48  ;;  %4509 = vmatprep.subr.bf16.mxu1 %v8513_v50 }
 0x716   :  { %4469 = vmatpush1.bf16.msra.mxu0 %v8516_v51  ;;  %4510 = vmatpush1.bf16.msra.mxu1 %v8519_v53 }
 0x717   :  { %4470 = vmatprep.subr.bf16.mxu0 %v8522_v55  ;;  %4511 = vmatprep.subr.bf16.mxu1 %v8525_v37 }
 0x71a   :  { %4471 = vmatpush1.bf16.msra.mxu0 %v8528_v29  ;;  %4512 = vmatpush1.bf16.msra.mxu1 %v8531_v60 }
 0x71b   :  { %4472 = vmatprep.subr.bf16.mxu0 %v8534_v54  ;;  %4513 = vmatprep.subr.bf16.mxu1 %v8537_v56 }
 0x71e   :  { %4473 = vmatpush1.bf16.msra.mxu0 %v8540_v58  ;;  %4514 = vmatpush1.bf16.msra.mxu1 %v8543_v59  ;;  %v8561_v59 = vld [vmem:[#allocation12 + $0xcc] ss:$16 sps:$4 sm:$0xff]  }
 0x71f   :  { %4474 = vmatprep.subr.bf16.mxu0 %v8546_v62  ;;  %4515 = vmatprep.subr.bf16.mxu1 %v8549_v63  ;;  %9467 = vst [vmem:[#allocation34_spill] sm:$0xff] %v8561_v59  ;;  %v8564_v62 = vld [vmem:[#allocation12 + $0xc0] ss:$16 sps:$4 sm:$0xff]   ;;  %v8567_v63 = vld [vmem:[#allocation12 + $0xc8] ss:$16 sps:$4 sm:$0xff]  }
 0x720   :  { %9468 = vst [vmem:[#allocation35_spill] sm:$0xff] %v8564_v62  ;;  %9469 = vst [vmem:[#allocation36_spill] sm:$0xff] %v8567_v63 }
 0x722   :  { %4475 = vmatpush1.bf16.msra.mxu0 %v8552_v35  ;;  %4516 = vmatpush1.bf16.msra.mxu1 %v8555_v0  ;;  %v8570_v35 = vld [vmem:[#allocation12 + $0xe4] ss:$16 sps:$4 sm:$0xff]   ;;  %v8573_v0 = vld [vmem:[#allocation12 + $0xec] ss:$16 sps:$4 sm:$0xff]  }
 0x723   :  { %4476 = vmatprep.subr.bf16.mxu0 %v8558_v1  ;;  %4517 = vmatprep.subr.bf16.mxu1 %v8561_v59  ;;  %9470 = vst [vmem:[#allocation37_spill] sm:$0xff] %v8570_v35  ;;  %9471 = vst [vmem:[#allocation38_spill] sm:$0xff] %v8573_v0  ;;  %v8576_v1 = vld [vmem:[#allocation12 + $0xe0] ss:$16 sps:$4 sm:$0xff]   ;;  %v8579_v59 = vld [vmem:[#allocation12 + $0xe8] ss:$16 sps:$4 sm:$0xff]  }
 0x724   :  { %9472 = vst [vmem:[#allocation39_spill] sm:$0xff] %v8576_v1  ;;  %9473 = vst [vmem:[#allocation40_spill] sm:$0xff] %v8579_v59 }
 0x726   :  { %4477 = vmatpush1.bf16.msra.mxu0 %v8564_v62  ;;  %4518 = vmatpush1.bf16.msra.mxu1 %v8567_v63  ;;  %v8582_v62 = vld [vmem:[#allocation10 + $0x4] ss:$16 sps:$4 sm:$0xff]   ;;  %v8585_v63 = vld [vmem:[#allocation10 + $0xc] ss:$16 sps:$4 sm:$0xff]  }
 0x727   :  { %4478 = vmatprep.subr.bf16.mxu0 %v8570_v35  ;;  %4519 = vmatprep.subr.bf16.mxu1 %v8573_v0  ;;  %9474 = vst [vmem:[#allocation41_spill] sm:$0xff] %v8582_v62  ;;  %9475 = vst [vmem:[#allocation42_spill] sm:$0xff] %v8585_v63 }
 0x72a   :  { %4479 = vmatpush1.bf16.msra.mxu0 %v8576_v1  ;;  %4520 = vmatpush1.bf16.msra.mxu1 %v8579_v59 }
 0x72b   :  { %4550 = vmatprep.subr.bf16.mxu0 %v8582_v62  ;;  %4591 = vmatprep.subr.bf16.mxu1 %v8585_v63 }
 0x7c0   :  { %v4270_v35 = vpop.f32.mrb[40].mxu0  ;;  %v4311_v58 = vpop.f32.mrb[40].mxu1 }
 0x7c1   :  { %v6235_v0 = vadd.f32 %v4270_v35, %v9415_v9  ;;  %v4272_v56 = vpop.f32.mrb[41].mxu0  ;;  %v4313_v54 = vpop.f32.mrb[41].mxu1  ;;  %v6237_v62 = vadd.f32 %v4311_v58, %v9417_v31 }
 0x7c2   :  { %v6236_v1 = vadd.f32 %v4272_v56, %v9416_v12  ;;  %v4274_v60 = vpop.f32.mrb[42].mxu0  ;;  %v4315_v29 = vpop.f32.mrb[42].mxu1  ;;  %v6238_v63 = vadd.f32 %v4313_v54, %v9418_v61  ;;  %v4343_v12 = vld [vmem:[#allocation6 + $0x10] sm:$0xc0] }
 0x7c3   :  { %v4322_v37 = vmul.f32 0.5, %v6235_v0  ;;  %v4275_v59 = vpop.f32.mrb[43].mxu0  ;;  %v4316_v55 = vpop.f32.mrb[43].mxu1 }
 0x7c4   :  { %v4326_v53 = vmul.f32 0.5, %v6236_v1  ;;  %v4331_v51 = vmul.f32 0.5, %v6238_v63 }
 0x7c5   :  { %6712 = vtanh.f32 %v4322_v37 }
 0x7c6   :  { %6714 = vtanh.f32 %v4326_v53 }
 0x7c7   :  { %6716 = vtanh.f32 %v6237_v62 }
 0x7c8   :  { %6718 = vtanh.f32 %v4331_v51 }
 0x7cf   :  { %v6713_v50 = vpop.eup %6712 }
 0x7d0   :  { %v6715_v35 = vpop.eup %6714  ;;  %v4324_v9 = vmul.f32 0.5, %v6713_v50 }
 0x7d1   :  { %v4328_v48 = vmul.f32 0.5, %v6715_v35  ;;  %v6717_v60 = vpop.eup %6716  ;;  %v4341_v35 = vld [vmem:[#allocation6] sm:$0xc0] }
 0x7d2   :  { %v4325_v56 = vadd.f32 0.5, %v4324_v9  ;;  %v6719_v53 = vpop.eup %6718 }
 0x7d3   :  { %v4329_v29 = vadd.f32 0.5, %v4328_v48  ;;  %v4333_v37 = vmul.f32 0.5, %v6719_v53 }
 0x7d4   :  { %v4336_v0 = vmul.f32 %v6717_v60, %v4325_v56 }
 0x7d5   :  { %v4335_v55 = vmul.f32 %v4329_v29, %v8345_v52  ;;  %v4334_v50 = vadd.f32 0.5, %v4333_v37  ;;  %v4342_v52 = vld [vmem:[#allocation6 + $0x8] sm:$0xc0]  ;;  %v8596_v37 = vld [vmem:[#allocation10] ss:$16 sps:$4 sm:$0xff]  }
 0x7d7   :  { %v8593_v59 = vadd.f32 %v4336_v0, %v4335_v55 }
 0x7d9   :  { %9476 = vst [vmem:[#allocation77_spill] sm:$0xff] %v8593_v59  ;;  %6720 = vtanh.f32 %v8593_v59 }
 0x7e0   :  { %v4379_v58 = vpop.f32.mrb[44].mxu0  ;;  %v4420_v54 = vpop.f32.mrb[44].mxu1 }
 0x7e1   :  { %v4431_v62 = vrot.slane %v4379_v58, 2  ;;  %v4381_v63 = vpop.f32.mrb[45].mxu0  ;;  %v4422_v1 = vpop.f32.mrb[45].mxu1  ;;  %v4433_v60 = vrot.slane %v4420_v54, 2  ;;  %v4344_v54 = vld [vmem:[#allocation6 + $0x18] sm:$0xc0] }
 0x7e2   :  { %v4432_v51 = vrot.slane %v4381_v63, 2  ;;  %v4383_v9 = vpop.f32.mrb[46].mxu0  ;;  %v4424_v61 = vpop.f32.mrb[46].mxu1  ;;  %v4434_v30 = vrot.slane %v4422_v1, 2  ;;  %v8616_v63 = vld [vmem:[#allocation10 + $0x44] ss:$16 sps:$4 sm:$0xff]  }
 0x7e3   :  { %v6721_v48 = vpop.eup %6720  ;;  %v4439_v56 = vadd.f32 %v4431_v62, %v4341_v35  ;;  %v4384_v29 = vpop.f32.mrb[47].mxu0  ;;  %v4441_v58 = vadd.f32 %v4433_v60, %v4343_v12  ;;  %v8599_v61 = vld [vmem:[#allocation10 + $0x8] ss:$16 sps:$4 sm:$0xff]   ;;  %v8602_v62 = vld [vmem:[#allocation10 + $0x24] ss:$16 sps:$4 sm:$0xff]  }
 0x7e4   :  { %v4425_v0 = vpop.f32.mrb[47].mxu1  ;;  %v4339_v55 = vmul.f32 %v6721_v48, %v4334_v50  ;;  %v4440_v59 = vadd.f32 %v4432_v51, %v4342_v52  ;;  %v4442_v12 = vadd.f32 %v4434_v30, %v4344_v54  ;;  %v8619_v1 = vld [vmem:[#allocation10 + $0x4c] ss:$16 sps:$4 sm:$0xff]   ;;  %v8622_v35 = vld [vmem:[#allocation10 + $0x40] ss:$16 sps:$4 sm:$0xff]  }
 0x7e5   :  { %v4443_v31 = vmul.f32 0.5, %v4439_v56  ;;  %v8625_v51 = vld [vmem:[#allocation10 + $0x48] ss:$16 sps:$4 sm:$0xff]   ;;  %v8628_v56 = vld [vmem:[#allocation10 + $0x64] ss:$16 sps:$4 sm:$0xff]  }
 0x7e6   :  { %v4340_v53 = vpack.c.bf16 %v4339_v55, %v4339_v55  ;;  %v4447_v47 = vmul.f32 0.5, %v4440_v59  ;;  %v8605_v59 = vld [vmem:[#allocation10 + $0x2c] ss:$16 sps:$4 sm:$0xff]   ;;  %v4452_v30 = vmul.f32 0.5, %v4442_v12  ;;  %v8638_v54 = vld [vmem:[#allocation10 + $0x68] ss:$16 sps:$4 sm:$0xff]  }
 0x7e7   :  { %6722 = vtanh.f32 %v4443_v31  ;;  %v8610_v31 = vld [vmem:[#allocation10 + $0x20] ss:$16 sps:$4 sm:$0xff]   ;;  %v8631_v60 = vld [vmem:[#allocation10 + $0x6c] ss:$16 sps:$4 sm:$0xff]  }
 0x7e8   :  { %6724 = vtanh.f32 %v4447_v47  ;;  %4497 = vmatmul.mubr.bf16.vlgmr.msra.gmra.mrb[48].mxu0 %v4340_v53  ;;  %4538 = vmatmul.mubr.bf16.vlgmr.msra.gmra.mrb[48].mxu1 %v4340_v53  ;;  %v8613_v47 = vld [vmem:[#allocation10 + $0x28] ss:$16 sps:$4 sm:$0xff]   ;;  %v4457_v53 = vrot.slane %v8367_v49, 6  ;;  %v8649_v49 = vld [vmem:[#allocation10 + $0x80] ss:$16 sps:$4 sm:$0xff]  }
 0x7e9   :  { %4551 = vmatpush1.bf16.msra.mxu0 %v8596_v37  ;;  %4592 = vmatpush1.bf16.msra.mxu1 %v8599_v61  ;;  %6726 = vtanh.f32 %v4441_v58  ;;  %v8635_v58 = vld [vmem:[#allocation10 + $0x60] ss:$16 sps:$4 sm:$0xff]   ;;  %9478 = vst [vmem:[#allocation52_spill] sm:$0xff] %v8649_v49 }
 0x7ea   :  { %4552 = vmatprep.subr.bf16.mxu0 %v8602_v62  ;;  %4593 = vmatprep.subr.bf16.mxu1 %v8605_v59  ;;  %6728 = vtanh.f32 %v4452_v30 }
 0x7eb   :  { %4582 = vmatprep.mubr.bf16.mxu0 %v9296_v34  ;;  %4623 = vmatprep.mubr.bf16.mxu1 %v9296_v34 }
 0x7ed   :  { %4553 = vmatpush1.bf16.msra.mxu0 %v8610_v31  ;;  %4594 = vmatpush1.bf16.msra.mxu1 %v8613_v47 }
 0x7ee   :  { %4554 = vmatprep.subr.bf16.mxu0 %v8616_v63  ;;  %4595 = vmatprep.subr.bf16.mxu1 %v8619_v1 }
 0x7f1   :  { %v6723_v50 = vpop.eup %6722  ;;  %4555 = vmatpush1.bf16.msra.mxu0 %v8622_v35  ;;  %4596 = vmatpush1.bf16.msra.mxu1 %v8625_v51 }
 0x7f2   :  { %v6725_v9 = vpop.eup %6724  ;;  %v4445_v48 = vmul.f32 0.5, %v6723_v50  ;;  %4556 = vmatprep.subr.bf16.mxu0 %v8628_v56  ;;  %4597 = vmatprep.subr.bf16.mxu1 %v8631_v60  ;;  %v8641_v50 = vld [vmem:[#allocation10 + $0x84] ss:$16 sps:$4 sm:$0xff]  }
 0x7f3   :  { %v4449_v52 = vmul.f32 0.5, %v6725_v9  ;;  %v6727_v0 = vpop.eup %6726  ;;  %v8644_v9 = vld [vmem:[#allocation10 + $0x8c] ss:$16 sps:$4 sm:$0xff]  }
 0x7f4   :  { %v4446_v29 = vadd.f32 0.5, %v4445_v48  ;;  %9477 = vst [vmem:[#allocation51_spill] sm:$0xff] %v8644_v9 }
 0x7f5   :  { %v4450_v55 = vadd.f32 0.5, %v4449_v52  ;;  %4557 = vmatpush1.bf16.msra.mxu0 %v8635_v58  ;;  %4598 = vmatpush1.bf16.msra.mxu1 %v8638_v54  ;;  %v8652_v52 = vld [vmem:[#allocation10 + $0x88] ss:$16 sps:$4 sm:$0xff]  }
 0x7f6   :  { %v4460_v12 = vmul.f32 %v6727_v0, %v4446_v29  ;;  %4558 = vmatprep.subr.bf16.mxu0 %v8641_v50  ;;  %4599 = vmatprep.subr.bf16.mxu1 %v8644_v9  ;;  %9479 = vst [vmem:[#allocation53_spill] sm:$0xff] %v8652_v52  ;;  %v8655_v29 = vld [vmem:[#allocation10 + $0xa4] ss:$16 sps:$4 sm:$0xff]   ;;  %v8658_v0 = vld [vmem:[#allocation10 + $0xac] ss:$16 sps:$4 sm:$0xff]  }
 0x7f7   :  { %v4459_v30 = vmul.f32 %v4457_v53, %v4450_v55  ;;  %9480 = vst [vmem:[#allocation54_spill] sm:$0xff] %v8655_v29  ;;  %9481 = vst [vmem:[#allocation58_spill] sm:$0xff] %v8658_v0  ;;  %v6729_v55 = vpop.eup %6728  ;;  %v8662_v53 = vld [vmem:[#allocation10 + $0xa0] ss:$16 sps:$4 sm:$0xff]  }
 0x7f8   :  { %9482 = vst [vmem:[#allocation59_spill] sm:$0xff] %v8662_v53 }
 0x7f9   :  { %v8647_v48 = vadd.f32 %v4460_v12, %v4459_v30  ;;  %4559 = vmatpush1.bf16.msra.mxu0 %v8649_v49  ;;  %4600 = vmatpush1.bf16.msra.mxu1 %v8652_v52  ;;  %v8665_v12 = vld [vmem:[#allocation10 + $0xa8] ss:$16 sps:$4 sm:$0xff]   ;;  %v8668_v30 = vld [vmem:[#allocation10 + $0xc4] ss:$16 sps:$4 sm:$0xff]   ;;  %v8674_v52 = vld [vmem:[#allocation10 + $0xc0] ss:$16 sps:$4 sm:$0xff]  }
 0x7fa   :  { %4560 = vmatprep.subr.bf16.mxu0 %v8655_v29  ;;  %4601 = vmatprep.subr.bf16.mxu1 %v8658_v0  ;;  %9483 = vst [vmem:[#allocation60_spill] sm:$0xff] %v8665_v12  ;;  %9484 = vst [vmem:[#allocation61_spill] sm:$0xff] %v8668_v30  ;;  %v8671_v29 = vld [vmem:[#allocation10 + $0xcc] ss:$16 sps:$4 sm:$0xff]   ;;  %v4454_v0 = vmul.f32 0.5, %v6729_v55 }
 0x7fb   :  { %6730 = vtanh.f32 %v8647_v48  ;;  %9485 = vst [vmem:[#allocation62_spill] sm:$0xff] %v8671_v29  ;;  %9486 = vst [vmem:[#allocation63_spill] sm:$0xff] %v8674_v52  ;;  %v8677_v49 = vld [vmem:[#allocation10 + $0xc8] ss:$16 sps:$4 sm:$0xff]  }
 0x7fc   :  { %9487 = vst [vmem:[#allocation64_spill] sm:$0xff] %v8677_v49  ;;  %v8689_v55 = vld [vmem:[#allocation10 + $0xe8] ss:$16 sps:$4 sm:$0xff]  }
 0x7fd   :  { %4561 = vmatpush1.bf16.msra.mxu0 %v8662_v53  ;;  %4602 = vmatpush1.bf16.msra.mxu1 %v8665_v12  ;;  %v8680_v53 = vld [vmem:[#allocation10 + $0xe4] ss:$16 sps:$4 sm:$0xff]   ;;  %v8683_v12 = vld [vmem:[#allocation10 + $0xec] ss:$16 sps:$4 sm:$0xff]  }
 0x7fe   :  { %4562 = vmatprep.subr.bf16.mxu0 %v8668_v30  ;;  %4603 = vmatprep.subr.bf16.mxu1 %v8671_v29  ;;  %9488 = vst [vmem:[#allocation66_spill] sm:$0xff] %v8680_v53  ;;  %v4455_v30 = vadd.f32 0.5, %v4454_v0  ;;  %v8686_v29 = vld [vmem:[#allocation10 + $0xe0] ss:$16 sps:$4 sm:$0xff]  }
 0x7ff   :  { %v9494_v0 = vld [vmem:[#allocation20_spill] sm:$0xff] }
 0x801   :  { %4563 = vmatpush1.bf16.msra.mxu0 %v8674_v52  ;;  %4604 = vmatpush1.bf16.msra.mxu1 %v8677_v49 }
 0x802   :  { %4564 = vmatprep.subr.bf16.mxu0 %v8680_v53  ;;  %4605 = vmatprep.subr.bf16.mxu1 %v8683_v12 }
 0x805   :  { %v6731_v9 = vpop.eup %6730  ;;  %4565 = vmatpush1.bf16.msra.mxu0 %v8686_v29  ;;  %4606 = vmatpush1.bf16.msra.mxu1 %v8689_v55 }
 0x806   :  { %4659 = vmatprep.subr.bf16.mxu0 %v8266_v39  ;;  %4700 = vmatprep.subr.bf16.mxu1 %v8269_v24  ;;  %v4463_v49 = vmul.f32 %v6731_v9, %v4455_v30  ;;  %v9489_v39 = vld [vmem:[#allocation71_spill] sm:$0xff]  ;;  %v9490_v24 = vld [vmem:[#allocation72_spill] sm:$0xff]  ;;  %v9491_v9 = vld [vmem:[#allocation17_spill] sm:$0xff] }
 0x807   :  { %v9496_v30 = vld [vmem:[#allocation22_spill] sm:$0xff] }
 0x808   :  { %v4546_v53 = vpack.c.bf16 %v4463_v49, %v4463_v49  ;;  %v9492_v49 = vld [vmem:[#allocation18_spill] sm:$0xff] }
 0x80a   :  { %v4548_v52 = vrot.slane %v4546_v53, 3  ;;  %v9495_v53 = vld [vmem:[#allocation21_spill] sm:$0xff] }
 0x80c   :  { %4583 = vmatmul.mubr.bf16.vlgmr.msra.gmra.mrb[48].mxu0 %v4548_v52  ;;  %4624 = vmatmul.mubr.bf16.vlgmr.msra.gmra.mrb[48].mxu1 %v4548_v52 }
 0x80d   :  { %4660 = vmatpush1.bf16.msra.mxu0 %v8390_v22  ;;  %4701 = vmatpush1.bf16.msra.mxu1 %v8393_v42 }
 0x80e   :  { %4661 = vmatprep.subr.bf16.mxu0 %v8396_v33  ;;  %4702 = vmatprep.subr.bf16.mxu1 %v8399_v57 }
 0x80f   :  { %4691 = vmatprep.mubr.bf16.mxu0 %v9296_v34  ;;  %4732 = vmatprep.mubr.bf16.mxu1 %v9296_v34 }
 0x811   :  { %4662 = vmatpush1.bf16.msra.mxu0 %v8404_v2  ;;  %4703 = vmatpush1.bf16.msra.mxu1 %v8407_v3 }
 0x812   :  { %4663 = vmatprep.subr.bf16.mxu0 %v8410_v4  ;;  %4704 = vmatprep.subr.bf16.mxu1 %v8413_v5 }
 0x815   :  { %4664 = vmatpush1.bf16.msra.mxu0 %v8416_v6  ;;  %4705 = vmatpush1.bf16.msra.mxu1 %v8419_v7 }
 0x816   :  { %4665 = vmatprep.subr.bf16.mxu0 %v8422_v8  ;;  %4706 = vmatprep.subr.bf16.mxu1 %v8425_v10 }
 0x819   :  { %4666 = vmatpush1.bf16.msra.mxu0 %v8428_v11  ;;  %4707 = vmatpush1.bf16.msra.mxu1 %v8431_v20 }
 0x81a   :  { %4667 = vmatprep.subr.bf16.mxu0 %v8434_v13  ;;  %4708 = vmatprep.subr.bf16.mxu1 %v8437_v14 }
 0x81d   :  { %4668 = vmatpush1.bf16.msra.mxu0 %v8440_v15  ;;  %4709 = vmatpush1.bf16.msra.mxu1 %v8443_v16 }
 0x81e   :  { %4669 = vmatprep.subr.bf16.mxu0 %v8446_v17  ;;  %4710 = vmatprep.subr.bf16.mxu1 %v8449_v36 }
 0x821   :  { %4670 = vmatpush1.bf16.msra.mxu0 %v8452_v26  ;;  %4711 = vmatpush1.bf16.msra.mxu1 %v8455_v25 }
 0x822   :  { %4671 = vmatprep.subr.bf16.mxu0 %v8458_v18  ;;  %4712 = vmatprep.subr.bf16.mxu1 %v8461_v21  ;;  %v4658_v18 = vld [vmem:[#allocation6 + $0x38] sm:$0x3] }
 0x825   :  { %4672 = vmatpush1.bf16.msra.mxu0 %v8464_v28  ;;  %4713 = vmatpush1.bf16.msra.mxu1 %v8467_v38 }
 0x826   :  { %4673 = vmatprep.subr.bf16.mxu0 %v8470_v40  ;;  %4714 = vmatprep.subr.bf16.mxu1 %v8473_v27 }
 0x829   :  { %4674 = vmatpush1.bf16.msra.mxu0 %v8476_v41  ;;  %4715 = vmatpush1.bf16.msra.mxu1 %v8479_v43 }
 0x82a   :  { %4766 = vmatprep.subr.bf16.mxu0 %v8482_v44  ;;  %4807 = vmatprep.subr.bf16.mxu1 %v8485_v45  ;;  %v9518_v44 = vld [vmem:[#allocation74_spill] sm:$0xff] }
 0x82c   :  { %4692 = vmatmul.mubr.bf16.vlgmr.msra.gmra.mrb[52].mxu0 %v4548_v52  ;;  %4733 = vmatmul.mubr.bf16.vlgmr.msra.gmra.mrb[52].mxu1 %v4548_v52  ;;  %v9493_v52 = vld [vmem:[#allocation19_spill] sm:$0xff] }
 0x82d   :  { %4767 = vmatpush1.bf16.msra.mxu0 %v8490_v23  ;;  %4808 = vmatpush1.bf16.msra.mxu1 %v8493_v19  ;;  %v9499_v19 = vld [vmem:[#allocation25_spill] sm:$0xff] }
 0x82e   :  { %4768 = vmatprep.subr.bf16.mxu0 %v8496_v46  ;;  %4809 = vmatprep.subr.bf16.mxu1 %v8499_v32  ;;  %v9497_v32 = vld [vmem:[#allocation23_spill] sm:$0xff]  ;;  %v9498_v46 = vld [vmem:[#allocation24_spill] sm:$0xff]  ;;  %v9517_v23 = vld [vmem:[#allocation73_spill] sm:$0xff] }
 0x82f   :  { %4798 = vmatprep.mubr.bf16.mxu0 %v9296_v34  ;;  %4839 = vmatprep.mubr.bf16.mxu1 %v9296_v34 }
 0x831   :  { %4769 = vmatpush1.bf16.msra.mxu0 %v9489_v39  ;;  %4810 = vmatpush1.bf16.msra.mxu1 %v9490_v24  ;;  %v9500_v39 = vld [vmem:[#allocation26_spill] sm:$0xff]  ;;  %v9501_v24 = vld [vmem:[#allocation27_spill] sm:$0xff] }
 0x832   :  { %4770 = vmatprep.subr.bf16.mxu0 %v9491_v9  ;;  %4811 = vmatprep.subr.bf16.mxu1 %v9492_v49  ;;  %v9502_v9 = vld [vmem:[#allocation28_spill] sm:$0xff]  ;;  %v9503_v49 = vld [vmem:[#allocation29_spill] sm:$0xff] }
 0x835   :  { %4771 = vmatpush1.bf16.msra.mxu0 %v9493_v52  ;;  %4812 = vmatpush1.bf16.msra.mxu1 %v9494_v0  ;;  %v9504_v52 = vld [vmem:[#allocation30_spill] sm:$0xff]  ;;  %v9505_v0 = vld [vmem:[#allocation31_spill] sm:$0xff] }
 0x836   :  { %4772 = vmatprep.subr.bf16.mxu0 %v9495_v53  ;;  %4813 = vmatprep.subr.bf16.mxu1 %v9496_v30  ;;  %v9506_v53 = vld [vmem:[#allocation32_spill] sm:$0xff]  ;;  %v9507_v30 = vld [vmem:[#allocation33_spill] sm:$0xff] }
 0x839   :  { %4773 = vmatpush1.bf16.msra.mxu0 %v9497_v32  ;;  %4814 = vmatpush1.bf16.msra.mxu1 %v9498_v46  ;;  %v9508_v32 = vld [vmem:[#allocation34_spill] sm:$0xff]  ;;  %v9509_v46 = vld [vmem:[#allocation35_spill] sm:$0xff] }
 0x83a   :  { %4774 = vmatprep.subr.bf16.mxu0 %v9499_v19  ;;  %4815 = vmatprep.subr.bf16.mxu1 %v9500_v39  ;;  %v9510_v19 = vld [vmem:[#allocation36_spill] sm:$0xff]  ;;  %v9511_v39 = vld [vmem:[#allocation37_spill] sm:$0xff] }
 0x83d   :  { %4775 = vmatpush1.bf16.msra.mxu0 %v9501_v24  ;;  %4816 = vmatpush1.bf16.msra.mxu1 %v9502_v9  ;;  %v9512_v24 = vld [vmem:[#allocation38_spill] sm:$0xff]  ;;  %v9513_v9 = vld [vmem:[#allocation39_spill] sm:$0xff] }
 0x83e   :  { %4776 = vmatprep.subr.bf16.mxu0 %v9503_v49  ;;  %4817 = vmatprep.subr.bf16.mxu1 %v9504_v52  ;;  %v9514_v49 = vld [vmem:[#allocation40_spill] sm:$0xff]  ;;  %v9515_v52 = vld [vmem:[#allocation41_spill] sm:$0xff] }
 0x841   :  { %4777 = vmatpush1.bf16.msra.mxu0 %v9505_v0  ;;  %4818 = vmatpush1.bf16.msra.mxu1 %v9506_v53  ;;  %v9516_v0 = vld [vmem:[#allocation42_spill] sm:$0xff] }
 0x842   :  { %4778 = vmatprep.subr.bf16.mxu0 %v9507_v30  ;;  %4819 = vmatprep.subr.bf16.mxu1 %v9508_v32 }
 0x845   :  { %4779 = vmatpush1.bf16.msra.mxu0 %v9509_v46  ;;  %4820 = vmatpush1.bf16.msra.mxu1 %v9510_v19 }
 0x846   :  { %4780 = vmatprep.subr.bf16.mxu0 %v9511_v39  ;;  %4821 = vmatprep.subr.bf16.mxu1 %v9512_v24 }
 0x849   :  { %4781 = vmatpush1.bf16.msra.mxu0 %v9513_v9  ;;  %4822 = vmatpush1.bf16.msra.mxu1 %v9514_v49  ;;  %v9519_v49 = vld [vmem:[#allocation75_spill] sm:$0xff] }
 0x84a   :  { %4849 = vmatprep.subr.bf16.mxu0 %v9515_v52  ;;  %4890 = vmatprep.subr.bf16.mxu1 %v9516_v0  ;;  %v9520_v0 = vld [vmem:[#allocation76_spill] sm:$0xff] }
 0x8df   :  { %v4584_v53 = vpop.f32.mrb[48].mxu0  ;;  %v4625_v30 = vpop.f32.mrb[48].mxu1 }
 0x8e0   :  { %v6239_v32 = vadd.f32 %v4584_v53, %v9517_v23  ;;  %v4586_v45 = vpop.f32.mrb[49].mxu0  ;;  %v4627_v46 = vpop.f32.mrb[49].mxu1  ;;  %v6241_v40 = vadd.f32 %v4625_v30, %v9519_v49 }
 0x8e1   :  { %v6240_v19 = vadd.f32 %v4586_v45, %v9518_v44  ;;  %v4588_v43 = vpop.f32.mrb[50].mxu0  ;;  %v4629_v39 = vpop.f32.mrb[50].mxu1  ;;  %v6242_v52 = vadd.f32 %v4627_v46, %v9520_v0  ;;  %v4656_v0 = vld [vmem:[#allocation6 + $0x28] sm:$0x3] }
 0x8e2   :  { %v4636_v41 = vmul.f32 0.5, %v6239_v32  ;;  %v4589_v24 = vpop.f32.mrb[51].mxu0  ;;  %v4630_v27 = vpop.f32.mrb[51].mxu1 }
 0x8e3   :  { %v4640_v9 = vmul.f32 0.5, %v6240_v19  ;;  %v4645_v38 = vmul.f32 0.5, %v6242_v52  ;;  %v9521_v24 = vld [vmem:[#allocation77_spill] sm:$0xff] }
 0x8e4   :  { %6732 = vtanh.f32 %v4636_v41 }
 0x8e5   :  { %6734 = vtanh.f32 %v4640_v9  ;;  %v4655_v9 = vld [vmem:[#allocation6 + $0x20] sm:$0x3] }
 0x8e6   :  { %6736 = vtanh.f32 %v6241_v40 }
 0x8e7   :  { %6738 = vtanh.f32 %v4645_v38 }
 0x8ee   :  { %v6733_v28 = vpop.eup %6732 }
 0x8ef   :  { %v6735_v53 = vpop.eup %6734  ;;  %v4638_v23 = vmul.f32 0.5, %v6733_v28 }
 0x8f0   :  { %v4642_v21 = vmul.f32 0.5, %v6735_v53  ;;  %v6737_v43 = vpop.eup %6736 }
 0x8f1   :  { %v4639_v45 = vadd.f32 0.5, %v4638_v23  ;;  %v6739_v41 = vpop.eup %6738 }
 0x8f2   :  { %v4643_v39 = vadd.f32 0.5, %v4642_v21  ;;  %v4647_v40 = vmul.f32 0.5, %v6739_v41 }
 0x8f3   :  { %v4650_v32 = vmul.f32 %v6737_v43, %v4639_v45 }
 0x8f4   :  { %v4649_v27 = vmul.f32 %v4643_v39, %v9521_v24  ;;  %v4648_v38 = vadd.f32 0.5, %v4647_v40 }
 0x8f6   :  { %v8767_v19 = vadd.f32 %v4650_v32, %v4649_v27  ;;  %v4657_v27 = vld [vmem:[#allocation6 + $0x30] sm:$0x3] }
 0x8f8   :  { %9522 = vst [vmem:[#allocation67_spill] sm:$0xff] %v8767_v19  ;;  %6740 = vtanh.f32 %v8767_v19 }
 0x8ff   :  { %v4693_v46 = vpop.f32.mrb[52].mxu0  ;;  %v4734_v52 = vpop.f32.mrb[52].mxu1 }
 0x900   :  { %v4741_v30 = vadd.f32 %v4693_v46, %v4655_v9  ;;  %v4695_v28 = vpop.f32.mrb[53].mxu0  ;;  %v4736_v53 = vpop.f32.mrb[53].mxu1  ;;  %v4743_v41 = vadd.f32 %v4734_v52, %v4657_v27 }
 0x901   :  { %v4742_v23 = vadd.f32 %v4695_v28, %v4656_v0  ;;  %v4697_v49 = vpop.f32.mrb[54].mxu0  ;;  %v4738_v21 = vpop.f32.mrb[54].mxu1  ;;  %v4744_v9 = vadd.f32 %v4736_v53, %v4658_v18 }
 0x902   :  { %v6741_v45 = vpop.eup %6740  ;;  %v4745_v43 = vmul.f32 0.5, %v4741_v30  ;;  %v4698_v39 = vpop.f32.mrb[55].mxu0  ;;  %v4759_v30 = vrot.slane %v8647_v48, 6  ;;  %v9524_v21 = vld [vmem:[#allocation52_spill] sm:$0xff]  ;;  %v9527_v48 = vld [vmem:[#allocation58_spill] sm:$0xff] }
 0x903   :  { %v4739_v32 = vpop.f32.mrb[55].mxu1  ;;  %v4653_v24 = vmul.f32 %v6741_v45, %v4648_v38  ;;  %v4749_v19 = vmul.f32 0.5, %v4742_v23  ;;  %v4754_v49 = vmul.f32 0.5, %v4744_v9  ;;  %v9523_v38 = vld [vmem:[#allocation51_spill] sm:$0xff]  ;;  %v9525_v45 = vld [vmem:[#allocation53_spill] sm:$0xff]  ;;  %v9531_v9 = vld [vmem:[#allocation62_spill] sm:$0xff] }
 0x904   :  { %6742 = vtanh.f32 %v4745_v43  ;;  %v9526_v43 = vld [vmem:[#allocation54_spill] sm:$0xff]  ;;  %v9528_v32 = vld [vmem:[#allocation59_spill] sm:$0xff] }
 0x905   :  { %v4654_v44 = vpack.c.bf16 %v4653_v24, %v4653_v24  ;;  %6744 = vtanh.f32 %v4749_v19  ;;  %v9529_v24 = vld [vmem:[#allocation60_spill] sm:$0xff] }
 0x906   :  { %6746 = vtanh.f32 %v4743_v41  ;;  %v9530_v41 = vld [vmem:[#allocation61_spill] sm:$0xff] }
 0x907   :  { %4799 = vmatmul.mubr.bf16.vlgmr.msra.gmra.mrb[56].mxu0 %v4654_v44  ;;  %4840 = vmatmul.mubr.bf16.vlgmr.msra.gmra.mrb[56].mxu1 %v4654_v44  ;;  %6748 = vtanh.f32 %v4754_v49  ;;  %v9532_v49 = vld [vmem:[#allocation63_spill] sm:$0xff] }
 0x908   :  { %4850 = vmatpush1.bf16.msra.mxu0 %v8596_v37  ;;  %4891 = vmatpush1.bf16.msra.mxu1 %v8599_v61 }
 0x909   :  { %4851 = vmatprep.subr.bf16.mxu0 %v8602_v62  ;;  %4892 = vmatprep.subr.bf16.mxu1 %v8605_v59 }
 0x90a   :  { %4881 = vmatprep.mubr.bf16.mxu0 %v9296_v34  ;;  %4922 = vmatprep.mubr.bf16.mxu1 %v9296_v34 }
 0x90c   :  { %4852 = vmatpush1.bf16.msra.mxu0 %v8610_v31  ;;  %4893 = vmatpush1.bf16.msra.mxu1 %v8613_v47 }
 0x90d   :  { %4853 = vmatprep.subr.bf16.mxu0 %v8616_v63  ;;  %4894 = vmatprep.subr.bf16.mxu1 %v8619_v1 }
 0x90e   :  { %v6743_v18 = vpop.eup %6742 }
 0x90f   :  { %v6745_v44 = vpop.eup %6744  ;;  %v4747_v0 = vmul.f32 0.5, %v6743_v18  ;;  %v9533_v18 = vld [vmem:[#allocation64_spill] sm:$0xff] }
 0x910   :  { %v4751_v19 = vmul.f32 0.5, %v6745_v44  ;;  %4854 = vmatpush1.bf16.msra.mxu0 %v8622_v35  ;;  %4895 = vmatpush1.bf16.msra.mxu1 %v8625_v51  ;;  %v6747_v46 = vpop.eup %6746 }
 0x911   :  { %v4748_v40 = vadd.f32 0.5, %v4747_v0  ;;  %4855 = vmatprep.subr.bf16.mxu0 %v8628_v56  ;;  %4896 = vmatprep.subr.bf16.mxu1 %v8631_v60  ;;  %v6749_v39 = vpop.eup %6748  ;;  %v9534_v0 = vld [vmem:[#allocation66_spill] sm:$0xff] }
 0x912   :  { %v4752_v52 = vadd.f32 0.5, %v4751_v19  ;;  %v4756_v27 = vmul.f32 0.5, %v6749_v39  ;;  %v9559_v39 = vld [vmem:[#allocation25_spill] sm:$0xff] }
 0x913   :  { %v4762_v28 = vmul.f32 %v6747_v46, %v4748_v40 }
 0x914   :  { %v4761_v53 = vmul.f32 %v4759_v30, %v4752_v52  ;;  %4856 = vmatpush1.bf16.msra.mxu0 %v8635_v58  ;;  %4897 = vmatpush1.bf16.msra.mxu1 %v8638_v54  ;;  %v4757_v44 = vadd.f32 0.5, %v4756_v27  ;;  %v6878_v52 = vld [vmem:[#allocation7 + $0x4] ss:$16 sps:$4 sm:$0xff]   ;;  %v6879_v30 = vld [vmem:[#allocation7 + $0xc] ss:$16 sps:$4 sm:$0xff]  }
 0x915   :  { %4857 = vmatprep.subr.bf16.mxu0 %v8641_v50  ;;  %4898 = vmatprep.subr.bf16.mxu1 %v9523_v38  ;;  %v9560_v27 = vld [vmem:[#allocation26_spill] sm:$0xff] }
 0x916   :  { %v8789_v23 = vadd.f32 %v4762_v28, %v4761_v53  ;;  %v9557_v28 = vld [vmem:[#allocation23_spill] sm:$0xff]  ;;  %v9558_v53 = vld [vmem:[#allocation24_spill] sm:$0xff] }
 0x918   :  { %6750 = vtanh.f32 %v8789_v23  ;;  %4858 = vmatpush1.bf16.msra.mxu0 %v9524_v21  ;;  %4899 = vmatpush1.bf16.msra.mxu1 %v9525_v45 }
 0x919   :  { %4859 = vmatprep.subr.bf16.mxu0 %v9526_v43  ;;  %4900 = vmatprep.subr.bf16.mxu1 %v9527_v48 }
 0x91c   :  { %4860 = vmatpush1.bf16.msra.mxu0 %v9528_v32  ;;  %4901 = vmatpush1.bf16.msra.mxu1 %v9529_v24 }
 0x91d   :  { %4861 = vmatprep.subr.bf16.mxu0 %v9530_v41  ;;  %4902 = vmatprep.subr.bf16.mxu1 %v9531_v9 }
 0x920   :  { %4862 = vmatpush1.bf16.msra.mxu0 %v9532_v49  ;;  %4903 = vmatpush1.bf16.msra.mxu1 %v9533_v18 }
 0x921   :  { %4863 = vmatprep.subr.bf16.mxu0 %v9534_v0  ;;  %4904 = vmatprep.subr.bf16.mxu1 %v8683_v12 }
 0x922   :  { %v6751_v19 = vpop.eup %6750 }
 0x923   :  { %v4765_v40 = vmul.f32 %v6751_v19, %v4757_v44  ;;  %v9561_v44 = vld [vmem:[#allocation27_spill] sm:$0xff]  ;;  %v9562_v19 = vld [vmem:[#allocation28_spill] sm:$0xff] }
 0x924   :  { %4864 = vmatpush1.bf16.msra.mxu0 %v8686_v29  ;;  %4905 = vmatpush1.bf16.msra.mxu1 %v8689_v55 }
 0x925   :  { %v4848_v46 = vpack.c.bf16 %v4765_v40, %v4765_v40  ;;  %4958 = vmatprep.subr.bf16.mxu0 %v6878_v52  ;;  %4999 = vmatprep.subr.bf16.mxu1 %v6879_v30  ;;  %v9563_v40 = vld [vmem:[#allocation29_spill] sm:$0xff]  ;;  %v9565_v52 = vld [vmem:[#allocation31_spill] sm:$0xff]  ;;  %v9566_v30 = vld [vmem:[#allocation32_spill] sm:$0xff] }
 0x927   :  { %4882 = vmatmul.mubr.bf16.vlgmr.msra.gmra.mrb[56].mxu0 %v4848_v46  ;;  %4923 = vmatmul.mubr.bf16.vlgmr.msra.gmra.mrb[56].mxu1 %v4848_v46 }
 0x928   :  { %4959 = vmatpush1.bf16.msra.mxu0 %v8390_v22  ;;  %5000 = vmatpush1.bf16.msra.mxu1 %v8393_v42  ;;  %v9535_v22 = vld [vmem:[#allocation43_spill] sm:$0xff]  ;;  %v9536_v42 = vld [vmem:[#allocation44_spill] sm:$0xff] }
 0x929   :  { %4960 = vmatprep.subr.bf16.mxu0 %v8396_v33  ;;  %5001 = vmatprep.subr.bf16.mxu1 %v8399_v57  ;;  %v9537_v33 = vld [vmem:[#allocation45_spill] sm:$0xff]  ;;  %v9538_v57 = vld [vmem:[#allocation46_spill] sm:$0xff] }
 0x92a   :  { %4990 = vmatprep.mubr.bf16.mxu0 %v9296_v34  ;;  %5031 = vmatprep.mubr.bf16.mxu1 %v9296_v34 }
 0x92c   :  { %4961 = vmatpush1.bf16.msra.mxu0 %v8404_v2  ;;  %5002 = vmatpush1.bf16.msra.mxu1 %v8407_v3  ;;  %v9539_v2 = vld [vmem:[#allocation47_spill] sm:$0xff]  ;;  %v9540_v3 = vld [vmem:[#allocation48_spill] sm:$0xff] }
 0x92d   :  { %4962 = vmatprep.subr.bf16.mxu0 %v8410_v4  ;;  %5003 = vmatprep.subr.bf16.mxu1 %v8413_v5  ;;  %v9541_v4 = vld [vmem:[#allocation49_spill] sm:$0xff]  ;;  %v9542_v5 = vld [vmem:[#allocation50_spill] sm:$0xff] }
 0x930   :  { %4963 = vmatpush1.bf16.msra.mxu0 %v8416_v6  ;;  %5004 = vmatpush1.bf16.msra.mxu1 %v8419_v7  ;;  %v9543_v6 = vld [vmem:[#allocation55_spill] sm:$0xff]  ;;  %v9544_v7 = vld [vmem:[#allocation56_spill] sm:$0xff] }
 0x931   :  { %4964 = vmatprep.subr.bf16.mxu0 %v8422_v8  ;;  %5005 = vmatprep.subr.bf16.mxu1 %v8425_v10  ;;  %v9545_v8 = vld [vmem:[#allocation57_spill] sm:$0xff] }
 0x932   :  { %v9546_v10 = vld [vmem:[#allocation65_spill] sm:$0xff] }
 0x934   :  { %4965 = vmatpush1.bf16.msra.mxu0 %v8428_v11  ;;  %5006 = vmatpush1.bf16.msra.mxu1 %v8431_v20  ;;  %v9547_v11 = vld [vmem:[#allocation69_spill] sm:$0xff]  ;;  %v9548_v20 = vld [vmem:[#allocation70_spill] sm:$0xff] }
 0x935   :  { %4966 = vmatprep.subr.bf16.mxu0 %v8434_v13  ;;  %5007 = vmatprep.subr.bf16.mxu1 %v8437_v14  ;;  %v9549_v13 = vld [vmem:[#allocation71_spill] sm:$0xff]  ;;  %v9550_v14 = vld [vmem:[#allocation72_spill] sm:$0xff] }
 0x938   :  { %4967 = vmatpush1.bf16.msra.mxu0 %v8440_v15  ;;  %5008 = vmatpush1.bf16.msra.mxu1 %v8443_v16  ;;  %v9551_v15 = vld [vmem:[#allocation17_spill] sm:$0xff]  ;;  %v9552_v16 = vld [vmem:[#allocation18_spill] sm:$0xff] }
 0x939   :  { %4968 = vmatprep.subr.bf16.mxu0 %v8446_v17  ;;  %5009 = vmatprep.subr.bf16.mxu1 %v8449_v36  ;;  %v9553_v17 = vld [vmem:[#allocation19_spill] sm:$0xff]  ;;  %v9554_v36 = vld [vmem:[#allocation20_spill] sm:$0xff] }
 0x93c   :  { %4969 = vmatpush1.bf16.msra.mxu0 %v8452_v26  ;;  %5010 = vmatpush1.bf16.msra.mxu1 %v8455_v25  ;;  %v9555_v26 = vld [vmem:[#allocation21_spill] sm:$0xff]  ;;  %v9556_v25 = vld [vmem:[#allocation22_spill] sm:$0xff] }
 0x93d   :  { %4970 = vmatprep.subr.bf16.mxu0 %v9535_v22  ;;  %5011 = vmatprep.subr.bf16.mxu1 %v9536_v42  ;;  %v9567_v22 = vld [vmem:[#allocation33_spill] sm:$0xff]  ;;  %v9568_v42 = vld [vmem:[#allocation34_spill] sm:$0xff] }
 0x940   :  { %4971 = vmatpush1.bf16.msra.mxu0 %v9537_v33  ;;  %5012 = vmatpush1.bf16.msra.mxu1 %v9538_v57  ;;  %v9569_v33 = vld [vmem:[#allocation35_spill] sm:$0xff]  ;;  %v9570_v57 = vld [vmem:[#allocation36_spill] sm:$0xff] }
 0x941   :  { %4972 = vmatprep.subr.bf16.mxu0 %v9539_v2  ;;  %5013 = vmatprep.subr.bf16.mxu1 %v9540_v3  ;;  %v9571_v2 = vld [vmem:[#allocation37_spill] sm:$0xff]  ;;  %v9572_v3 = vld [vmem:[#allocation38_spill] sm:$0xff] }
 0x944   :  { %4973 = vmatpush1.bf16.msra.mxu0 %v9541_v4  ;;  %5014 = vmatpush1.bf16.msra.mxu1 %v9542_v5  ;;  %v9573_v4 = vld [vmem:[#allocation39_spill] sm:$0xff]  ;;  %v9574_v5 = vld [vmem:[#allocation40_spill] sm:$0xff] }
 0x945   :  { %5077 = vmatprep.subr.bf16.mxu0 %v9543_v6  ;;  %5118 = vmatprep.subr.bf16.mxu1 %v9544_v7  ;;  %v9575_v6 = vld [vmem:[#allocation41_spill] sm:$0xff]  ;;  %v9576_v7 = vld [vmem:[#allocation42_spill] sm:$0xff] }
 0x947   :  { %4991 = vmatmul.mubr.bf16.vlgmr.msra.gmra.mrb[60].mxu0 %v4848_v46  ;;  %5032 = vmatmul.mubr.bf16.vlgmr.msra.gmra.mrb[60].mxu1 %v4848_v46  ;;  %v9564_v46 = vld [vmem:[#allocation30_spill] sm:$0xff] }
 0x948   :  { %5078 = vmatpush1.bf16.msra.mxu0 %v9545_v8  ;;  %5119 = vmatpush1.bf16.msra.mxu1 %v9546_v10 }
 0x949   :  { %5079 = vmatprep.subr.bf16.mxu0 %v9547_v11  ;;  %5120 = vmatprep.subr.bf16.mxu1 %v9548_v20  ;;  %v9577_v11 = vld [vmem:[#allocation73_spill] sm:$0xff] }
 0x94a   :  { %5109 = vmatprep.mubr.bf16.mxu0 %v9296_v34  ;;  %5150 = vmatprep.mubr.bf16.mxu1 %v9296_v34 }
 0x94c   :  { %5080 = vmatpush1.bf16.msra.mxu0 %v9549_v13  ;;  %5121 = vmatpush1.bf16.msra.mxu1 %v9550_v14 }
 0x94d   :  { %5081 = vmatprep.subr.bf16.mxu0 %v9551_v15  ;;  %5122 = vmatprep.subr.bf16.mxu1 %v9552_v16  ;;  %v9578_v15 = vld [vmem:[#allocation74_spill] sm:$0xff] }
 0x950   :  { %5082 = vmatpush1.bf16.msra.mxu0 %v9553_v17  ;;  %5123 = vmatpush1.bf16.msra.mxu1 %v9554_v36 }
 0x951   :  { %5083 = vmatprep.subr.bf16.mxu0 %v9555_v26  ;;  %5124 = vmatprep.subr.bf16.mxu1 %v9556_v25 }
 0x954   :  { %5084 = vmatpush1.bf16.msra.mxu0 %v9557_v28  ;;  %5125 = vmatpush1.bf16.msra.mxu1 %v9558_v53 }
 0x955   :  { %5085 = vmatprep.subr.bf16.mxu0 %v9559_v39  ;;  %5126 = vmatprep.subr.bf16.mxu1 %v9560_v27  ;;  %v9579_v39 = vld [vmem:[#allocation75_spill] sm:$0xff] }
 0x958   :  { %5086 = vmatpush1.bf16.msra.mxu0 %v9561_v44  ;;  %5127 = vmatpush1.bf16.msra.mxu1 %v9562_v19  ;;  %v9580_v44 = vld [vmem:[#allocation76_spill] sm:$0xff] }
 0x959   :  { %5087 = vmatprep.subr.bf16.mxu0 %v9563_v40  ;;  %5128 = vmatprep.subr.bf16.mxu1 %v9564_v46 }
 0x95c   :  { %5088 = vmatpush1.bf16.msra.mxu0 %v9565_v52  ;;  %5129 = vmatpush1.bf16.msra.mxu1 %v9566_v30 }
 0x95d   :  { %5089 = vmatprep.subr.bf16.mxu0 %v9567_v22  ;;  %5130 = vmatprep.subr.bf16.mxu1 %v9568_v42 }
 0x960   :  { %5090 = vmatpush1.bf16.msra.mxu0 %v9569_v33  ;;  %5131 = vmatpush1.bf16.msra.mxu1 %v9570_v57 }
 0x961   :  { %5091 = vmatprep.subr.bf16.mxu0 %v9571_v2  ;;  %5132 = vmatprep.subr.bf16.mxu1 %v9572_v3  ;;  %v9581_v3 = vld [vmem:[#allocation67_spill] sm:$0xff] }
 0x964   :  { %5092 = vmatpush1.bf16.msra.mxu0 %v9573_v4  ;;  %5133 = vmatpush1.bf16.msra.mxu1 %v9574_v5 }
 0x965   :  { %5163 = vmatprep.subr.bf16.mxu0 %v9575_v6  ;;  %5204 = vmatprep.subr.bf16.mxu1 %v9576_v7 }
 0x9fa   :  { %v4883_v8 = vpop.f32.mrb[56].mxu0  ;;  %v4924_v10 = vpop.f32.mrb[56].mxu1 }
 0x9fb   :  { %v6243_v20 = vadd.f32 %v4883_v8, %v9577_v11  ;;  %v4885_v13 = vpop.f32.mrb[57].mxu0  ;;  %v4926_v14 = vpop.f32.mrb[57].mxu1  ;;  %v6245_v27 = vadd.f32 %v4924_v10, %v9579_v39 }
 0x9fc   :  { %v6244_v16 = vadd.f32 %v4885_v13, %v9578_v15  ;;  %v4887_v17 = vpop.f32.mrb[58].mxu0  ;;  %v4928_v36 = vpop.f32.mrb[58].mxu1  ;;  %v6246_v19 = vadd.f32 %v4926_v14, %v9580_v44 }
 0x9fd   :  { %v4935_v26 = vmul.f32 0.5, %v6243_v20  ;;  %v4888_v25 = vpop.f32.mrb[59].mxu0  ;;  %v4929_v28 = vpop.f32.mrb[59].mxu1  ;;  %v4954_v17 = vld [vmem:[#allocation6 + $0x20] sm:$0xc] }
 0x9fe   :  { %v4939_v53 = vmul.f32 0.5, %v6244_v16  ;;  %v4944_v40 = vmul.f32 0.5, %v6246_v19  ;;  %v4955_v19 = vld [vmem:[#allocation6 + $0x28] sm:$0xc] }
 0x9ff   :  { %6752 = vtanh.f32 %v4935_v26 }
 0xa00   :  { %6754 = vtanh.f32 %v4939_v53 }
 0xa01   :  { %6756 = vtanh.f32 %v6245_v27 }
 0xa02   :  { %6758 = vtanh.f32 %v4944_v40 }
 0xa09   :  { %v6753_v46 = vpop.eup %6752 }
 0xa0a   :  { %v6755_v52 = vpop.eup %6754  ;;  %v4937_v30 = vmul.f32 0.5, %v6753_v46 }
 0xa0b   :  { %v4941_v22 = vmul.f32 0.5, %v6755_v52  ;;  %v6757_v33 = vpop.eup %6756 }
 0xa0c   :  { %v4938_v42 = vadd.f32 0.5, %v4937_v30  ;;  %v6759_v6 = vpop.eup %6758 }
 0xa0d   :  { %v4942_v57 = vadd.f32 0.5, %v4941_v22  ;;  %v4946_v7 = vmul.f32 0.5, %v6759_v6 }
 0xa0e   :  { %v4949_v2 = vmul.f32 %v6757_v33, %v4938_v42  ;;  %v4956_v33 = vld [vmem:[#allocation6 + $0x30] sm:$0xc] }
 0xa0f   :  { %v4948_v4 = vmul.f32 %v4942_v57, %v9581_v3  ;;  %v4947_v16 = vadd.f32 0.5, %v4946_v7 }
 0xa11   :  { %v8879_v5 = vadd.f32 %v4949_v2, %v4948_v4  ;;  %v4957_v4 = vld [vmem:[#allocation6 + $0x38] sm:$0xc] }
 0xa13   :  { %6760 = vtanh.f32 %v8879_v5 }
 0xa1a   :  { %v4992_v8 = vpop.f32.mrb[60].mxu0  ;;  %v5033_v10 = vpop.f32.mrb[60].mxu1 }
 0xa1b   :  { %v5044_v20 = vrot.slane %v4992_v8, 6  ;;  %v4994_v13 = vpop.f32.mrb[61].mxu0  ;;  %v5035_v14 = vpop.f32.mrb[61].mxu1  ;;  %v5046_v27 = vrot.slane %v5033_v10, 6  ;;  %v6659_v8 = vld [vmem:[%s9024_s18 + $0x28] sm:$0xff]  }
 0xa1c   :  { %v5045_v36 = vrot.slane %v4994_v13, 6  ;;  %v4996_v26 = vpop.f32.mrb[62].mxu0  ;;  %v5037_v25 = vpop.f32.mrb[62].mxu1  ;;  %v5047_v3 = vrot.slane %v5035_v14, 6 }
 0xa1d   :  { %v6761_v28 = vpop.eup %6760  ;;  %v5052_v53 = vadd.f32 %v5044_v20, %v4954_v17  ;;  %v4997_v40 = vpop.f32.mrb[63].mxu0  ;;  %v5054_v2 = vadd.f32 %v5046_v27, %v4956_v33 }
 0xa1e   :  { %v5038_v46 = vpop.f32.mrb[63].mxu1  ;;  %v4952_v52 = vmul.f32 %v6761_v28, %v4947_v16  ;;  %v5053_v30 = vadd.f32 %v5045_v36, %v4955_v19  ;;  %v5055_v6 = vadd.f32 %v5047_v3, %v4957_v4 }
 0xa1f   :  { %v5056_v22 = vmul.f32 0.5, %v5052_v53 }
 0xa20   :  { %v4953_v42 = vpack.c.bf16 %v4952_v52, %v4952_v52  ;;  %v5060_v57 = vmul.f32 0.5, %v5053_v30 }
 0xa21   :  { %6762 = vtanh.f32 %v5056_v22 }
 0xa22   :  { %6764 = vtanh.f32 %v5060_v57  ;;  %5110 = vmatmul.mubr.bf16.vlgmr.msra.gmra.mrb[64].mxu0 %v4953_v42  ;;  %5151 = vmatmul.mubr.bf16.vlgmr.msra.gmra.mrb[64].mxu1 %v4953_v42 }
 0xa23   :  { %5164 = vmatpush1.bf16.msra.mxu0 %v8596_v37  ;;  %5205 = vmatpush1.bf16.msra.mxu1 %v8599_v61  ;;  %6766 = vtanh.f32 %v5054_v2  ;;  %v5065_v37 = vmul.f32 0.5, %v5055_v6 }
 0xa24   :  { %5165 = vmatprep.subr.bf16.mxu0 %v8602_v62  ;;  %5206 = vmatprep.subr.bf16.mxu1 %v8605_v59 }
 0xa25   :  { %5195 = vmatprep.mubr.bf16.mxu0 %v9296_v34  ;;  %5236 = vmatprep.mubr.bf16.mxu1 %v9296_v34  ;;  %6768 = vtanh.f32 %v5065_v37 }
 0xa27   :  { %5166 = vmatpush1.bf16.msra.mxu0 %v8610_v31  ;;  %5207 = vmatpush1.bf16.msra.mxu1 %v8613_v47 }
 0xa28   :  { %5167 = vmatprep.subr.bf16.mxu0 %v8616_v63  ;;  %5208 = vmatprep.subr.bf16.mxu1 %v8619_v1  ;;  %v5070_v63 = vrot.slane %v8789_v23, 6 }
 0xa2b   :  { %v6763_v61 = vpop.eup %6762  ;;  %5168 = vmatpush1.bf16.msra.mxu0 %v8622_v35  ;;  %5209 = vmatpush1.bf16.msra.mxu1 %v8625_v51 }
 0xa2c   :  { %v6765_v62 = vpop.eup %6764  ;;  %v5058_v59 = vmul.f32 0.5, %v6763_v61  ;;  %5169 = vmatprep.subr.bf16.mxu0 %v8628_v56  ;;  %5210 = vmatprep.subr.bf16.mxu1 %v8631_v60 }
 0xa2d   :  { %v5062_v34 = vmul.f32 0.5, %v6765_v62  ;;  %v6767_v47 = vpop.eup %6766  ;;  %v6660_v62 = vld [vmem:[%s9024_s18 + $0x30] sm:$0xff]  }
 0xa2e   :  { %v5059_v31 = vadd.f32 0.5, %v5058_v59  ;;  %v5827_v59 = vld [vmem:[%s9023_s17] ss:$0 sm:$0xff]  ;;  %s6946_s17 = scalar_lea.vmem %s5501_s22, 32 }
 0xa2f   :  { %v5063_v7 = vadd.f32 0.5, %v5062_v34  ;;  %5170 = vmatpush1.bf16.msra.mxu0 %v8635_v58  ;;  %5211 = vmatpush1.bf16.msra.mxu1 %v8638_v54  ;;  %v6769_v56 = vpop.eup %6768  ;;  %p6947_p10 = scmp.ne.s32.totalorder %s5501_s22, %s6946_s17  ;;  %p6952_p12 = scmp.lt.s32.totalorder %s6946_s17, %s6946_s17 }
 0xa30   :  { %v5073_v1 = vmul.f32 %v6767_v47, %v5059_v31  ;;  %5171 = vmatprep.subr.bf16.mxu0 %v8641_v50  ;;  %5212 = vmatprep.subr.bf16.mxu1 %v9523_v38  ;;  %v5067_v60 = vmul.f32 0.5, %v6769_v56  ;;  %v9582_v38 = vmov 0.0  }
 0xa31   :  { %v5072_v35 = vmul.f32 %v5070_v63, %v5063_v7  ;;  %p6953_p13 = por %p6952_p12, %p6951_p11 }
 0xa32   :  { %v5068_v58 = vadd.f32 0.5, %v5067_v60 }
 0xa33   :  { %v5074_v51 = vadd.f32 %v5073_v1, %v5072_v35  ;;  %5172 = vmatpush1.bf16.msra.mxu0 %v9524_v21  ;;  %5213 = vmatpush1.bf16.msra.mxu1 %v9525_v45  ;;  %v6649_v45 = vld [vmem:[%s9022_s16 + $0x18] sm:$0xff]   ;;  %p6954_p0 = pnand %p6953_p13, %p6947_p10 }
 0xa34   :  { %5173 = vmatprep.subr.bf16.mxu0 %v9526_v43  ;;  %5214 = vmatprep.subr.bf16.mxu1 %v9527_v48  ;;  %v6650_v43 = vld [vmem:[%s9022_s16 + $0x20] sm:$0xff]   ;;  %v6651_v48 = vld [vmem:[%s9022_s16 + $0x28] sm:$0xff]  }
 0xa35   :  { %6770 = vtanh.f32 %v5074_v51  ;;  %v5836_v51 = vld [vmem:[%s9025_s19] ss:$0 sm:$0xff] }
 0xa37   :  { %5174 = vmatpush1.bf16.msra.mxu0 %v9528_v32  ;;  %5215 = vmatpush1.bf16.msra.mxu1 %v9529_v24  ;;  %v6652_v32 = vld [vmem:[%s9022_s16 + $0x30] sm:$0xff]   ;;  %v6653_v24 = vld [vmem:[%s9022_s16 + $0x38] sm:$0xff]  }
 0xa38   :  { %5175 = vmatprep.subr.bf16.mxu0 %v9530_v41  ;;  %5216 = vmatprep.subr.bf16.mxu1 %v9531_v9  ;;  %v6654_v41 = vld [vmem:[%s9024_s18] sm:$0xff]   ;;  %v6655_v9 = vld [vmem:[%s9024_s18 + $0x8] sm:$0xff]  }
 0xa3b   :  { %5176 = vmatpush1.bf16.msra.mxu0 %v9532_v49  ;;  %5217 = vmatpush1.bf16.msra.mxu1 %v9533_v18  ;;  %v6656_v49 = vld [vmem:[%s9024_s18 + $0x10] sm:$0xff]   ;;  %v6657_v18 = vld [vmem:[%s9024_s18 + $0x18] sm:$0xff]  }
 0xa3c   :  { %5177 = vmatprep.subr.bf16.mxu0 %v9534_v0  ;;  %5218 = vmatprep.subr.bf16.mxu1 %v8683_v12  ;;  %v6647_v12 = vld [vmem:[%s9022_s16 + $0x8] sm:$0xff]   ;;  %v6658_v0 = vld [vmem:[%s9024_s18 + $0x20] sm:$0xff]  }
 0xa3f   :  { %v6771_v54 = vpop.eup %6770  ;;  %5178 = vmatpush1.bf16.msra.mxu0 %v8686_v29  ;;  %5219 = vmatpush1.bf16.msra.mxu1 %v8689_v55  ;;  %v6646_v29 = vld [vmem:[%s9022_s16] sm:$0xff]   ;;  %v6648_v55 = vld [vmem:[%s9022_s16 + $0x10] sm:$0xff]  }
 0xa40   :  { %v5076_v50 = vmul.f32 %v6771_v54, %v5068_v58  ;;  %6187 = vmatprep.subr.bf16.mxu0 %v9582_v38  ;;  %6207 = vmatprep.subr.bf16.mxu1 %v9582_v38 }
 0xa42   :  { %v5159_v23 = vpack.c.bf16 %v5076_v50, %v5076_v50 }
 0xa44   :  { %v5161_v21 = vrot.slane %v5159_v23, 1 }
 0xa46   :  { %5196 = vmatmul.mubr.bf16.vlgmr.msra.gmra.mrb[64].mxu0 %v5161_v21  ;;  %5237 = vmatmul.mubr.bf16.vlgmr.msra.gmra.mrb[64].mxu1 %v5161_v21 }
 0xa47   :  { %6203 = vmatprep.mubr.msk.bf16.mxu0 %vm6980_vm4, %v9582_v38  ;;  %6223 = vmatprep.mubr.msk.bf16.mxu1 %vm6980_vm4, %v9582_v38 }
 0xa48   :  { %6188 = vmatpush3.bf16.msra.mxu0 %v6646_v29  ;;  %6208 = vmatpush3.bf16.msra.mxu1 %v6654_v41 }
 0xa49   :  { %6189 = vmatprep.subr.bf16.mxu0 %v9582_v38  ;;  %6209 = vmatprep.subr.bf16.mxu1 %v9582_v38 }
 0xa4c   :  { %6190 = vmatpush3.bf16.msra.mxu0 %v6647_v12  ;;  %6210 = vmatpush3.bf16.msra.mxu1 %v6655_v9 }
 0xa4d   :  { %6191 = vmatprep.subr.bf16.mxu0 %v9582_v38  ;;  %6211 = vmatprep.subr.bf16.mxu1 %v9582_v38 }
 0xa50   :  { %6192 = vmatpush3.bf16.msra.mxu0 %v6648_v55  ;;  %6212 = vmatpush3.bf16.msra.mxu1 %v6656_v49 }
 0xa51   :  { %6193 = vmatprep.subr.bf16.mxu0 %v9582_v38  ;;  %6213 = vmatprep.subr.bf16.mxu1 %v9582_v38 }
 0xa54   :  { %6194 = vmatpush3.bf16.msra.mxu0 %v6649_v45  ;;  %6214 = vmatpush3.bf16.msra.mxu1 %v6657_v18 }
 0xa55   :  { %6195 = vmatprep.subr.bf16.mxu0 %v9582_v38  ;;  %6215 = vmatprep.subr.bf16.mxu1 %v9582_v38 }
 0xa58   :  { %6196 = vmatpush3.bf16.msra.mxu0 %v6650_v43  ;;  %6216 = vmatpush3.bf16.msra.mxu1 %v6658_v0 }
 0xa59   :  { %6197 = vmatprep.subr.bf16.mxu0 %v9582_v38  ;;  %6217 = vmatprep.subr.bf16.mxu1 %v9582_v38 }
 0xa5c   :  { %6198 = vmatpush3.bf16.msra.mxu0 %v6651_v48  ;;  %6218 = vmatpush3.bf16.msra.mxu1 %v6659_v8 }
 0xa5d   :  { %6199 = vmatprep.subr.bf16.mxu0 %v9582_v38  ;;  %6219 = vmatprep.subr.bf16.mxu1 %v9582_v38 }
 0xa60   :  { %6200 = vmatpush3.bf16.msra.mxu0 %v6652_v32  ;;  %6220 = vmatpush3.bf16.msra.mxu1 %v6660_v62 }
 0xa61   :  { %6201 = vmatprep.subr.bf16.mxu0 %v9582_v38  ;;  %6221 = vmatprep.subr.bf16.mxu1 %v9582_v38 }
 0xa64   :  { %6202 = vmatpush3.bf16.msra.mxu0 %v6653_v24 }
 0xb19   :  { %v5197_v10 = vpop.f32.mrb[64].mxu0  ;;  %v5238_v20 = vpop.f32.mrb[64].mxu1 }
 0xb1a   :  { %v6247_v13 = vadd.f32 %v5197_v10, %v9577_v11  ;;  %v5199_v14 = vpop.f32.mrb[65].mxu0  ;;  %v5240_v16 = vpop.f32.mrb[65].mxu1  ;;  %v6249_v19 = vadd.f32 %v5238_v20, %v9579_v39 }
 0xb1b   :  { %v6248_v17 = vadd.f32 %v5199_v14, %v9578_v15  ;;  %v5201_v36 = vpop.f32.mrb[66].mxu0  ;;  %v5242_v26 = vpop.f32.mrb[66].mxu1  ;;  %v6250_v40 = vadd.f32 %v5240_v16, %v9580_v44 }
 0xb1c   :  { %v5249_v25 = vmul.f32 0.5, %v6247_v13  ;;  %v5202_v28 = vpop.f32.mrb[67].mxu0  ;;  %v5243_v53 = vpop.f32.mrb[67].mxu1 }
 0xb1d   :  { %v5253_v27 = vmul.f32 0.5, %v6248_v17  ;;  %v5258_v46 = vmul.f32 0.5, %v6250_v40 }
 0xb1e   :  { %6772 = vtanh.f32 %v5249_v25 }
 0xb1f   :  { %6774 = vtanh.f32 %v5253_v27 }
 0xb20   :  { %6776 = vtanh.f32 %v6249_v19 }
 0xb21   :  { %6778 = vtanh.f32 %v5258_v46 }
 0xb28   :  { %v6773_v52 = vpop.eup %6772 }
 0xb29   :  { %v6775_v11 = vpop.eup %6774  ;;  %v5251_v30 = vmul.f32 0.5, %v6773_v52 }
 0xb2a   :  { %v5255_v22 = vmul.f32 0.5, %v6775_v11  ;;  %v6777_v42 = vpop.eup %6776 }
 0xb2b   :  { %v5252_v15 = vadd.f32 0.5, %v5251_v30  ;;  %v6779_v4 = vpop.eup %6778 }
 0xb2c   :  { %v5256_v33 = vadd.f32 0.5, %v5255_v22  ;;  %v5260_v39 = vmul.f32 0.5, %v6779_v4 }
 0xb2d   :  { %v5263_v57 = vmul.f32 %v6777_v42, %v5252_v15 }
 0xb2e   :  { %v5262_v2 = vmul.f32 %v5256_v33, %v8879_v5  ;;  %v5261_v6 = vadd.f32 0.5, %v5260_v39  ;;  %v6661_v5 = vld [vmem:[%s9024_s18 + $0x38] sm:$0xff]  }
 0xb2f   :  { %6222 = vmatpush3.bf16.msra.mxu1 %v6661_v5 }
 0xb30   :  { %v5264_v3 = vadd.f32 %v5263_v57, %v5262_v2 }
 0xb32   :  { %6780 = vtanh.f32 %v5264_v3 }
 0xb3c   :  { %v6781_v37 = vpop.eup %6780 }
 0xb3d   :  { %v5266_v61 = vmul.f32 %v6781_v37, %v5261_v6 }
 0xb3f   :  { %v5267_v44 = vpack.c.bf16 %v5266_v61, %v5266_v61 }
 0xb41   :  { %6204 = vmatmul.mubr.bf16.vlgmr.msra.gmra.mrb[68].mxu0 %v5267_v44 }
 0xc14   :  { %v5373_v34 = vpop.f32.mrb[68].mxu0 }
 0xc15   :  { %v5374_v31 = vadd.f32 %v5827_v59, %v5373_v34  ;;  %v6205_v47 = vpop.f32.mrb[69].mxu0 }
 0xc16   :  { %v5376_v7 = vpop.f32.mrb[70].mxu0 }
 0xc17   :  { %v5379_v63 = vmax.f32 %v5374_v31, 0.0  ;;  %v6206_v1 = vpop.f32.mrb[71].mxu0 }
 0xc19   :  { %v5380_v35 = vpack.c.bf16 %v5379_v63, %v5379_v63 }
 0xc1b   :  { %6224 = vmatmul.mubr.bf16.vlgmr.msra.gmra.mrb[68].mxu1 %v5380_v35 }
 0xcee   :  { %v5486_v56 = vpop.f32.mrb[68].mxu1 }
 0xcef   :  { %v5487_v60 = vadd.f32 %v5836_v51, %v5486_v56  ;;  %v6225_v58 = vpop.f32.mrb[69].mxu1 }
 0xcf0   :  { %v5489_v54 = vpop.f32.mrb[70].mxu1 }
 0xcf1   :  { %v6226_v50 = vpop.f32.mrb[71].mxu1  ;;  %5493 = vst.msk [vmem:[#allocation13] sm:$0x3] %vm5492_vm7, %v5487_v60 }
 0xcf2   :  { %6957 = shalt.err (!%p6954_p0)
}
 0xcf3   :  { %s6958_s19 = scalar_lea.hbm %s9026_s20, 32 }
 0xcf4   :  { %p6959_p1 = scmp.ne.s32.totalorder %s9026_s20, %s6958_s19  ;;  %p6962_p2 = scmp.lt.u32.totalorder %s6958_s19, %s9026_s20 }
 0xcf6   :  { %p6964_p3 = pnand %p6962_p2, %p6959_p1 }
 0xcf8   :  { %6967 = shalt.err (!%p6964_p3)
}
 0xcf9   :  { %5503 = dma.vmem_to_hbm [thread:$0]  %s5501_s22, 32, %s9026_s20, [#allocation9]  }
 0xcfa   :  { %6972 = dma.done.wait [#allocation9], 32  }
 0xcfb   :  { %6973 = vsyncadd [#allocation9], 4294967264 }
 0xcfc   :  { %5507 = vsyncpa [#allocation8], 1 }
 0xcfd   :  { %5508 = vsyncpa [#allocation11], 1 }
 0xcfe   :  { %5509 = vsyncpa [#allocation9], 1 }

</bundles_post_ra>
